<compile_context>
chip_gen: v5e
topology: v5e:2x2
jax: 0.10.0
libtpu: 0.0.40
codegen_flags: <defaults>
</compile_context>

<pallas_src>
import jax
import jax.numpy as jnp
from jax.experimental import pallas as pl
from jax.experimental.pallas import tpu as pltpu

LATENT_DIM = 20
IN_DIM = 28 * 28        # 784
HID_DIM = 400
IN_PAD = 896            # 7 * 128, lane-aligned (x / fc1 K)
HID_PAD = 512           # 4 * 128, lane-aligned hidden width
LAT_PAD = 128           # latent vector padded to one full lane group
ML_PAD = 2 * LAT_PAD    # fused mu|logvar columns (mu @ 0, logvar @ 128)
MAX_TB = 512            # batch tile cap (bf16 activations -> ~12 MiB VMEM)


def _round_up(n, m):
    return ((n + m - 1) // m) * m


def _cdiv(a, b):
    return -(-a // b)


def vae_kernel(x_ref, eps_ref,
               w1_ref, b1_ref,
               wml_ref, bml_ref,
               w3_ref, b3_ref,
               w4_ref, b4_ref,
               recon_ref, lat_ref):
    """One batch tile of the full VAE forward. bf16 weights/acts, f32 accumulation."""
    x = x_ref[...]                                               # (TB, 896) bf16

    # encode: h = relu(x @ W1 + b1)
    h = jnp.dot(x, w1_ref[...], preferred_element_type=jnp.float32) + b1_ref[...]
    h = jnp.maximum(h, 0.0).astype(jnp.bfloat16)                 # (TB, 512)

    # fused mu|logvar matmul: (TB, 256); mu in cols 0:128, logvar in cols 128:256
    ml = jnp.dot(h, wml_ref[...], preferred_element_type=jnp.float32) + bml_ref[...]
    mu = ml[:, :LAT_PAD]                                         # lane-aligned slice
    logvar = ml[:, LAT_PAD:]                                     # lane-aligned slice

    # reparametrize: z = eps * exp(0.5 * logvar) + mu
    # (padded cols: eps=0, logvar=0 -> exp=1, mu=0 -> z=0, exact)
    z = eps_ref[...] * jnp.exp(0.5 * logvar) + mu                # (TB, 128) f32

    # decode: sigmoid(relu(z @ W3 + b3) @ W4 + b4)
    h2 = jnp.dot(z.astype(jnp.bfloat16), w3_ref[...],
                 preferred_element_type=jnp.float32) + b3_ref[...]
    h2 = jnp.maximum(h2, 0.0).astype(jnp.bfloat16)               # (TB, 512)
    logits = jnp.dot(h2, w4_ref[...],
                     preferred_element_type=jnp.float32) + b4_ref[...]
    recon_ref[...] = jax.nn.sigmoid(logits)                      # (TB, 784) f32

    # packed latent slab, all stores 128-lane aligned: [mu@0 | logvar@128 | z@256]
    lat_ref[:, :ML_PAD] = ml
    lat_ref[:, ML_PAD:] = z


def init_params(key):
    """Parameter init matching nn.Linear defaults; weights stored as (in, out)."""
    def linear(k, fan_in, fan_out):
        kw, kb = jax.random.split(k)
        bound = 1.0 / jnp.sqrt(fan_in)
        w = jax.random.uniform(kw, (fan_in, fan_out), jnp.float32, -bound, bound)
        b = jax.random.uniform(kb, (1, fan_out), jnp.float32, -bound, bound)
        return w, b

    k1, k2, k3, k4, k5 = jax.random.split(key, 5)
    w1, b1 = linear(k1, IN_DIM, HID_DIM)          # fc1
    wmu, bmu = linear(k2, HID_DIM, LATENT_DIM)    # fcMu
    wlv, blv = linear(k3, HID_DIM, LATENT_DIM)    # fcLogvar
    w3, b3 = linear(k4, LATENT_DIM, HID_DIM)      # fc3
    w4, b4 = linear(k5, HID_DIM, IN_DIM)          # fc4
    return (w1, b1, wmu, bmu, wlv, blv, w3, b3, w4, b4)


def prepare_params(params):
    """Fuse/pad weights to lane-aligned layouts, cast weights to bf16.

    Padding is exact: padded x columns hit zero weight rows; padded hidden units
    get zero bias -> relu(0)=0 -> zero weight rows downstream; padded latent
    columns carry zeros all the way through.
    """
    (w1, b1, wmu, bmu, wlv, blv, w3, b3, w4, b4) = params
    bf = jnp.bfloat16

    # fc1: (784, 400) -> (896, 512)
    w1p = jnp.pad(w1, ((0, IN_PAD - IN_DIM), (0, HID_PAD - HID_DIM))).astype(bf)
    b1p = jnp.pad(b1, ((0, 0), (0, HID_PAD - HID_DIM)))

    # fused mu|logvar: (512, 256), mu cols 0:20, logvar cols 128:148
    wml = jnp.zeros((HID_PAD, ML_PAD), jnp.float32)
    wml = wml.at[:HID_DIM, :LATENT_DIM].set(wmu)
    wml = wml.at[:HID_DIM, LAT_PAD:LAT_PAD + LATENT_DIM].set(wlv)
    bml = jnp.zeros((1, ML_PAD), jnp.float32)
    bml = bml.at[:, :LATENT_DIM].set(bmu)
    bml = bml.at[:, LAT_PAD:LAT_PAD + LATENT_DIM].set(blv)

    # fc3: (20, 400) -> (128, 512)  (clean K=128 matmul)
    w3p = jnp.pad(w3, ((0, LAT_PAD - LATENT_DIM), (0, HID_PAD - HID_DIM))).astype(bf)
    b3p = jnp.pad(b3, ((0, 0), (0, HID_PAD - HID_DIM)))

    # fc4: (400, 784) -> (512, 784); output columns stay 784 (no recon padding)
    w4p = jnp.pad(w4, ((0, HID_PAD - HID_DIM), (0, 0))).astype(bf)
    b4p = b4

    return (w1p, b1p, wml.astype(bf), bml, w3p, b3p, w4p, b4p)


def _pick_tiling(B):
    """Return (tb, b_pad, n_tiles): >=2 tiles when b_pad>=16 (v7x megacore),
    rows padded only to the next multiple of 8 per tile (minimal waste)."""
    b8 = _round_up(max(B, 1), 8)
    n_tiles = max(_cdiv(b8, MAX_TB), 2 if b8 >= 16 else 1)
    tb = _round_up(_cdiv(b8, n_tiles), 8)
    b_pad = n_tiles * tb
    return tb, b_pad, n_tiles


@jax.jit
def vae_forward(x_nchw, eps, kparams):
    """Full VAE forward.

    x_nchw: (B, 1, 28, 28) float32 image (NCHW like PyTorch).
    eps:    (B, LATENT_DIM) float32 reparametrization noise.
    kparams: output of prepare_params().
    Returns (recon (B,784), mu (B,20), logvar (B,20), z (B,20)), recon f32.
    """
    B = x_nchw.shape[0]
    tb, b_pad, n_tiles = _pick_tiling(B)

    # reshape + cast + pad fused in one XLA pass (this function is jitted)
    x = x_nchw.reshape(B, IN_DIM).astype(jnp.bfloat16)           # x.view(-1, 784)
    x = jnp.pad(x, ((0, b_pad - B), (0, IN_PAD - IN_DIM)))       # (b_pad, 896) bf16
    eps_p = jnp.pad(eps.astype(jnp.float32),
                    ((0, b_pad - B), (0, LAT_PAD - LATENT_DIM)))  # (b_pad, 128) f32

    grid = (n_tiles,)
    batch_spec = lambda i: (i, 0)     # noqa: E731
    resident = lambda i: (0, 0)       # noqa: E731  (weights stay put across tiles)

    in_specs = [
        pl.BlockSpec((tb, IN_PAD), batch_spec),                  # x (bf16)
        pl.BlockSpec((tb, LAT_PAD), batch_spec),                 # eps (f32)
    ] + [pl.BlockSpec(p.shape, resident) for p in kparams]       # weights / biases

    out_specs = (
        pl.BlockSpec((tb, IN_DIM), batch_spec),                  # recon, 784 wide
        pl.BlockSpec((tb, 3 * LAT_PAD), batch_spec),             # mu|logvar|z slab
    )
    out_shape = (
        jax.ShapeDtypeStruct((b_pad, IN_DIM), jnp.float32),
        jax.ShapeDtypeStruct((b_pad, 3 * LAT_PAD), jnp.float32),
    )

    # advisory cost estimate so XLA schedules the surrounding pad/cast sensibly
    flops = 2 * b_pad * (IN_PAD * HID_PAD + HID_PAD * ML_PAD
                         + LAT_PAD * HID_PAD + HID_PAD * IN_DIM)
    transcendentals = b_pad * (IN_DIM + ML_PAD)
    weight_bytes = ((IN_PAD * HID_PAD + HID_PAD * ML_PAD
                     + LAT_PAD * HID_PAD + HID_PAD * IN_DIM) * 2
                    + (HID_PAD + ML_PAD + HID_PAD + IN_DIM) * 4)
    bytes_accessed = (b_pad * IN_PAD * 2 + b_pad * LAT_PAD * 4
                      + b_pad * IN_DIM * 4 + b_pad * 3 * LAT_PAD * 4
                      + weight_bytes)

    recon_p, lat_p = pl.pallas_call(
        vae_kernel,
        grid=grid,
        in_specs=in_specs,
        out_specs=out_specs,
        out_shape=out_shape,
        compiler_params=pltpu.CompilerParams(
            dimension_semantics=("parallel",),     # shards batch tiles across TCs
            vmem_limit_bytes=48 * 1024 * 1024,
        ),
        cost_estimate=pl.CostEstimate(flops=flops,
                                      transcendentals=transcendentals,
                                      bytes_accessed=bytes_accessed),
    )(x, eps_p, *kparams)

    recon = recon_p[:B] if b_pad != B else recon_p               # already 784 wide
    mu = lat_p[:B, :LATENT_DIM]
    logvar = lat_p[:B, LAT_PAD:LAT_PAD + LATENT_DIM]
    z = lat_p[:B, ML_PAD:ML_PAD + LATENT_DIM]
    return recon, mu, logvar, z


def vae_reference(x_nchw, eps, params):
    """Pure-JAX reference with the same bf16 weight/activation, f32-accum recipe."""
    (w1, b1, wmu, bmu, wlv, blv, w3, b3, w4, b4) = params
    bf = jnp.bfloat16
    B = x_nchw.shape[0]
    x = x_nchw.reshape(B, IN_DIM).astype(bf)
    h = jnp.maximum(
        jnp.dot(x, w1.astype(bf), preferred_element_type=jnp.float32) + b1, 0.0)
    hb = h.astype(bf)
    mu = jnp.dot(hb, wmu.astype(bf), preferred_element_type=jnp.float32) + bmu
    logvar = jnp.dot(hb, wlv.astype(bf), preferred_element_type=jnp.float32) + blv
    z = eps * jnp.exp(0.5 * logvar) + mu
    h2 = jnp.maximum(
        jnp.dot(z.astype(bf), w3.astype(bf), preferred_element_type=jnp.float32) + b3,
        0.0)
    recon = jax.nn.sigmoid(
        jnp.dot(h2.astype(bf), w4.astype(bf), preferred_element_type=jnp.float32) + b4)
    return recon, mu, logvar, z


if __name__ == "__main__":
    key = jax.random.PRNGKey(0)
    k_params, k_x, k_eps = jax.random.split(key, 3)

    B = 8
    params = init_params(k_params)
    kparams = prepare_params(params)

    x = jax.random.uniform(k_x, (B, 1, 28, 28), jnp.float32)      # NCHW image
    eps = jax.random.normal(k_eps, (B, LATENT_DIM), jnp.float32)  # reparam noise

    recon, mu, logvar, z = jax.block_until_ready(vae_forward(x, eps, kparams))

    # sanity check against pure-JAX reference (same bf16 quantization recipe)
    r_ref, mu_ref, lv_ref, z_ref = vae_reference(x, eps, params)
    for name, got, want in (("recon", recon, r_ref), ("mu", mu, mu_ref),
                            ("logvar", logvar, lv_ref), ("z", z, z_ref)):
        assert got.shape == want.shape, f"{name} shape mismatch"
        assert jnp.allclose(got, want, atol=5e-3, rtol=5e-3), f"{name} mismatch"

    print("KERNEL_OK")
</pallas_src>

<mosaic_0001>
module attributes {stable_mosaic.version = 11 : i64} {
  func.func @vae_kernel(%arg0: i32, %arg1: memref<8x896xbf16, #tpu.memory_space<vmem>>, %arg2: memref<8x128xf32, #tpu.memory_space<vmem>>, %arg3: memref<896x512xbf16, #tpu.memory_space<vmem>>, %arg4: memref<1x512xf32, #tpu.memory_space<vmem>>, %arg5: memref<512x256xbf16, #tpu.memory_space<vmem>>, %arg6: memref<1x256xf32, #tpu.memory_space<vmem>>, %arg7: memref<128x512xbf16, #tpu.memory_space<vmem>>, %arg8: memref<1x512xf32, #tpu.memory_space<vmem>>, %arg9: memref<512x784xbf16, #tpu.memory_space<vmem>>, %arg10: memref<1x784xf32, #tpu.memory_space<vmem>>, %arg11: memref<8x784xf32, #tpu.memory_space<vmem>>, %arg12: memref<8x384xf32, #tpu.memory_space<vmem>>) attributes {dimension_semantics = [#tpu.dimension_semantics<parallel>], iteration_bounds = array<i64: 1>, scalar_prefetch = 0 : i64, scratch_operands = 0 : i64, tpu.core_type = #tpu.core_type<tc>, window_params = [{transform_indices = @transform_0, window_bounds = array<i64: 8, 896>}, {transform_indices = @transform_1, window_bounds = array<i64: 8, 128>}, {pipeline_mode = #tpu.pipeline_mode<synchronous>, transform_indices = @transform_2, window_bounds = array<i64: 896, 512>}, {pipeline_mode = #tpu.pipeline_mode<synchronous>, transform_indices = @transform_3, window_bounds = array<i64: 1, 512>}, {pipeline_mode = #tpu.pipeline_mode<synchronous>, transform_indices = @transform_4, window_bounds = array<i64: 512, 256>}, {pipeline_mode = #tpu.pipeline_mode<synchronous>, transform_indices = @transform_5, window_bounds = array<i64: 1, 256>}, {pipeline_mode = #tpu.pipeline_mode<synchronous>, transform_indices = @transform_6, window_bounds = array<i64: 128, 512>}, {pipeline_mode = #tpu.pipeline_mode<synchronous>, transform_indices = @transform_7, window_bounds = array<i64: 1, 512>}, {pipeline_mode = #tpu.pipeline_mode<synchronous>, transform_indices = @transform_8, window_bounds = array<i64: 512, 784>}, {pipeline_mode = #tpu.pipeline_mode<synchronous>, transform_indices = @transform_9, window_bounds = array<i64: 1, 784>}, {transform_indices = @transform_10, window_bounds = array<i64: 8, 784>}, {transform_indices = @transform_11, window_bounds = array<i64: 8, 384>}]} {
    %c0 = arith.constant 0 : index
    %c0_0 = arith.constant 0 : index
    %0 = vector.load %arg1[%c0, %c0_0] : memref<8x896xbf16, #tpu.memory_space<vmem>>, vector<8x896xbf16>
    %c0_1 = arith.constant 0 : index
    %c0_2 = arith.constant 0 : index
    %1 = vector.load %arg3[%c0_1, %c0_2] : memref<896x512xbf16, #tpu.memory_space<vmem>>, vector<896x512xbf16>
    %cst = arith.constant dense<0.000000e+00> : vector<8x512xf32>
    %2 = tpu.matmul %0, %1, %cst {dimension_numbers = #tpu.dot_dimension_numbers<[1], [0], [0], [1], [0, 0, 1, 1], [], []>} : vector<8x896xbf16>, vector<896x512xbf16>, vector<8x512xf32> -> vector<8x512xf32>
    %c0_3 = arith.constant 0 : index
    %c0_4 = arith.constant 0 : index
    %3 = vector.load %arg4[%c0_3, %c0_4] : memref<1x512xf32, #tpu.memory_space<vmem>>, vector<1x512xf32>
    %4 = vector.broadcast %3 : vector<1x512xf32> to vector<8x512xf32>
    %5 = arith.addf %2, %4 : vector<8x512xf32>
    %cst_5 = arith.constant 0.000000e+00 : f32
    %6 = vector.broadcast %cst_5 : f32 to vector<8x512xf32>
    %7 = arith.maximumf %5, %6 : vector<8x512xf32>
    %8 = arith.truncf %7 : vector<8x512xf32> to vector<8x512xbf16>
    %c0_6 = arith.constant 0 : index
    %c0_7 = arith.constant 0 : index
    %9 = vector.load %arg5[%c0_6, %c0_7] : memref<512x256xbf16, #tpu.memory_space<vmem>>, vector<512x256xbf16>
    %cst_8 = arith.constant dense<0.000000e+00> : vector<8x256xf32>
    %10 = tpu.matmul %8, %9, %cst_8 {dimension_numbers = #tpu.dot_dimension_numbers<[1], [0], [0], [1], [0, 0, 1, 1], [], []>} : vector<8x512xbf16>, vector<512x256xbf16>, vector<8x256xf32> -> vector<8x256xf32>
    %c0_9 = arith.constant 0 : index
    %c0_10 = arith.constant 0 : index
    %11 = vector.load %arg6[%c0_9, %c0_10] : memref<1x256xf32, #tpu.memory_space<vmem>>, vector<1x256xf32>
    %12 = vector.broadcast %11 : vector<1x256xf32> to vector<8x256xf32>
    %13 = arith.addf %10, %12 : vector<8x256xf32>
    %14 = vector.extract_strided_slice %13 {offsets = [0, 0], sizes = [8, 128], strides = [1, 1]} : vector<8x256xf32> to vector<8x128xf32>
    %15 = vector.extract_strided_slice %13 {offsets = [0, 128], sizes = [8, 128], strides = [1, 1]} : vector<8x256xf32> to vector<8x128xf32>
    %c0_11 = arith.constant 0 : index
    %c0_12 = arith.constant 0 : index
    %16 = vector.load %arg2[%c0_11, %c0_12] : memref<8x128xf32, #tpu.memory_space<vmem>>, vector<8x128xf32>
    %cst_13 = arith.constant 5.000000e-01 : f32
    %17 = vector.broadcast %cst_13 : f32 to vector<8x128xf32>
    %18 = arith.mulf %17, %15 : vector<8x128xf32>
    %19 = math.exp %18 : vector<8x128xf32>
    %20 = arith.mulf %16, %19 : vector<8x128xf32>
    %21 = arith.addf %20, %14 : vector<8x128xf32>
    %22 = arith.truncf %21 : vector<8x128xf32> to vector<8x128xbf16>
    %c0_14 = arith.constant 0 : index
    %c0_15 = arith.constant 0 : index
    %23 = vector.load %arg7[%c0_14, %c0_15] : memref<128x512xbf16, #tpu.memory_space<vmem>>, vector<128x512xbf16>
    %cst_16 = arith.constant dense<0.000000e+00> : vector<8x512xf32>
    %24 = tpu.matmul %22, %23, %cst_16 {dimension_numbers = #tpu.dot_dimension_numbers<[1], [0], [0], [1], [0, 0, 1, 1], [], []>} : vector<8x128xbf16>, vector<128x512xbf16>, vector<8x512xf32> -> vector<8x512xf32>
    %c0_17 = arith.constant 0 : index
    %c0_18 = arith.constant 0 : index
    %25 = vector.load %arg8[%c0_17, %c0_18] : memref<1x512xf32, #tpu.memory_space<vmem>>, vector<1x512xf32>
    %26 = vector.broadcast %25 : vector<1x512xf32> to vector<8x512xf32>
    %27 = arith.addf %24, %26 : vector<8x512xf32>
    %cst_19 = arith.constant 0.000000e+00 : f32
    %28 = vector.broadcast %cst_19 : f32 to vector<8x512xf32>
    %29 = arith.maximumf %27, %28 : vector<8x512xf32>
    %30 = arith.truncf %29 : vector<8x512xf32> to vector<8x512xbf16>
    %c0_20 = arith.constant 0 : index
    %c0_21 = arith.constant 0 : index
    %31 = vector.load %arg9[%c0_20, %c0_21] : memref<512x784xbf16, #tpu.memory_space<vmem>>, vector<512x784xbf16>
    %cst_22 = arith.constant dense<0.000000e+00> : vector<8x784xf32>
    %32 = tpu.matmul %30, %31, %cst_22 {dimension_numbers = #tpu.dot_dimension_numbers<[1], [0], [0], [1], [0, 0, 1, 1], [], []>} : vector<8x512xbf16>, vector<512x784xbf16>, vector<8x784xf32> -> vector<8x784xf32>
    %c0_23 = arith.constant 0 : index
    %c0_24 = arith.constant 0 : index
    %33 = vector.load %arg10[%c0_23, %c0_24] : memref<1x784xf32, #tpu.memory_space<vmem>>, vector<1x784xf32>
    %34 = vector.broadcast %33 : vector<1x784xf32> to vector<8x784xf32>
    %35 = arith.addf %32, %34 : vector<8x784xf32>
    %36 = arith.negf %35 : vector<8x784xf32>
    %37 = math.exp %36 : vector<8x784xf32>
    %cst_25 = arith.constant 1.000000e+00 : f32
    %38 = vector.broadcast %cst_25 : f32 to vector<8x784xf32>
    %39 = arith.addf %38, %37 : vector<8x784xf32>
    %40 = arith.divf %38, %39 : vector<8x784xf32>
    %c0_26 = arith.constant 0 : index
    %c0_27 = arith.constant 0 : index
    %41 = vector.load %arg11[%c0_26, %c0_27] : memref<8x784xf32, #tpu.memory_space<vmem>>, vector<8x784xf32>
    tpu.vector_store %arg11[%c0_26, %c0_27], %40 {strides = array<i32>} : memref<8x784xf32, #tpu.memory_space<vmem>>, vector<8x784xf32>,
    %c0_28 = arith.constant 0 : index
    %c0_29 = arith.constant 0 : index
    %42 = vector.load %arg12[%c0_28, %c0_29] : memref<8x384xf32, #tpu.memory_space<vmem>>, vector<8x256xf32>
    tpu.vector_store %arg12[%c0_28, %c0_29], %13 {strides = array<i32>} : memref<8x384xf32, #tpu.memory_space<vmem>>, vector<8x256xf32>,
    %c0_30 = arith.constant 0 : index
    %c256 = arith.constant 256 : index
    %43 = vector.load %arg12[%c0_30, %c256] : memref<8x384xf32, #tpu.memory_space<vmem>>, vector<8x128xf32>
    tpu.vector_store %arg12[%c0_30, %c256], %21 {strides = array<i32>} : memref<8x384xf32, #tpu.memory_space<vmem>>, vector<8x128xf32>,
    return
  }
  func.func @transform_0(%arg0: i32) -> (i32, i32) {
    %c0_i32 = arith.constant 0 : i32
    %c0_i32_0 = arith.constant 0 : i32
    return %arg0, %c0_i32 : i32, i32
  }
  func.func @transform_1(%arg0: i32) -> (i32, i32) {
    %c0_i32 = arith.constant 0 : i32
    %c0_i32_0 = arith.constant 0 : i32
    return %arg0, %c0_i32 : i32, i32
  }
  func.func @transform_2(%arg0: i32) -> (i32, i32) {
    %c0_i32 = arith.constant 0 : i32
    %c0_i32_0 = arith.constant 0 : i32
    %c0_i32_1 = arith.constant 0 : i32
    return %c0_i32, %c0_i32_0 : i32, i32
  }
  func.func @transform_3(%arg0: i32) -> (i32, i32) {
    %c0_i32 = arith.constant 0 : i32
    %c0_i32_0 = arith.constant 0 : i32
    %c0_i32_1 = arith.constant 0 : i32
    return %c0_i32, %c0_i32_0 : i32, i32
  }
  func.func @transform_4(%arg0: i32) -> (i32, i32) {
    %c0_i32 = arith.constant 0 : i32
    %c0_i32_0 = arith.constant 0 : i32
    %c0_i32_1 = arith.constant 0 : i32
    return %c0_i32, %c0_i32_0 : i32, i32
  }
  func.func @transform_5(%arg0: i32) -> (i32, i32) {
    %c0_i32 = arith.constant 0 : i32
    %c0_i32_0 = arith.constant 0 : i32
    %c0_i32_1 = arith.constant 0 : i32
    return %c0_i32, %c0_i32_0 : i32, i32
  }
  func.func @transform_6(%arg0: i32) -> (i32, i32) {
    %c0_i32 = arith.constant 0 : i32
    %c0_i32_0 = arith.constant 0 : i32
    %c0_i32_1 = arith.constant 0 : i32
    return %c0_i32, %c0_i32_0 : i32, i32
  }
  func.func @transform_7(%arg0: i32) -> (i32, i32) {
    %c0_i32 = arith.constant 0 : i32
    %c0_i32_0 = arith.constant 0 : i32
    %c0_i32_1 = arith.constant 0 : i32
    return %c0_i32, %c0_i32_0 : i32, i32
  }
  func.func @transform_8(%arg0: i32) -> (i32, i32) {
    %c0_i32 = arith.constant 0 : i32
    %c0_i32_0 = arith.constant 0 : i32
    %c0_i32_1 = arith.constant 0 : i32
    return %c0_i32, %c0_i32_0 : i32, i32
  }
  func.func @transform_9(%arg0: i32) -> (i32, i32) {
    %c0_i32 = arith.constant 0 : i32
    %c0_i32_0 = arith.constant 0 : i32
    %c0_i32_1 = arith.constant 0 : i32
    return %c0_i32, %c0_i32_0 : i32, i32
  }
  func.func @transform_10(%arg0: i32) -> (i32, i32) {
    %c0_i32 = arith.constant 0 : i32
    %c0_i32_0 = arith.constant 0 : i32
    return %arg0, %c0_i32 : i32, i32
  }
  func.func @transform_11(%arg0: i32) -> (i32, i32) {
    %c0_i32 = arith.constant 0 : i32
    %c0_i32_0 = arith.constant 0 : i32
    return %arg0, %c0_i32 : i32, i32
  }
}

</mosaic_0001>

<bundles_post_ra>
// kernel: vae_forward.1
= control target key start
LH: loop header
LB: loop body
LE: loop exit
PB: predicated region body
PF: predicated region fallthrough
CT: control target
= control target key end

     0   :  { %s10805_s0 = inlined_call_operand.vmem [shape: bf16[8,896], index: 0, kind: input, shape index: {}]   ;;  %s10806_s1 = inlined_call_operand.vmem [shape: f32[8,128], index: 1, kind: input, shape index: {}]   ;;  %s10807_s2 = inlined_call_operand.vmem [shape: bf16[896,512], index: 2, kind: input, shape index: {}]   ;;  %s10808_s3 = inlined_call_operand.vmem [shape: f32[1,512], index: 3, kind: input, shape index: {}]   ;;  %s10809_s4 = inlined_call_operand.vmem [shape: bf16[512,256], index: 4, kind: input, shape index: {}]   ;;  %s10810_s5 = inlined_call_operand.vmem [shape: f32[1,256], index: 5, kind: input, shape index: {}]   ;;  %s10811_s6 = inlined_call_operand.vmem [shape: bf16[128,512], index: 6, kind: input, shape index: {}]   ;;  %s10812_s7 = inlined_call_operand.vmem [shape: f32[1,512], index: 7, kind: input, shape index: {}]   ;;  %s10813_s8 = inlined_call_operand.vmem [shape: bf16[512,784], index: 8, kind: input, shape index: {}]   ;;  %s10814_s9 = inlined_call_operand.vmem [shape: f32[1,784], index: 9, kind: input, shape index: {}]   ;;  %s10815_s10 = inlined_call_operand.hbm [shape: f32[8,784], index: 10, kind: output, shape index: {0}]   ;;  %s10816_s11 = inlined_call_operand.vmem [shape: f32[8,384], index: 11, kind: output, shape index: {1}]  }
   0x1   :  { %v4622_v0 = vld [vmem:[%s10807_s2 + $0xe0] sm:$0xf]  ;;  %v6721_v1 = vld [vmem:[%s10807_s2 + $0xec] sm:$0xf0] }
   0x2   :  { %v4750_v2 = vld [vmem:[%s10807_s2 + $0x1e0] sm:$0xf]  ;;  %v4623_v3 = vor.u32 %v6721_v1, %v4622_v0  ;;  %v6753_v4 = vld [vmem:[%s10807_s2 + $0x1ec] sm:$0xf0] }
   0x3   :  { %v4878_v5 = vld [vmem:[%s10807_s2 + $0x2e0] sm:$0xf]  ;;  %v6785_v6 = vld [vmem:[%s10807_s2 + $0x2ec] sm:$0xf0]  ;;  %v4751_v7 = vor.u32 %v6753_v4, %v4750_v2 }
   0x4   :  { %v4879_v8 = vor.u32 %v6785_v6, %v4878_v5  ;;  %v5006_v9 = vld [vmem:[%s10807_s2 + $0x3e0] sm:$0xf]  ;;  %v6817_v10 = vld [vmem:[%s10807_s2 + $0x3ec] sm:$0xf0]  ;;  %1421 = vmatpush.bf16.msra.mxu0 %v4623_v3 }
   0x5   :  { %v4606_v11 = vld [vmem:[%s10807_s2 + $0xc0] sm:$0xf]  ;;  %v5007_v12 = vor.u32 %v6817_v10, %v5006_v9  ;;  %v6717_v13 = vld [vmem:[%s10807_s2 + $0xcc] sm:$0xf0]  ;;  %1434 = vmatpush.bf16.msra.mxu1 %v4751_v7 }
   0x6   :  { %v4734_v14 = vld [vmem:[%s10807_s2 + $0x1c0] sm:$0xf]  ;;  %v6749_v15 = vld [vmem:[%s10807_s2 + $0x1cc] sm:$0xf0]  ;;  %1447 = vmatpush.bf16.msra.mxu2 %v4879_v8  ;;  %v4607_v16 = vor.u32 %v6717_v13, %v4606_v11 }
   0x7   :  { %v4735_v17 = vor.u32 %v6749_v15, %v4734_v14  ;;  %v4862_v18 = vld [vmem:[%s10807_s2 + $0x2c0] sm:$0xf]  ;;  %v6781_v19 = vld [vmem:[%s10807_s2 + $0x2cc] sm:$0xf0]  ;;  %1460 = vmatpush.bf16.msra.mxu3 %v5007_v12 }
   0x8   :  { %v4990_v20 = vld [vmem:[%s10807_s2 + $0x3c0] sm:$0xf]  ;;  %v4863_v21 = vor.u32 %v6781_v19, %v4862_v18  ;;  %v6813_v22 = vld [vmem:[%s10807_s2 + $0x3cc] sm:$0xf0]  ;;  %1422 = vmatpush.bf16.msra.mxu0 %v4607_v16 }
   0x9   :  { %v4590_v23 = vld [vmem:[%s10807_s2 + $0xa0] sm:$0xf]  ;;  %v6713_v24 = vld [vmem:[%s10807_s2 + $0xac] sm:$0xf0]  ;;  %v4991_v25 = vor.u32 %v6813_v22, %v4990_v20  ;;  %1435 = vmatpush.bf16.msra.mxu1 %v4735_v17 }
   0xa   :  { %v4718_v26 = vld [vmem:[%s10807_s2 + $0x1a0] sm:$0xf]  ;;  %v6745_v27 = vld [vmem:[%s10807_s2 + $0x1ac] sm:$0xf0]  ;;  %v4591_v29 = vor.u32 %v6713_v24, %v4590_v23  ;;  %1448 = vmatpush.bf16.msra.mxu2 %v4863_v21 }
   0xb   :  { %v4846_v28 = vld [vmem:[%s10807_s2 + $0x2a0] sm:$0xf]  ;;  %v6777_v30 = vld [vmem:[%s10807_s2 + $0x2ac] sm:$0xf0]  ;;  %v4719_v33 = vor.u32 %v6745_v27, %v4718_v26  ;;  %1461 = vmatpush.bf16.msra.mxu3 %v4991_v25 }
   0xc   :  { %v4974_v31 = vld [vmem:[%s10807_s2 + $0x3a0] sm:$0xf]  ;;  %v6809_v32 = vld [vmem:[%s10807_s2 + $0x3ac] sm:$0xf0]  ;;  %v4847_v34 = vor.u32 %v6777_v30, %v4846_v28  ;;  %1423 = vmatpush.bf16.msra.mxu0 %v4591_v29 }
   0xd   :  { %v4574_v35 = vld [vmem:[%s10807_s2 + $0x80] sm:$0xf]  ;;  %v6709_v36 = vld [vmem:[%s10807_s2 + $0x8c] sm:$0xf0]  ;;  %v4975_v38 = vor.u32 %v6809_v32, %v4974_v31  ;;  %1436 = vmatpush.bf16.msra.mxu1 %v4719_v33 }
   0xe   :  { %v4702_v37 = vld [vmem:[%s10807_s2 + $0x180] sm:$0xf]  ;;  %v6741_v39 = vld [vmem:[%s10807_s2 + $0x18c] sm:$0xf0]  ;;  %v4575_v44 = vor.u32 %v6709_v36, %v4574_v35  ;;  %1449 = vmatpush.bf16.msra.mxu2 %v4847_v34 }
   0xf   :  { %v4830_v40 = vld [vmem:[%s10807_s2 + $0x280] sm:$0xf]  ;;  %v6773_v41 = vld [vmem:[%s10807_s2 + $0x28c] sm:$0xf0]  ;;  %v4703_v45 = vor.u32 %v6741_v39, %v4702_v37  ;;  %1462 = vmatpush.bf16.msra.mxu3 %v4975_v38  ;;  %v6719_v37 = vld [vmem:[%s10807_s2 + $0xe4] sm:$0xf] }
  0x10   :  { %v4958_v42 = vld [vmem:[%s10807_s2 + $0x380] sm:$0xf]  ;;  %v6805_v43 = vld [vmem:[%s10807_s2 + $0x38c] sm:$0xf0]  ;;  %v4831_v46 = vor.u32 %v6773_v41, %v4830_v40  ;;  %1424 = vmatpush.bf16.msra.mxu0 %v4575_v44  ;;  %v4624_v38 = vld [vmem:[%s10807_s2 + $0xf0] sm:$0xf0] }
  0x11   :  { %v4558_v47 = vld [vmem:[%s10807_s2 + $0x60] sm:$0xf]  ;;  %v6705_v48 = vld [vmem:[%s10807_s2 + $0x6c] sm:$0xf0]  ;;  %v4959_v50 = vor.u32 %v6805_v43, %v4958_v42  ;;  %1437 = vmatpush.bf16.msra.mxu1 %v4703_v45 }
  0x12   :  { %v4686_v49 = vld [vmem:[%s10807_s2 + $0x160] sm:$0xf]  ;;  %v6737_v51 = vld [vmem:[%s10807_s2 + $0x16c] sm:$0xf0]  ;;  %v4559_v56 = vor.u32 %v6705_v48, %v4558_v47  ;;  %1450 = vmatpush.bf16.msra.mxu2 %v4831_v46  ;;  %v4627_v46 = vor.u32 %v6719_v37, %v4624_v38 }
  0x13   :  { %v4814_v52 = vld [vmem:[%s10807_s2 + $0x260] sm:$0xf]  ;;  %v6769_v53 = vld [vmem:[%s10807_s2 + $0x26c] sm:$0xf0]  ;;  %v4687_v57 = vor.u32 %v6737_v51, %v4686_v49  ;;  %1463 = vmatpush.bf16.msra.mxu3 %v4959_v50  ;;  %v6715_v50 = vld [vmem:[%s10807_s2 + $0xc4] sm:$0xf] }
  0x14   :  { %v4942_v54 = vld [vmem:[%s10807_s2 + $0x360] sm:$0xf]  ;;  %v6801_v55 = vld [vmem:[%s10807_s2 + $0x36c] sm:$0xf0]  ;;  %v4815_v58 = vor.u32 %v6769_v53, %v4814_v52  ;;  %1425 = vmatpush.bf16.msra.mxu0 %v4559_v56  ;;  %v4608_v51 = vld [vmem:[%s10807_s2 + $0xd0] sm:$0xf0] }
  0x15   :  { %v4542_v59 = vld [vmem:[%s10807_s2 + $0x40] sm:$0xf]  ;;  %v6701_v60 = vld [vmem:[%s10807_s2 + $0x4c] sm:$0xf0]  ;;  %v4943_v62 = vor.u32 %v6801_v55, %v4942_v54  ;;  %1438 = vmatpush.bf16.msra.mxu1 %v4687_v57 }
  0x16   :  { %v4670_v61 = vld [vmem:[%s10807_s2 + $0x140] sm:$0xf]  ;;  %v6733_v63 = vld [vmem:[%s10807_s2 + $0x14c] sm:$0xf0]  ;;  %v4543_v4 = vor.u32 %v6701_v60, %v4542_v59  ;;  %1451 = vmatpush.bf16.msra.mxu2 %v4815_v58  ;;  %v4611_v59 = vor.u32 %v6715_v50, %v4608_v51 }
  0x17   :  { %v4798_v0 = vld [vmem:[%s10807_s2 + $0x240] sm:$0xf]  ;;  %v6765_v1 = vld [vmem:[%s10807_s2 + $0x24c] sm:$0xf0]  ;;  %v4671_v5 = vor.u32 %v6733_v63, %v4670_v61  ;;  %1464 = vmatpush.bf16.msra.mxu3 %v4943_v62  ;;  %v6711_v62 = vld [vmem:[%s10807_s2 + $0xa4] sm:$0xf] }
  0x18   :  { %v4926_v2 = vld [vmem:[%s10807_s2 + $0x340] sm:$0xf]  ;;  %v6797_v3 = vld [vmem:[%s10807_s2 + $0x34c] sm:$0xf0]  ;;  %v4799_v6 = vor.u32 %v6765_v1, %v4798_v0  ;;  %1426 = vmatpush.bf16.msra.mxu0 %v4543_v4  ;;  %v4592_v63 = vld [vmem:[%s10807_s2 + $0xb0] sm:$0xf0] }
  0x19   :  { %v4526_v7 = vld [vmem:[%s10807_s2 + $0x20] sm:$0xf]  ;;  %v6697_v8 = vld [vmem:[%s10807_s2 + $0x2c] sm:$0xf0]  ;;  %v4927_v10 = vor.u32 %v6797_v3, %v4926_v2  ;;  %1439 = vmatpush.bf16.msra.mxu1 %v4671_v5  ;;  %v39_v2 = vld [vmem:[%s10805_s0 + $0x8] sm:$0xff] }
  0x1a   :  { %v4654_v9 = vld [vmem:[%s10807_s2 + $0x120] sm:$0xf]  ;;  %v6729_v11 = vld [vmem:[%s10807_s2 + $0x12c] sm:$0xf0]  ;;  %v4527_v16 = vor.u32 %v6697_v8, %v4526_v7  ;;  %1452 = vmatpush.bf16.msra.mxu2 %v4799_v6  ;;  %v282_v8 = vunpack.c.l.b16 %v39_v2 }
  0x1b   :  { %v4782_v12 = vld [vmem:[%s10807_s2 + $0x220] sm:$0xf]  ;;  %v6761_v13 = vld [vmem:[%s10807_s2 + $0x22c] sm:$0xf0]  ;;  %v4655_v19 = vor.u32 %v6729_v11, %v4654_v9  ;;  %1465 = vmatpush.bf16.msra.mxu3 %v4927_v10  ;;  %v283_v10 = vunpack.c.h.b16 %v39_v2  ;;  %v4595_v11 = vor.u32 %v6711_v62, %v4592_v63 }
  0x1c   :  { %v4910_v14 = vld [vmem:[%s10807_s2 + $0x320] sm:$0xf]  ;;  %v6793_v15 = vld [vmem:[%s10807_s2 + $0x32c] sm:$0xf0]  ;;  %v4783_v20 = vor.u32 %v6761_v13, %v4782_v12  ;;  %1427 = vmatpush.bf16.msra.mxu0 %v4527_v16  ;;  %v6707_v16 = vld [vmem:[%s10807_s2 + $0x84] sm:$0xf] }
  0x1d   :  { %v4510_v17 = vld [vmem:[%s10807_s2] sm:$0xf]  ;;  %v6693_v18 = vld [vmem:[%s10807_s2 + $0xc] sm:$0xf0]  ;;  %v4911_v24 = vor.u32 %v6793_v15, %v4910_v14  ;;  %1440 = vmatpush.bf16.msra.mxu1 %v4655_v19 }
  0x1e   :  { %v4638_v21 = vld [vmem:[%s10807_s2 + $0x100] sm:$0xf]  ;;  %v6725_v22 = vld [vmem:[%s10807_s2 + $0x10c] sm:$0xf0]  ;;  %v4511_v31 = vor.u32 %v6693_v18, %v4510_v17  ;;  %1453 = vmatpush.bf16.msra.mxu2 %v4783_v20  ;;  %v4576_v17 = vld [vmem:[%s10807_s2 + $0x90] sm:$0xf0]  ;;  %v7647_v18 = vpack.c.b16 %v282_v8, %v282_v8  ;;  %v7651_v20 = vpack.c.b16 %v283_v10, %v283_v10 }
  0x1f   :  { %v4766_v23 = vld [vmem:[%s10807_s2 + $0x200] sm:$0xf]  ;;  %v6757_v25 = vld [vmem:[%s10807_s2 + $0x20c] sm:$0xf0]  ;;  %v4639_v35 = vor.u32 %v6725_v22, %v4638_v21  ;;  %1466 = vmatpush.bf16.msra.mxu3 %v4911_v24  ;;  %v6751_v8 = vld [vmem:[%s10807_s2 + $0x1e4] sm:$0xf] }
  0x20   :  { %v4894_v26 = vld [vmem:[%s10807_s2 + $0x300] sm:$0xf]  ;;  %v6789_v27 = vld [vmem:[%s10807_s2 + $0x30c] sm:$0xf0]  ;;  %v4767_v36 = vor.u32 %v6757_v25, %v4766_v23  ;;  %1428 = vmatpush.bf16.msra.mxu0 %v4511_v31  ;;  %v6783_v10 = vld [vmem:[%s10807_s2 + $0x2e4] sm:$0xf] }
  0x21   :  { %v5134_v28 = vld [vmem:[%s10807_s2 + $0x4e0] sm:$0xf]  ;;  %v6849_v29 = vld [vmem:[%s10807_s2 + $0x4ec] sm:$0xf0]  ;;  %v4895_v39 = vor.u32 %v6789_v27, %v4894_v26  ;;  %1441 = vmatpush.bf16.msra.mxu1 %v4639_v35 }
  0x22   :  { %v5262_v30 = vld [vmem:[%s10807_s2 + $0x5e0] sm:$0xf]  ;;  %v6881_v32 = vld [vmem:[%s10807_s2 + $0x5ec] sm:$0xf0]  ;;  %v5135_v40 = vor.u32 %v6849_v29, %v5134_v28  ;;  %1454 = vmatpush.bf16.msra.mxu2 %v4767_v36  ;;  %v4579_v28 = vor.u32 %v6707_v16, %v4576_v17 }
  0x23   :  { %v5390_v33 = vld [vmem:[%s10807_s2 + $0x6e0] sm:$0xf]  ;;  %v6913_v34 = vld [vmem:[%s10807_s2 + $0x6ec] sm:$0xf0]  ;;  %v5263_v41 = vor.u32 %v6881_v32, %v5262_v30  ;;  %1467 = vmatpush.bf16.msra.mxu3 %v4895_v39  ;;  %v6703_v32 = vld [vmem:[%s10807_s2 + $0x64] sm:$0xf] }
  0x24   :  { %v5391_v42 = vor.u32 %v6913_v34, %v5390_v33  ;;  %v5118_v43 = vld [vmem:[%s10807_s2 + $0x4c0] sm:$0xf]  ;;  %v6845_v44 = vld [vmem:[%s10807_s2 + $0x4cc] sm:$0xf0]  ;;  %1473 = vmatpush.bf16.msrb.mxu0 %v5135_v40  ;;  %v4560_v33 = vld [vmem:[%s10807_s2 + $0x70] sm:$0xf0] }
  0x25   :  { %v5246_v45 = vld [vmem:[%s10807_s2 + $0x5c0] sm:$0xf]  ;;  %v6877_v47 = vld [vmem:[%s10807_s2 + $0x5cc] sm:$0xf0]  ;;  %v5119_v52 = vor.u32 %v6845_v44, %v5118_v43  ;;  %1486 = vmatpush.bf16.msrb.mxu1 %v5263_v41  ;;  %1455 = vmatmul.bf16.vlgmr.msra.gmra.mxu2 %v7647_v18  ;;  %v4563_v40 = vor.u32 %v6703_v32, %v4560_v33  ;;  %v6699_v44 = vld [vmem:[%s10807_s2 + $0x44] sm:$0xf] }
  0x26   :  { %v5374_v48 = vld [vmem:[%s10807_s2 + $0x6c0] sm:$0xf]  ;;  %v6909_v49 = vld [vmem:[%s10807_s2 + $0x6cc] sm:$0xf0]  ;;  %1499 = vmatpush.bf16.msrb.mxu2 %v5391_v42  ;;  %v5247_v54 = vor.u32 %v6877_v47, %v5246_v45  ;;  %1468 = vmatmul.bf16.vlgmr.msra.gmra.mxu3 %v7651_v20  ;;  %v4544_v45 = vld [vmem:[%s10807_s2 + $0x50] sm:$0xf0] }
  0x27   :  { %v5102_v53 = vld [vmem:[%s10807_s2 + $0x4a0] sm:$0xf]  ;;  %v5375_v55 = vor.u32 %v6909_v49, %v5374_v48  ;;  %v6841_v56 = vld [vmem:[%s10807_s2 + $0x4ac] sm:$0xf0]  ;;  %1512 = vmatpush.bf16.msrb.mxu3 %v4627_v46  ;;  %v6779_v32 = vld [vmem:[%s10807_s2 + $0x2c4] sm:$0xf] }
  0x28   :  { %v5230_v57 = vld [vmem:[%s10807_s2 + $0x5a0] sm:$0xf]  ;;  %v6873_v58 = vld [vmem:[%s10807_s2 + $0x5ac] sm:$0xf0]  ;;  %1474 = vmatpush.bf16.msrb.mxu0 %v5119_v52  ;;  %v5103_v0 = vor.u32 %v6841_v56, %v5102_v53  ;;  %v4547_v52 = vor.u32 %v6699_v44, %v4544_v45  ;;  %v6695_v56 = vld [vmem:[%s10807_s2 + $0x24] sm:$0xf] }
  0x29   :  { %v5358_v60 = vld [vmem:[%s10807_s2 + $0x6a0] sm:$0xf]  ;;  %v6905_v61 = vld [vmem:[%s10807_s2 + $0x6ac] sm:$0xf0]  ;;  %v5231_v1 = vor.u32 %v6873_v58, %v5230_v57  ;;  %1487 = vmatpush.bf16.msrb.mxu1 %v5247_v54  ;;  %v4528_v57 = vld [vmem:[%s10807_s2 + $0x30] sm:$0xf0] }
  0x2a   :  { %v38_v3 = vld [vmem:[%s10805_s0] sm:$0xff]  ;;  %1500 = vmatpush.bf16.msrb.mxu2 %v5375_v55  ;;  %v5359_v4 = vor.u32 %v6905_v61, %v5358_v60  ;;  %v6837_v6 = vld [vmem:[%s10807_s2 + $0x48c] sm:$0xf0] }
  0x2b   :  { %v5086_v5 = vld [vmem:[%s10807_s2 + $0x480] sm:$0xf]  ;;  %v280_v9 = vunpack.c.l.b16 %v38_v3  ;;  %1513 = vmatpush.bf16.msrb.mxu3 %v4611_v59  ;;  %v6869_v12 = vld [vmem:[%s10807_s2 + $0x58c] sm:$0xf0]  ;;  %v281_v15 = vunpack.c.h.b16 %v38_v3  ;;  %v41_v3 = vld [vmem:[%s10805_s0 + $0x18] sm:$0xf] }
  0x2c   :  { %v5214_v7 = vld [vmem:[%s10807_s2 + $0x580] sm:$0xf]  ;;  %v6901_v14 = vld [vmem:[%s10807_s2 + $0x68c] sm:$0xf0]  ;;  %1475 = vmatpush.bf16.msrb.mxu0 %v5103_v0  ;;  %v5087_v21 = vor.u32 %v6837_v6, %v5086_v5  ;;  %v6691_v5 = vld [vmem:[%s10807_s2 + $0x4] sm:$0xf] }
  0x2d   :  { %v5342_v13 = vld [vmem:[%s10807_s2 + $0x680] sm:$0xf]  ;;  %v7649_v19 = vpack.c.b16 %v280_v9, %v280_v9  ;;  %v7653_v22 = vpack.c.b16 %v281_v15, %v281_v15  ;;  %1488 = vmatpush.bf16.msrb.mxu1 %v5231_v1  ;;  %v5215_v23 = vor.u32 %v6869_v12, %v5214_v7  ;;  %v6833_v26 = vld [vmem:[%s10807_s2 + $0x46c] sm:$0xf0]  ;;  %v4512_v6 = vld [vmem:[%s10807_s2 + $0x10] sm:$0xf0]  ;;  %v286_v15 = vunpack.c.l.b16 %v41_v3 }
  0x2e   :  { %1501 = vmatpush.bf16.msrb.mxu2 %v5359_v4  ;;  %v5343_v24 = vor.u32 %v6901_v14, %v5342_v13  ;;  %v5070_v25 = vld [vmem:[%s10807_s2 + $0x460] sm:$0xf]  ;;  %v6865_v29 = vld [vmem:[%s10807_s2 + $0x56c] sm:$0xf0]  ;;  %v4531_v4 = vor.u32 %v6695_v56, %v4528_v57  ;;  %v4752_v9 = vld [vmem:[%s10807_s2 + $0x1f0] sm:$0xf0] }
  0x2f   :  { %v5198_v27 = vld [vmem:[%s10807_s2 + $0x560] sm:$0xf]  ;;  %1514 = vmatpush.bf16.msrb.mxu3 %v4595_v11  ;;  %v6897_v31 = vld [vmem:[%s10807_s2 + $0x66c] sm:$0xf0]  ;;  %1429 = vmatmul.bf16.vlgmr.msra.gmra.mxu0 %v7649_v19  ;;  %v5071_v34 = vor.u32 %v6833_v26, %v5070_v25  ;;  %v4880_v12 = vld [vmem:[%s10807_s2 + $0x2f0] sm:$0xf0]  ;;  %v4515_v26 = vor.u32 %v6691_v5, %v4512_v6 }
  0x30   :  { %v5326_v30 = vld [vmem:[%s10807_s2 + $0x660] sm:$0xf]  ;;  %1476 = vmatpush.bf16.msrb.mxu0 %v5087_v21  ;;  %1442 = vmatmul.bf16.vlgmr.msra.gmra.mxu1 %v7653_v22  ;;  %v5199_v35 = vor.u32 %v6865_v29, %v5198_v27  ;;  %v6829_v38 = vld [vmem:[%s10807_s2 + $0x44c] sm:$0xf0]  ;;  %v6815_v13 = vld [vmem:[%s10807_s2 + $0x3e4] sm:$0xf]  ;;  %v4755_v27 = vor.u32 %v6751_v8, %v4752_v9 }
  0x31   :  { %1489 = vmatpush.bf16.msrb.mxu1 %v5215_v23  ;;  %v5327_v36 = vor.u32 %v6897_v31, %v5326_v30  ;;  %v5054_v37 = vld [vmem:[%s10807_s2 + $0x440] sm:$0xf]  ;;  %v6861_v41 = vld [vmem:[%s10807_s2 + $0x54c] sm:$0xf0]  ;;  %v5008_v14 = vld [vmem:[%s10807_s2 + $0x3f0] sm:$0xf0] }
  0x32   :  { %1502 = vmatpush.bf16.msrb.mxu2 %v5343_v24  ;;  %v5182_v39 = vld [vmem:[%s10807_s2 + $0x540] sm:$0xf]  ;;  %v6893_v43 = vld [vmem:[%s10807_s2 + $0x64c] sm:$0xf0]  ;;  %v5055_v46 = vor.u32 %v6829_v38, %v5054_v37  ;;  %v6847_v21 = vld [vmem:[%s10807_s2 + $0x4e4] sm:$0xf]  ;;  %v5011_v29 = vor.u32 %v6815_v13, %v5008_v14  ;;  %v7803_v37 = vpack.c.b16 %v286_v15, %v286_v15 }
  0x33   :  { %1515 = vmatpush.bf16.msrb.mxu3 %v4579_v28  ;;  %v5310_v42 = vld [vmem:[%s10807_s2 + $0x640] sm:$0xf]  ;;  %v5183_v47 = vor.u32 %v6861_v41, %v5182_v39  ;;  %v6825_v50 = vld [vmem:[%s10807_s2 + $0x42c] sm:$0xf0]  ;;  %v5136_v23 = vld [vmem:[%s10807_s2 + $0x4f0] sm:$0xf0]  ;;  %v4883_v28 = vor.u32 %v6783_v10, %v4880_v12 }
  0x34   :  { %1477 = vmatpush.bf16.msrb.mxu0 %v5071_v34  ;;  %v5311_v48 = vor.u32 %v6893_v43, %v5310_v42  ;;  %v5038_v49 = vld [vmem:[%s10807_s2 + $0x420] sm:$0xf]  ;;  %v6857_v53 = vld [vmem:[%s10807_s2 + $0x52c] sm:$0xf0]  ;;  %v6747_v30 = vld [vmem:[%s10807_s2 + $0x1c4] sm:$0xf]  ;;  %v5139_v33 = vor.u32 %v6847_v21, %v5136_v23 }
  0x35   :  { %1490 = vmatpush.bf16.msrb.mxu1 %v5199_v35  ;;  %v5166_v51 = vld [vmem:[%s10807_s2 + $0x520] sm:$0xf]  ;;  %v6889_v55 = vld [vmem:[%s10807_s2 + $0x62c] sm:$0xf0]  ;;  %v5039_v59 = vor.u32 %v6825_v50, %v5038_v49  ;;  %v4736_v31 = vld [vmem:[%s10807_s2 + $0x1d0] sm:$0xf0] }
  0x36   :  { %1503 = vmatpush.bf16.msrb.mxu2 %v5327_v36  ;;  %v5294_v54 = vld [vmem:[%s10807_s2 + $0x620] sm:$0xf]  ;;  %v6821_v60 = vld [vmem:[%s10807_s2 + $0x40c] sm:$0xf0]  ;;  %v5167_v63 = vor.u32 %v6857_v53, %v5166_v51  ;;  %v4864_v34 = vld [vmem:[%s10807_s2 + $0x2d0] sm:$0xf0]  ;;  %v4739_v42 = vor.u32 %v6747_v30, %v4736_v31 }
  0x37   :  { %1516 = vmatpush.bf16.msrb.mxu3 %v4563_v40  ;;  %v5022_v58 = vld [vmem:[%s10807_s2 + $0x400] sm:$0xf]  ;;  %v6853_v62 = vld [vmem:[%s10807_s2 + $0x50c] sm:$0xf0]  ;;  %v5295_v0 = vor.u32 %v6889_v55, %v5294_v54  ;;  %v6811_v35 = vld [vmem:[%s10807_s2 + $0x3c4] sm:$0xf]  ;;  %v4867_v43 = vor.u32 %v6779_v32, %v4864_v34 }
  0x38   :  { %1478 = vmatpush.bf16.msrb.mxu0 %v5055_v46  ;;  %v5150_v61 = vld [vmem:[%s10807_s2 + $0x500] sm:$0xf]  ;;  %v6885_v2 = vld [vmem:[%s10807_s2 + $0x60c] sm:$0xf0]  ;;  %v5023_v11 = vor.u32 %v6821_v60, %v5022_v58  ;;  %v4992_v36 = vld [vmem:[%s10807_s2 + $0x3d0] sm:$0xf0] }
  0x39   :  { %1491 = vmatpush.bf16.msrb.mxu1 %v5183_v47  ;;  %v5278_v1 = vld [vmem:[%s10807_s2 + $0x600] sm:$0xf]  ;;  %v40_v7 = vld [vmem:[%s10805_s0 + $0x10] sm:$0xff]  ;;  %v5151_v16 = vor.u32 %v6853_v62, %v5150_v61  ;;  %v6843_v38 = vld [vmem:[%s10807_s2 + $0x4c4] sm:$0xf]  ;;  %v4995_v44 = vor.u32 %v6811_v35, %v4992_v36 }
  0x3a   :  { %1504 = vmatpush.bf16.msrb.mxu2 %v5311_v48  ;;  %v5279_v17 = vor.u32 %v6885_v2, %v5278_v1  ;;  %v284_v24 = vunpack.c.l.b16 %v40_v7  ;;  %v285_v25 = vunpack.c.h.b16 %v40_v7  ;;  %v5120_v39 = vld [vmem:[%s10807_s2 + $0x4d0] sm:$0xf0]  ;;  %v6743_v45 = vld [vmem:[%s10807_s2 + $0x1a4] sm:$0xf] }
  0x3b   :  { %1517 = vmatpush.bf16.msrb.mxu3 %v4547_v52  ;;  %v4720_v46 = vld [vmem:[%s10807_s2 + $0x1b0] sm:$0xf0]  ;;  %v6775_v47 = vld [vmem:[%s10807_s2 + $0x2a4] sm:$0xf]  ;;  %v5123_v48 = vor.u32 %v6843_v38, %v5120_v39 }
  0x3c   :  { %1479 = vmatpush.bf16.msrb.mxu0 %v5039_v59  ;;  %v7811_v40 = vpack.c.b16 %v284_v24, %v284_v24  ;;  %v7813_v41 = vpack.c.b16 %v285_v25, %v285_v25  ;;  %v4848_v49 = vld [vmem:[%s10807_s2 + $0x2b0] sm:$0xf0]  ;;  %v6807_v50 = vld [vmem:[%s10807_s2 + $0x3a4] sm:$0xf]  ;;  %v4723_v54 = vor.u32 %v6743_v45, %v4720_v46 }
  0x3d   :  { %1492 = vmatpush.bf16.msrb.mxu1 %v5167_v63  ;;  %v4976_v51 = vld [vmem:[%s10807_s2 + $0x3b0] sm:$0xf0]  ;;  %v6839_v52 = vld [vmem:[%s10807_s2 + $0x4a4] sm:$0xf]  ;;  %v4851_v55 = vor.u32 %v6775_v47, %v4848_v49 }
  0x3e   :  { %1505 = vmatpush.bf16.msrb.mxu2 %v5295_v0  ;;  %v5104_v53 = vld [vmem:[%s10807_s2 + $0x4b0] sm:$0xf0]  ;;  %v4979_v56 = vor.u32 %v6807_v50, %v4976_v51  ;;  %v6739_v57 = vld [vmem:[%s10807_s2 + $0x184] sm:$0xf] }
  0x3f   :  { %1518 = vmatpush.bf16.msrb.mxu3 %v4531_v4  ;;  %v4704_v58 = vld [vmem:[%s10807_s2 + $0x190] sm:$0xf0]  ;;  %v6771_v59 = vld [vmem:[%s10807_s2 + $0x284] sm:$0xf]  ;;  %v5107_v60 = vor.u32 %v6839_v52, %v5104_v53 }
  0x40   :  { %1480 = vmatpush.bf16.msrb.mxu0 %v5023_v11  ;;  %v4832_v61 = vld [vmem:[%s10807_s2 + $0x290] sm:$0xf0]  ;;  %v6803_v62 = vld [vmem:[%s10807_s2 + $0x384] sm:$0xf]  ;;  %v4707_v2 = vor.u32 %v6739_v57, %v4704_v58 }
  0x41   :  { %1493 = vmatpush.bf16.msrb.mxu1 %v5151_v16  ;;  %v4960_v63 = vld [vmem:[%s10807_s2 + $0x390] sm:$0xf0]  ;;  %v6835_v0 = vld [vmem:[%s10807_s2 + $0x484] sm:$0xf]  ;;  %v4835_v3 = vor.u32 %v6771_v59, %v4832_v61 }
  0x42   :  { %1506 = vmatpush.bf16.msrb.mxu2 %v5279_v17  ;;  %v5088_v1 = vld [vmem:[%s10807_s2 + $0x490] sm:$0xf0]  ;;  %v4963_v4 = vor.u32 %v6803_v62, %v4960_v63  ;;  %v6735_v5 = vld [vmem:[%s10807_s2 + $0x164] sm:$0xf] }
  0x43   :  { %1519 = vmatpush.bf16.msrb.mxu3 %v4515_v26  ;;  %1481 = vmatmul.bf16.vlgmr.msrb.gmra.mxu0 %v7811_v40  ;;  %v4688_v6 = vld [vmem:[%s10807_s2 + $0x170] sm:$0xf0]  ;;  %v6767_v7 = vld [vmem:[%s10807_s2 + $0x264] sm:$0xf]  ;;  %v5091_v8 = vor.u32 %v6835_v0, %v5088_v1 }
  0x44   :  { %1525 = vmatpush.bf16.msra.mxu0 %v4755_v27  ;;  %1494 = vmatmul.bf16.vlgmr.msrb.gmra.mxu1 %v7813_v41  ;;  %v4816_v9 = vld [vmem:[%s10807_s2 + $0x270] sm:$0xf0]  ;;  %v6799_v10 = vld [vmem:[%s10807_s2 + $0x364] sm:$0xf]  ;;  %v4691_v14 = vor.u32 %v6735_v5, %v4688_v6 }
  0x45   :  { %1538 = vmatpush.bf16.msra.mxu1 %v4883_v28  ;;  %1507 = vmatmul.bf16.vlgmr.msrb.gmra.mxu2 %v7803_v37  ;;  %v4944_v11 = vld [vmem:[%s10807_s2 + $0x370] sm:$0xf0]  ;;  %v6831_v12 = vld [vmem:[%s10807_s2 + $0x464] sm:$0xf]  ;;  %v4819_v15 = vor.u32 %v6767_v7, %v4816_v9 }
  0x46   :  { %1551 = vmatpush.bf16.msra.mxu2 %v5011_v29  ;;  %1520 = vmatmul.bf16.vlgmr.msrb.gmra.mxu3 %v7649_v19  ;;  %v5072_v13 = vld [vmem:[%s10807_s2 + $0x470] sm:$0xf0]  ;;  %v4947_v16 = vor.u32 %v6799_v10, %v4944_v11  ;;  %v6731_v17 = vld [vmem:[%s10807_s2 + $0x144] sm:$0xf] }
  0x47   :  { %1564 = vmatpush.bf16.msra.mxu3 %v5139_v33  ;;  %v4672_v21 = vld [vmem:[%s10807_s2 + $0x150] sm:$0xf0]  ;;  %v6763_v23 = vld [vmem:[%s10807_s2 + $0x244] sm:$0xf]  ;;  %v5075_v24 = vor.u32 %v6831_v12, %v5072_v13 }
  0x48   :  { %1526 = vmatpush.bf16.msra.mxu0 %v4739_v42  ;;  %v4800_v25 = vld [vmem:[%s10807_s2 + $0x250] sm:$0xf0]  ;;  %v6795_v26 = vld [vmem:[%s10807_s2 + $0x344] sm:$0xf] }
  0x49   :  { %1539 = vmatpush.bf16.msra.mxu1 %v4867_v43  ;;  %v4928_v27 = vld [vmem:[%s10807_s2 + $0x350] sm:$0xf0]  ;;  %v6827_v28 = vld [vmem:[%s10807_s2 + $0x444] sm:$0xf] }
  0x4a   :  { %1552 = vmatpush.bf16.msra.mxu2 %v4995_v44  ;;  %v5056_v29 = vld [vmem:[%s10807_s2 + $0x450] sm:$0xf0] }
  0x4b   :  { %1565 = vmatpush.bf16.msra.mxu3 %v5123_v48 }
  0x4c   :  { %1527 = vmatpush.bf16.msra.mxu0 %v4723_v54 }
  0x4d   :  { %1540 = vmatpush.bf16.msra.mxu1 %v4851_v55 }
  0x4e   :  { %1553 = vmatpush.bf16.msra.mxu2 %v4979_v56 }
  0x4f   :  { %1566 = vmatpush.bf16.msra.mxu3 %v5107_v60 }
  0x50   :  { %1528 = vmatpush.bf16.msra.mxu0 %v4707_v2 }
  0x51   :  { %1541 = vmatpush.bf16.msra.mxu1 %v4835_v3 }
  0x52   :  { %1554 = vmatpush.bf16.msra.mxu2 %v4963_v4 }
  0x53   :  { %1567 = vmatpush.bf16.msra.mxu3 %v5091_v8 }
  0x54   :  { %17 = vsyncpa [#allocation3], 0  ;;  %1529 = vmatpush.bf16.msra.mxu0 %v4691_v14  ;;  %v4675_v30 = vor.u32 %v6731_v17, %v4672_v21  ;;  %v4803_v31 = vor.u32 %v6763_v23, %v4800_v25  ;;  %v4931_v32 = vor.u32 %v6795_v26, %v4928_v27  ;;  %v6727_v33 = vld [vmem:[%s10807_s2 + $0x124] sm:$0xf]  ;;  %v4656_v34 = vld [vmem:[%s10807_s2 + $0x130] sm:$0xf0]  ;;  %v5059_v36 = vor.u32 %v6827_v28, %v5056_v29 }
  0x55   :  { %1542 = vmatpush.bf16.msra.mxu1 %v4819_v15  ;;  %v6759_v35 = vld [vmem:[%s10807_s2 + $0x224] sm:$0xf]  ;;  %v4784_v38 = vld [vmem:[%s10807_s2 + $0x230] sm:$0xf0]  ;;  %v4659_v45 = vor.u32 %v6727_v33, %v4656_v34  ;;  %v4630_v62 = vld [vmem:[%s10807_s2 + $0xe8] sm:$0xf] }
  0x56   :  { %1555 = vmatpush.bf16.msra.mxu2 %v4947_v16  ;;  %v6791_v39 = vld [vmem:[%s10807_s2 + $0x324] sm:$0xf]  ;;  %v4912_v42 = vld [vmem:[%s10807_s2 + $0x330] sm:$0xf0]  ;;  %v4787_v48 = vor.u32 %v6759_v35, %v4784_v38  ;;  %v6722_v63 = vld [vmem:[%s10807_s2 + $0xf4] sm:$0xf0] }
  0x57   :  { %1568 = vmatpush.bf16.msra.mxu3 %v5075_v24  ;;  %v6823_v43 = vld [vmem:[%s10807_s2 + $0x424] sm:$0xf]  ;;  %v5040_v44 = vld [vmem:[%s10807_s2 + $0x430] sm:$0xf0]  ;;  %v4915_v49 = vor.u32 %v6791_v39, %v4912_v42  ;;  %v4758_v2 = vld [vmem:[%s10807_s2 + $0x1e8] sm:$0xf]  ;;  %v4631_v7 = vor.u32 %v6722_v63, %v4630_v62 }
  0x58   :  { %1530 = vmatpush.bf16.msra.mxu0 %v4675_v30  ;;  %v6723_v46 = vld [vmem:[%s10807_s2 + $0x104] sm:$0xf]  ;;  %v4640_v47 = vld [vmem:[%s10807_s2 + $0x110] sm:$0xf0]  ;;  %v5043_v53 = vor.u32 %v6823_v43, %v5040_v44  ;;  %v6754_v3 = vld [vmem:[%s10807_s2 + $0x1f4] sm:$0xf0] }
  0x59   :  { %1543 = vmatpush.bf16.msra.mxu1 %v4803_v31  ;;  %v6755_v50 = vld [vmem:[%s10807_s2 + $0x204] sm:$0xf]  ;;  %v4768_v51 = vld [vmem:[%s10807_s2 + $0x210] sm:$0xf0]  ;;  %v4643_v60 = vor.u32 %v6723_v46, %v4640_v47  ;;  %v4759_v11 = vor.u32 %v6754_v3, %v4758_v2  ;;  %v4614_v13 = vld [vmem:[%s10807_s2 + $0xc8] sm:$0xf] }
  0x5a   :  { %1556 = vmatpush.bf16.msra.mxu2 %v4931_v32  ;;  %v6787_v52 = vld [vmem:[%s10807_s2 + $0x304] sm:$0xf]  ;;  %v4896_v54 = vld [vmem:[%s10807_s2 + $0x310] sm:$0xf0]  ;;  %v4771_v0 = vor.u32 %v6755_v50, %v4768_v51  ;;  %v6718_v14 = vld [vmem:[%s10807_s2 + $0xd4] sm:$0xf0] }
  0x5b   :  { %1569 = vmatpush.bf16.msra.mxu3 %v5059_v36  ;;  %v6819_v55 = vld [vmem:[%s10807_s2 + $0x404] sm:$0xf]  ;;  %v5024_v56 = vld [vmem:[%s10807_s2 + $0x410] sm:$0xf0]  ;;  %v4899_v1 = vor.u32 %v6787_v52, %v4896_v54  ;;  %v4742_v15 = vld [vmem:[%s10807_s2 + $0x1c8] sm:$0xf]  ;;  %v4615_v23 = vor.u32 %v6718_v14, %v4614_v13 }
  0x5c   :  { %v6879_v57 = vld [vmem:[%s10807_s2 + $0x5e4] sm:$0xf]  ;;  %v5264_v58 = vld [vmem:[%s10807_s2 + $0x5f0] sm:$0xf0]  ;;  %1531 = vmatpush.bf16.msra.mxu0 %v4659_v45  ;;  %v5027_v4 = vor.u32 %v6819_v55, %v5024_v56  ;;  %v6750_v16 = vld [vmem:[%s10807_s2 + $0x1d4] sm:$0xf0] }
  0x5d   :  { %v6911_v59 = vld [vmem:[%s10807_s2 + $0x6e4] sm:$0xf]  ;;  %v5392_v61 = vld [vmem:[%s10807_s2 + $0x6f0] sm:$0xf0]  ;;  %1544 = vmatpush.bf16.msra.mxu1 %v4787_v48  ;;  %v5267_v5 = vor.u32 %v6879_v57, %v5264_v58  ;;  %v4743_v27 = vor.u32 %v6750_v16, %v4742_v15  ;;  %v4598_v29 = vld [vmem:[%s10807_s2 + $0xa8] sm:$0xf] }
  0x5e   :  { %1557 = vmatpush.bf16.msra.mxu2 %v4915_v49  ;;  %v5395_v6 = vor.u32 %v6911_v59, %v5392_v61  ;;  %v6875_v8 = vld [vmem:[%s10807_s2 + $0x5c4] sm:$0xf]  ;;  %v5248_v9 = vld [vmem:[%s10807_s2 + $0x5d0] sm:$0xf0]  ;;  %v6714_v30 = vld [vmem:[%s10807_s2 + $0xb4] sm:$0xf0] }
  0x5f   :  { %1570 = vmatpush.bf16.msra.mxu3 %v5043_v53  ;;  %v6907_v10 = vld [vmem:[%s10807_s2 + $0x6c4] sm:$0xf]  ;;  %v5376_v12 = vld [vmem:[%s10807_s2 + $0x6d0] sm:$0xf0]  ;;  %v5251_v17 = vor.u32 %v6875_v8, %v5248_v9  ;;  %v4726_v31 = vld [vmem:[%s10807_s2 + $0x1a8] sm:$0xf]  ;;  %v4599_v35 = vor.u32 %v6714_v30, %v4598_v29 }
  0x60   :  { %1532 = vmatpush.bf16.msra.mxu0 %v4643_v60  ;;  %v5379_v21 = vor.u32 %v6907_v10, %v5376_v12  ;;  %v6871_v24 = vld [vmem:[%s10807_s2 + $0x5a4] sm:$0xf]  ;;  %v5232_v25 = vld [vmem:[%s10807_s2 + $0x5b0] sm:$0xf0]  ;;  %v6746_v32 = vld [vmem:[%s10807_s2 + $0x1b4] sm:$0xf0] }
  0x61   :  { %1545 = vmatpush.bf16.msra.mxu1 %v4771_v0  ;;  %v6903_v26 = vld [vmem:[%s10807_s2 + $0x6a4] sm:$0xf]  ;;  %v5360_v28 = vld [vmem:[%s10807_s2 + $0x6b0] sm:$0xf0]  ;;  %v5235_v33 = vor.u32 %v6871_v24, %v5232_v25  ;;  %v4727_v42 = vor.u32 %v6746_v32, %v4726_v31  ;;  %v4582_v44 = vld [vmem:[%s10807_s2 + $0x88] sm:$0xf] }
  0x62   :  { %1558 = vmatpush.bf16.msra.mxu2 %v4899_v1  ;;  %v5363_v34 = vor.u32 %v6903_v26, %v5360_v28  ;;  %v6867_v36 = vld [vmem:[%s10807_s2 + $0x584] sm:$0xf]  ;;  %v5216_v38 = vld [vmem:[%s10807_s2 + $0x590] sm:$0xf0]  ;;  %v6710_v45 = vld [vmem:[%s10807_s2 + $0x94] sm:$0xf0] }
  0x63   :  { %1571 = vmatpush.bf16.msra.mxu3 %v5027_v4  ;;  %1533 = vmatmul.bf16.vlgmr.msra.gmra.mxu0 %v7653_v22  ;;  %v6899_v39 = vld [vmem:[%s10807_s2 + $0x684] sm:$0xf]  ;;  %v5344_v43 = vld [vmem:[%s10807_s2 + $0x690] sm:$0xf0]  ;;  %v4710_v46 = vld [vmem:[%s10807_s2 + $0x188] sm:$0xf]  ;;  %v5219_v48 = vor.u32 %v6867_v36, %v5216_v38  ;;  %v4583_v50 = vor.u32 %v6710_v45, %v4582_v44 }
  0x64   :  { %1577 = vmatpush.bf16.msrb.mxu0 %v5267_v5  ;;  %1546 = vmatmul.bf16.vlgmr.msra.gmra.mxu1 %v7647_v18  ;;  %v6742_v47 = vld [vmem:[%s10807_s2 + $0x194] sm:$0xf0]  ;;  %v5347_v49 = vor.u32 %v6899_v39, %v5344_v43  ;;  %v6863_v51 = vld [vmem:[%s10807_s2 + $0x564] sm:$0xf]  ;;  %v5200_v52 = vld [vmem:[%s10807_s2 + $0x570] sm:$0xf0] }
  0x65   :  { %1590 = vmatpush.bf16.msrb.mxu1 %v5395_v6  ;;  %1559 = vmatmul.bf16.vlgmr.msra.gmra.mxu2 %v7651_v20  ;;  %v6895_v53 = vld [vmem:[%s10807_s2 + $0x664] sm:$0xf]  ;;  %v4711_v54 = vor.u32 %v6742_v47, %v4710_v46  ;;  %v5328_v55 = vld [vmem:[%s10807_s2 + $0x670] sm:$0xf0]  ;;  %v4566_v56 = vld [vmem:[%s10807_s2 + $0x68] sm:$0xf]  ;;  %v5203_v60 = vor.u32 %v6863_v51, %v5200_v52 }
  0x66   :  { %1603 = vmatpush.bf16.msrb.mxu2 %v4631_v7  ;;  %1572 = vmatmul.bf16.vlgmr.msra.gmra.mxu3 %v7811_v40  ;;  %v6706_v57 = vld [vmem:[%s10807_s2 + $0x74] sm:$0xf0]  ;;  %v4694_v58 = vld [vmem:[%s10807_s2 + $0x168] sm:$0xf]  ;;  %v5331_v61 = vor.u32 %v6895_v53, %v5328_v55  ;;  %v6859_v63 = vld [vmem:[%s10807_s2 + $0x544] sm:$0xf] }
  0x67   :  { %1616 = vmatpush.bf16.msrb.mxu3 %v4759_v11  ;;  %v6738_v59 = vld [vmem:[%s10807_s2 + $0x174] sm:$0xf0]  ;;  %v4567_v62 = vor.u32 %v6706_v57, %v4566_v56  ;;  %v5184_v0 = vld [vmem:[%s10807_s2 + $0x550] sm:$0xf0]  ;;  %v6891_v1 = vld [vmem:[%s10807_s2 + $0x644] sm:$0xf] }
  0x68   :  { %1578 = vmatpush.bf16.msrb.mxu0 %v5251_v17  ;;  %v4695_v2 = vor.u32 %v6738_v59, %v4694_v58  ;;  %v5312_v3 = vld [vmem:[%s10807_s2 + $0x650] sm:$0xf0]  ;;  %v4550_v4 = vld [vmem:[%s10807_s2 + $0x48] sm:$0xf]  ;;  %v6702_v5 = vld [vmem:[%s10807_s2 + $0x54] sm:$0xf0]  ;;  %v5187_v8 = vor.u32 %v6859_v63, %v5184_v0 }
  0x69   :  { %1591 = vmatpush.bf16.msrb.mxu1 %v5379_v21  ;;  %v4678_v6 = vld [vmem:[%s10807_s2 + $0x148] sm:$0xf]  ;;  %v6734_v7 = vld [vmem:[%s10807_s2 + $0x154] sm:$0xf0]  ;;  %v5315_v9 = vor.u32 %v6891_v1, %v5312_v3  ;;  %v4551_v10 = vor.u32 %v6702_v5, %v4550_v4  ;;  %v6855_v11 = vld [vmem:[%s10807_s2 + $0x524] sm:$0xf] }
  0x6a   :  { %1604 = vmatpush.bf16.msrb.mxu2 %v4615_v23  ;;  %v5168_v12 = vld [vmem:[%s10807_s2 + $0x530] sm:$0xf0]  ;;  %v6887_v13 = vld [vmem:[%s10807_s2 + $0x624] sm:$0xf]  ;;  %v4679_v14 = vor.u32 %v6734_v7, %v4678_v6  ;;  %v4534_v16 = vld [vmem:[%s10807_s2 + $0x28] sm:$0xf] }
  0x6b   :  { %1617 = vmatpush.bf16.msrb.mxu3 %v4743_v27  ;;  %v5296_v15 = vld [vmem:[%s10807_s2 + $0x630] sm:$0xf0]  ;;  %v6698_v17 = vld [vmem:[%s10807_s2 + $0x34] sm:$0xf0]  ;;  %v4662_v21 = vld [vmem:[%s10807_s2 + $0x128] sm:$0xf]  ;;  %v5171_v24 = vor.u32 %v6855_v11, %v5168_v12 }
  0x6c   :  { %1579 = vmatpush.bf16.msrb.mxu0 %v5235_v33  ;;  %v6730_v23 = vld [vmem:[%s10807_s2 + $0x134] sm:$0xf0]  ;;  %v6851_v25 = vld [vmem:[%s10807_s2 + $0x504] sm:$0xf]  ;;  %v5152_v26 = vld [vmem:[%s10807_s2 + $0x510] sm:$0xf0]  ;;  %v5299_v27 = vor.u32 %v6887_v13, %v5296_v15  ;;  %v4535_v28 = vor.u32 %v6698_v17, %v4534_v16 }
  0x6d   :  { %1592 = vmatpush.bf16.msrb.mxu1 %v5363_v34  ;;  %v6883_v29 = vld [vmem:[%s10807_s2 + $0x604] sm:$0xf]  ;;  %v5280_v30 = vld [vmem:[%s10807_s2 + $0x610] sm:$0xf0]  ;;  %v4518_v31 = vld [vmem:[%s10807_s2 + $0x8] sm:$0xf]  ;;  %v4663_v32 = vor.u32 %v6730_v23, %v4662_v21 }
  0x6e   :  { %1605 = vmatpush.bf16.msrb.mxu2 %v4599_v35  ;;  %v6694_v33 = vld [vmem:[%s10807_s2 + $0x14] sm:$0xf0]  ;;  %v4646_v34 = vld [vmem:[%s10807_s2 + $0x108] sm:$0xf]  ;;  %v5283_v46 = vor.u32 %v6883_v29, %v5280_v30  ;;  %s4495_s18 = sshll.u32 %s10815_s10, 4  ;;  %s4496_s18 = int_to_ptr.hbm [resolvable:$true] %s4495_s18 }
  0x6f   :  { %1618 = vmatpush.bf16.msrb.mxu3 %v4727_v42  ;;  %v6726_v35 = vld [vmem:[%s10807_s2 + $0x114] sm:$0xf0]  ;;  %v4886_v36 = vld [vmem:[%s10807_s2 + $0x2e8] sm:$0xf]  ;;  %v5155_v42 = vor.u32 %v6851_v25, %v5152_v26  ;;  %v4519_v47 = vor.u32 %v6694_v33, %v4518_v31 }
  0x70   :  { %1580 = vmatpush.bf16.msrb.mxu0 %v5219_v48  ;;  %v6786_v38 = vld [vmem:[%s10807_s2 + $0x2f4] sm:$0xf0]  ;;  %v5014_v39 = vld [vmem:[%s10807_s2 + $0x3e8] sm:$0xf] }
  0x71   :  { %1593 = vmatpush.bf16.msrb.mxu1 %v5347_v49  ;;  %v6818_v43 = vld [vmem:[%s10807_s2 + $0x3f4] sm:$0xf0]  ;;  %v5142_v44 = vld [vmem:[%s10807_s2 + $0x4e8] sm:$0xf]  ;;  %v4887_v51 = vor.u32 %v6786_v38, %v4886_v36 }
  0x72   :  { %1606 = vmatpush.bf16.msrb.mxu2 %v4583_v50  ;;  %v6850_v45 = vld [vmem:[%s10807_s2 + $0x4f4] sm:$0xf0]  ;;  %v5270_v48 = vld [vmem:[%s10807_s2 + $0x5e8] sm:$0xf]  ;;  %v4647_v50 = vor.u32 %v6726_v35, %v4646_v34  ;;  %v5015_v52 = vor.u32 %v6818_v43, %v5014_v39 }
  0x73   :  { %1619 = vmatpush.bf16.msrb.mxu3 %v4711_v54  ;;  %v6882_v49 = vld [vmem:[%s10807_s2 + $0x5f4] sm:$0xf0]  ;;  %v5143_v53 = vor.u32 %v6850_v45, %v5142_v44  ;;  %v4870_v54 = vld [vmem:[%s10807_s2 + $0x2c8] sm:$0xf] }
  0x74   :  { %1581 = vmatpush.bf16.msrb.mxu0 %v5203_v60  ;;  %v6782_v55 = vld [vmem:[%s10807_s2 + $0x2d4] sm:$0xf0]  ;;  %v4998_v56 = vld [vmem:[%s10807_s2 + $0x3c8] sm:$0xf]  ;;  %v5271_v57 = vor.u32 %v6882_v49, %v5270_v48 }
  0x75   :  { %1594 = vmatpush.bf16.msrb.mxu1 %v5331_v61  ;;  %v6814_v58 = vld [vmem:[%s10807_s2 + $0x3d4] sm:$0xf0]  ;;  %v5126_v59 = vld [vmem:[%s10807_s2 + $0x4c8] sm:$0xf]  ;;  %v4871_v63 = vor.u32 %v6782_v55, %v4870_v54 }
  0x76   :  { %1607 = vmatpush.bf16.msrb.mxu2 %v4567_v62  ;;  %v6846_v60 = vld [vmem:[%s10807_s2 + $0x4d4] sm:$0xf0]  ;;  %v5254_v61 = vld [vmem:[%s10807_s2 + $0x5c8] sm:$0xf]  ;;  %v4999_v0 = vor.u32 %v6814_v58, %v4998_v56 }
  0x77   :  { %1620 = vmatpush.bf16.msrb.mxu3 %v4695_v2  ;;  %v6878_v62 = vld [vmem:[%s10807_s2 + $0x5d4] sm:$0xf0]  ;;  %v5127_v1 = vor.u32 %v6846_v60, %v5126_v59  ;;  %v4854_v2 = vld [vmem:[%s10807_s2 + $0x2a8] sm:$0xf] }
  0x78   :  { %1582 = vmatpush.bf16.msrb.mxu0 %v5187_v8  ;;  %v6778_v3 = vld [vmem:[%s10807_s2 + $0x2b4] sm:$0xf0]  ;;  %v4982_v4 = vld [vmem:[%s10807_s2 + $0x3a8] sm:$0xf]  ;;  %v5255_v5 = vor.u32 %v6878_v62, %v5254_v61 }
  0x79   :  { %1595 = vmatpush.bf16.msrb.mxu1 %v5315_v9  ;;  %v6810_v6 = vld [vmem:[%s10807_s2 + $0x3b4] sm:$0xf0]  ;;  %v5110_v7 = vld [vmem:[%s10807_s2 + $0x4a8] sm:$0xf]  ;;  %v4855_v11 = vor.u32 %v6778_v3, %v4854_v2 }
  0x7a   :  { %1608 = vmatpush.bf16.msrb.mxu2 %v4551_v10  ;;  %v6842_v8 = vld [vmem:[%s10807_s2 + $0x4b4] sm:$0xf0]  ;;  %v5238_v9 = vld [vmem:[%s10807_s2 + $0x5a8] sm:$0xf]  ;;  %v4983_v12 = vor.u32 %v6810_v6, %v4982_v4 }
  0x7b   :  { %1621 = vmatpush.bf16.msrb.mxu3 %v4679_v14  ;;  %v6874_v10 = vld [vmem:[%s10807_s2 + $0x5b4] sm:$0xf0]  ;;  %v5111_v13 = vor.u32 %v6842_v8, %v5110_v7  ;;  %v4838_v14 = vld [vmem:[%s10807_s2 + $0x288] sm:$0xf] }
  0x7c   :  { %1583 = vmatpush.bf16.msrb.mxu0 %v5171_v24  ;;  %v6774_v15 = vld [vmem:[%s10807_s2 + $0x294] sm:$0xf0]  ;;  %v4966_v16 = vld [vmem:[%s10807_s2 + $0x388] sm:$0xf]  ;;  %v5239_v17 = vor.u32 %v6874_v10, %v5238_v9 }
  0x7d   :  { %1596 = vmatpush.bf16.msrb.mxu1 %v5299_v27  ;;  %v6806_v21 = vld [vmem:[%s10807_s2 + $0x394] sm:$0xf0]  ;;  %v5094_v23 = vld [vmem:[%s10807_s2 + $0x488] sm:$0xf]  ;;  %v4839_v27 = vor.u32 %v6774_v15, %v4838_v14 }
  0x7e   :  { %1609 = vmatpush.bf16.msrb.mxu2 %v4535_v28  ;;  %v6838_v24 = vld [vmem:[%s10807_s2 + $0x494] sm:$0xf0]  ;;  %v5222_v25 = vld [vmem:[%s10807_s2 + $0x588] sm:$0xf]  ;;  %v4967_v28 = vor.u32 %v6806_v21, %v4966_v16  ;;  %v6720_v16 = vld [vmem:[%s10807_s2 + $0xec] sm:$0xf] }
  0x7f   :  { %1622 = vmatpush.bf16.msrb.mxu3 %v4663_v32  ;;  %v6870_v26 = vld [vmem:[%s10807_s2 + $0x594] sm:$0xf0]  ;;  %v5095_v29 = vor.u32 %v6838_v24, %v5094_v23  ;;  %v4822_v30 = vld [vmem:[%s10807_s2 + $0x268] sm:$0xf]  ;;  %v4632_v21 = vld [vmem:[%s10807_s2 + $0xf8] sm:$0xf0] }
  0x80   :  { %1584 = vmatpush.bf16.msrb.mxu0 %v5155_v42  ;;  %v6770_v31 = vld [vmem:[%s10807_s2 + $0x274] sm:$0xf0]  ;;  %v4950_v32 = vld [vmem:[%s10807_s2 + $0x368] sm:$0xf]  ;;  %v5223_v33 = vor.u32 %v6870_v26, %v5222_v25  ;;  %v6752_v23 = vld [vmem:[%s10807_s2 + $0x1ec] sm:$0xf] }
  0x81   :  { %1597 = vmatpush.bf16.msrb.mxu1 %v5283_v46  ;;  %v6802_v34 = vld [vmem:[%s10807_s2 + $0x374] sm:$0xf0]  ;;  %v5078_v35 = vld [vmem:[%s10807_s2 + $0x468] sm:$0xf]  ;;  %v4823_v42 = vor.u32 %v6770_v31, %v4822_v30  ;;  %v4760_v24 = vld [vmem:[%s10807_s2 + $0x1f8] sm:$0xf0]  ;;  %v4635_v31 = vor.u32 %v6720_v16, %v4632_v21 }
  0x82   :  { %1610 = vmatpush.bf16.msrb.mxu2 %v4519_v47  ;;  %v6834_v36 = vld [vmem:[%s10807_s2 + $0x474] sm:$0xf0]  ;;  %v5206_v38 = vld [vmem:[%s10807_s2 + $0x568] sm:$0xf]  ;;  %v4951_v43 = vor.u32 %v6802_v34, %v4950_v32  ;;  %v4763_v32 = vor.u32 %v6752_v23, %v4760_v24  ;;  %v4824_v16 = vld [vmem:[%s10807_s2 + $0x278] sm:$0xf0] }
  0x83   :  { %1623 = vmatpush.bf16.msrb.mxu3 %v4647_v50  ;;  %1585 = vmatmul.bf16.vlgmr.msrb.gmra.mxu0 %v7813_v41  ;;  %v6866_v39 = vld [vmem:[%s10807_s2 + $0x574] sm:$0xf0]  ;;  %v5079_v44 = vor.u32 %v6834_v36, %v5078_v35  ;;  %v4806_v45 = vld [vmem:[%s10807_s2 + $0x248] sm:$0xf]  ;;  %v6716_v35 = vld [vmem:[%s10807_s2 + $0xcc] sm:$0xf] }
  0x84   :  { %1629 = vmatpush.bf16.msra.mxu0 %v4887_v51  ;;  %1598 = vmatmul.bf16.vlgmr.msrb.gmra.mxu1 %v7803_v37  ;;  %v6766_v46 = vld [vmem:[%s10807_s2 + $0x254] sm:$0xf0]  ;;  %v4934_v47 = vld [vmem:[%s10807_s2 + $0x348] sm:$0xf]  ;;  %v5207_v48 = vor.u32 %v6866_v39, %v5206_v38  ;;  %v4616_v38 = vld [vmem:[%s10807_s2 + $0xd8] sm:$0xf0] }
  0x85   :  { %1642 = vmatpush.bf16.msra.mxu1 %v5015_v52  ;;  %1611 = vmatmul.bf16.vlgmr.msrb.gmra.mxu2 %v7649_v19  ;;  %v6798_v49 = vld [vmem:[%s10807_s2 + $0x354] sm:$0xf0]  ;;  %v5062_v50 = vld [vmem:[%s10807_s2 + $0x448] sm:$0xf]  ;;  %v4807_v54 = vor.u32 %v6766_v46, %v4806_v45  ;;  %v6748_v39 = vld [vmem:[%s10807_s2 + $0x1cc] sm:$0xf]  ;;  %v4619_v46 = vor.u32 %v6716_v35, %v4616_v38 }
  0x86   :  { %1655 = vmatpush.bf16.msra.mxu2 %v5143_v53  ;;  %1624 = vmatmul.bf16.vlgmr.msrb.gmra.mxu3 %v7653_v22  ;;  %v6830_v51 = vld [vmem:[%s10807_s2 + $0x454] sm:$0xf0]  ;;  %v5190_v52 = vld [vmem:[%s10807_s2 + $0x548] sm:$0xf]  ;;  %v4935_v55 = vor.u32 %v6798_v49, %v4934_v47 }
  0x87   :  { %1668 = vmatpush.bf16.msra.mxu3 %v5271_v57  ;;  %v6862_v53 = vld [vmem:[%s10807_s2 + $0x554] sm:$0xf0]  ;;  %v5063_v56 = vor.u32 %v6830_v51, %v5062_v50  ;;  %v4790_v57 = vld [vmem:[%s10807_s2 + $0x228] sm:$0xf]  ;;  %v6712_v50 = vld [vmem:[%s10807_s2 + $0xac] sm:$0xf] }
  0x88   :  { %1630 = vmatpush.bf16.msra.mxu0 %v4871_v63  ;;  %v6762_v58 = vld [vmem:[%s10807_s2 + $0x234] sm:$0xf0]  ;;  %v4918_v59 = vld [vmem:[%s10807_s2 + $0x328] sm:$0xf]  ;;  %v5191_v60 = vor.u32 %v6862_v53, %v5190_v52  ;;  %v4600_v52 = vld [vmem:[%s10807_s2 + $0xb8] sm:$0xf0] }
  0x89   :  { %1643 = vmatpush.bf16.msra.mxu1 %v4999_v0  ;;  %v6794_v61 = vld [vmem:[%s10807_s2 + $0x334] sm:$0xf0]  ;;  %v5046_v62 = vld [vmem:[%s10807_s2 + $0x428] sm:$0xf]  ;;  %v4791_v2 = vor.u32 %v6762_v58, %v4790_v57  ;;  %v6744_v53 = vld [vmem:[%s10807_s2 + $0x1ac] sm:$0xf]  ;;  %v4603_v58 = vor.u32 %v6712_v50, %v4600_v52 }
  0x8a   :  { %1656 = vmatpush.bf16.msra.mxu2 %v5127_v1  ;;  %v6826_v63 = vld [vmem:[%s10807_s2 + $0x434] sm:$0xf0]  ;;  %v5174_v0 = vld [vmem:[%s10807_s2 + $0x528] sm:$0xf] }
  0x8b   :  { %1669 = vmatpush.bf16.msra.mxu3 %v5255_v5  ;;  %v6858_v1 = vld [vmem:[%s10807_s2 + $0x534] sm:$0xf0]  ;;  %v4774_v3 = vld [vmem:[%s10807_s2 + $0x208] sm:$0xf]  ;;  %v4919_v5 = vor.u32 %v6794_v61, %v4918_v59  ;;  %v5047_v6 = vor.u32 %v6826_v63, %v5046_v62  ;;  %v6708_v62 = vld [vmem:[%s10807_s2 + $0x8c] sm:$0xf] }
  0x8c   :  { %1631 = vmatpush.bf16.msra.mxu0 %v4855_v11  ;;  %v6758_v4 = vld [vmem:[%s10807_s2 + $0x214] sm:$0xf0]  ;;  %v4902_v7 = vld [vmem:[%s10807_s2 + $0x308] sm:$0xf]  ;;  %v5175_v10 = vor.u32 %v6858_v1, %v5174_v0  ;;  %v4584_v0 = vld [vmem:[%s10807_s2 + $0x98] sm:$0xf0] }
  0x8d   :  { %1644 = vmatpush.bf16.msra.mxu1 %v4983_v12  ;;  %v6790_v8 = vld [vmem:[%s10807_s2 + $0x314] sm:$0xf0]  ;;  %v5030_v9 = vld [vmem:[%s10807_s2 + $0x408] sm:$0xf]  ;;  %v6740_v1 = vld [vmem:[%s10807_s2 + $0x18c] sm:$0xf] }
  0x8e   :  { %1657 = vmatpush.bf16.msra.mxu2 %v5111_v13  ;;  %v6822_v11 = vld [vmem:[%s10807_s2 + $0x414] sm:$0xf0]  ;;  %v5158_v12 = vld [vmem:[%s10807_s2 + $0x508] sm:$0xf]  ;;  %v4903_v25 = vor.u32 %v6790_v8, %v4902_v7 }
  0x8f   :  { %1670 = vmatpush.bf16.msra.mxu3 %v5239_v17  ;;  %v6854_v13 = vld [vmem:[%s10807_s2 + $0x514] sm:$0xf0]  ;;  %v5398_v14 = vld [vmem:[%s10807_s2 + $0x6e8] sm:$0xf]  ;;  %v4775_v17 = vor.u32 %v6758_v4, %v4774_v3  ;;  %v5031_v26 = vor.u32 %v6822_v11, %v5030_v9  ;;  %v6772_v3 = vld [vmem:[%s10807_s2 + $0x28c] sm:$0xf] }
  0x90   :  { %1632 = vmatpush.bf16.msra.mxu0 %v4839_v27  ;;  %v6914_v15 = vld [vmem:[%s10807_s2 + $0x6f4] sm:$0xf0]  ;;  %v6784_v27 = vld [vmem:[%s10807_s2 + $0x2ec] sm:$0xf]  ;;  %v4840_v4 = vld [vmem:[%s10807_s2 + $0x298] sm:$0xf0] }
  0x91   :  { %1645 = vmatpush.bf16.msra.mxu1 %v4967_v28  ;;  %v4888_v28 = vld [vmem:[%s10807_s2 + $0x2f8] sm:$0xf0]  ;;  %v5399_v30 = vor.u32 %v6914_v15, %v5398_v14  ;;  %v6910_v34 = vld [vmem:[%s10807_s2 + $0x6d4] sm:$0xf0]  ;;  %v5334_v8 = vld [vmem:[%s10807_s2 + $0x668] sm:$0xf]  ;;  %v4843_v11 = vor.u32 %v6772_v3, %v4840_v4 }
  0x92   :  { %1658 = vmatpush.bf16.msra.mxu2 %v5095_v29  ;;  %v5159_v29 = vor.u32 %v6854_v13, %v5158_v12  ;;  %v4891_v36 = vor.u32 %v6784_v27, %v4888_v28  ;;  %v6906_v49 = vld [vmem:[%s10807_s2 + $0x6b4] sm:$0xf0]  ;;  %v4568_v12 = vld [vmem:[%s10807_s2 + $0x78] sm:$0xf0]  ;;  %v6736_v13 = vld [vmem:[%s10807_s2 + $0x16c] sm:$0xf] }
  0x93   :  { %1671 = vmatpush.bf16.msra.mxu3 %v5223_v33  ;;  %v5382_v33 = vld [vmem:[%s10807_s2 + $0x6c8] sm:$0xf]  ;;  %v6902_v61 = vld [vmem:[%s10807_s2 + $0x694] sm:$0xf0]  ;;  %v4696_v14 = vld [vmem:[%s10807_s2 + $0x178] sm:$0xf0] }
  0x94   :  { %1633 = vmatpush.bf16.msra.mxu0 %v4823_v42  ;;  %v4744_v42 = vld [vmem:[%s10807_s2 + $0x1d8] sm:$0xf0]  ;;  %v5383_v45 = vor.u32 %v6910_v34, %v5382_v33  ;;  %v6898_v9 = vld [vmem:[%s10807_s2 + $0x674] sm:$0xf0]  ;;  %v6768_v15 = vld [vmem:[%s10807_s2 + $0x26c] sm:$0xf]  ;;  %v4699_v23 = vor.u32 %v6736_v13, %v4696_v14 }
  0x95   :  { %1646 = vmatpush.bf16.msra.mxu1 %v4951_v43  ;;  %v6780_v43 = vld [vmem:[%s10807_s2 + $0x2cc] sm:$0xf]  ;;  %v4747_v47 = vor.u32 %v6748_v39, %v4744_v42  ;;  %v5318_v24 = vld [vmem:[%s10807_s2 + $0x648] sm:$0xf]  ;;  %v4827_v27 = vor.u32 %v6768_v15, %v4824_v16  ;;  %v4552_v28 = vld [vmem:[%s10807_s2 + $0x58] sm:$0xf0] }
  0x96   :  { %1659 = vmatpush.bf16.msra.mxu2 %v5079_v44  ;;  %v4872_v44 = vld [vmem:[%s10807_s2 + $0x2d8] sm:$0xf0]  ;;  %v5302_v38 = vld [vmem:[%s10807_s2 + $0x628] sm:$0xf]  ;;  %v6890_v39 = vld [vmem:[%s10807_s2 + $0x634] sm:$0xf0] }
  0x97   :  { %1672 = vmatpush.bf16.msra.mxu3 %v5207_v48  ;;  %v5366_v48 = vld [vmem:[%s10807_s2 + $0x6a8] sm:$0xf]  ;;  %v4875_v51 = vor.u32 %v6780_v43, %v4872_v44  ;;  %v6696_v42 = vld [vmem:[%s10807_s2 + $0x2c] sm:$0xf]  ;;  %v5303_v50 = vor.u32 %v6890_v39, %v5302_v38  ;;  %v6886_v52 = vld [vmem:[%s10807_s2 + $0x614] sm:$0xf0] }
  0x98   :  { %1634 = vmatpush.bf16.msra.mxu0 %v4807_v54  ;;  %v4728_v54 = vld [vmem:[%s10807_s2 + $0x1b8] sm:$0xf0]  ;;  %v5367_v57 = vor.u32 %v6906_v49, %v5366_v48  ;;  %v6760_v48 = vld [vmem:[%s10807_s2 + $0x22c] sm:$0xf] }
  0x99   :  { %1647 = vmatpush.bf16.msra.mxu1 %v4935_v55  ;;  %v6776_v55 = vld [vmem:[%s10807_s2 + $0x2ac] sm:$0xf]  ;;  %v4731_v59 = vor.u32 %v6744_v53, %v4728_v54  ;;  %v4792_v49 = vld [vmem:[%s10807_s2 + $0x238] sm:$0xf0] }
  0x9a   :  { %1660 = vmatpush.bf16.msra.mxu2 %v5063_v56  ;;  %v4856_v56 = vld [vmem:[%s10807_s2 + $0x2b8] sm:$0xf0]  ;;  %v6840_v39 = vld [vmem:[%s10807_s2 + $0x4ac] sm:$0xf] }
  0x9b   :  { %1673 = vmatpush.bf16.msra.mxu3 %v5191_v60  ;;  %v5350_v60 = vld [vmem:[%s10807_s2 + $0x688] sm:$0xf]  ;;  %v4859_v63 = vor.u32 %v6776_v55, %v4856_v56  ;;  %v6692_v55 = vld [vmem:[%s10807_s2 + $0xc] sm:$0xf]  ;;  %v4520_v56 = vld [vmem:[%s10807_s2 + $0x18] sm:$0xf0] }
  0x9c   :  { %1635 = vmatpush.bf16.msra.mxu0 %v4791_v2  ;;  %v4712_v2 = vld [vmem:[%s10807_s2 + $0x198] sm:$0xf0] }
  0x9d   :  { %1648 = vmatpush.bf16.msra.mxu1 %v4919_v5  ;;  %v5351_v5 = vor.u32 %v6902_v61, %v5350_v60  ;;  %v4715_v7 = vor.u32 %v6740_v1, %v4712_v2  ;;  %v4648_v60 = vld [vmem:[%s10807_s2 + $0x118] sm:$0xf0]  ;;  %v6756_v61 = vld [vmem:[%s10807_s2 + $0x20c] sm:$0xf] }
  0x9e   :  { %1661 = vmatpush.bf16.msra.mxu2 %v5047_v6  ;;  %v4587_v6 = vor.u32 %v6708_v62, %v4584_v0  ;;  %v4776_v62 = vld [vmem:[%s10807_s2 + $0x218] sm:$0xf0]  ;;  %v6816_v0 = vld [vmem:[%s10807_s2 + $0x3ec] sm:$0xf] }
  0x9f   :  { %1674 = vmatpush.bf16.msra.mxu3 %v5175_v10  ;;  %v6704_v10 = vld [vmem:[%s10807_s2 + $0x6c] sm:$0xf]  ;;  %v5016_v1 = vld [vmem:[%s10807_s2 + $0x3f8] sm:$0xf0]  ;;  %v4779_v13 = vor.u32 %v6756_v61, %v4776_v62 }
  0xa0   :  { %1636 = vmatpush.bf16.msra.mxu0 %v4775_v17  ;;  %v5335_v17 = vor.u32 %v6898_v9, %v5334_v8  ;;  %v4571_v21 = vor.u32 %v6704_v10, %v4568_v12  ;;  %v6848_v2 = vld [vmem:[%s10807_s2 + $0x4ec] sm:$0xf]  ;;  %v5144_v4 = vld [vmem:[%s10807_s2 + $0x4f8] sm:$0xf0]  ;;  %v4523_v8 = vor.u32 %v6692_v55, %v4520_v56  ;;  %v5019_v14 = vor.u32 %v6816_v0, %v5016_v1 }
  0xa1   :  { %1649 = vmatpush.bf16.msra.mxu1 %v4903_v25  ;;  %v6894_v25 = vld [vmem:[%s10807_s2 + $0x654] sm:$0xf0]  ;;  %v6912_v10 = vld [vmem:[%s10807_s2 + $0x6ec] sm:$0xf]  ;;  %v5147_v15 = vor.u32 %v6848_v2, %v5144_v4  ;;  %v4984_v38 = vld [vmem:[%s10807_s2 + $0x3b8] sm:$0xf0] }
  0xa2   :  { %1662 = vmatpush.bf16.msra.mxu2 %v5031_v26  ;;  %v6700_v26 = vld [vmem:[%s10807_s2 + $0x4c] sm:$0xf]  ;;  %v5319_v33 = vor.u32 %v6894_v25, %v5318_v24  ;;  %v5128_v25 = vld [vmem:[%s10807_s2 + $0x4d8] sm:$0xf0] }
  0xa3   :  { %1675 = vmatpush.bf16.msra.mxu3 %v5159_v29  ;;  %1637 = vmatmul.bf16.vlgmr.msra.gmra.mxu0 %v7647_v18  ;;  %v6732_v29 = vld [vmem:[%s10807_s2 + $0x14c] sm:$0xf]  ;;  %v4555_v35 = vor.u32 %v6700_v26, %v4552_v28  ;;  %v5224_v55 = vld [vmem:[%s10807_s2 + $0x598] sm:$0xf0] }
  0xa4   :  { %1681 = vmatpush.bf16.msrb.mxu0 %v5399_v30  ;;  %1650 = vmatmul.bf16.vlgmr.msra.gmra.mxu1 %v7651_v20  ;;  %v4680_v30 = vld [vmem:[%s10807_s2 + $0x158] sm:$0xf0]  ;;  %v6876_v26 = vld [vmem:[%s10807_s2 + $0x5cc] sm:$0xf] }
  0xa5   :  { %1694 = vmatpush.bf16.msrb.mxu1 %v4635_v31  ;;  %1663 = vmatmul.bf16.vlgmr.msra.gmra.mxu2 %v7811_v40  ;;  %v6764_v31 = vld [vmem:[%s10807_s2 + $0x24c] sm:$0xf]  ;;  %v4952_v2 = vld [vmem:[%s10807_s2 + $0x378] sm:$0xf0] }
  0xa6   :  { %1707 = vmatpush.bf16.msrb.mxu2 %v4763_v32  ;;  %1676 = vmatmul.bf16.vlgmr.msra.gmra.mxu3 %v7813_v41  ;;  %v4808_v32 = vld [vmem:[%s10807_s2 + $0x258] sm:$0xf0]  ;;  %v6908_v28 = vld [vmem:[%s10807_s2 + $0x6cc] sm:$0xf] }
  0xa7   :  { %1720 = vmatpush.bf16.msrb.mxu3 %v4891_v36  ;;  %v4683_v36 = vor.u32 %v6732_v29, %v4680_v30  ;;  %v4811_v44 = vor.u32 %v6764_v31, %v4808_v32  ;;  %v5384_v29 = vld [vmem:[%s10807_s2 + $0x6d8] sm:$0xf0]  ;;  %v6900_v56 = vld [vmem:[%s10807_s2 + $0x68c] sm:$0xf] }
  0xa8   :  { %1682 = vmatpush.bf16.msrb.mxu0 %v5383_v45  ;;  %v4536_v45 = vld [vmem:[%s10807_s2 + $0x38] sm:$0xf0]  ;;  %v6800_v1 = vld [vmem:[%s10807_s2 + $0x36c] sm:$0xf] }
  0xa9   :  { %1695 = vmatpush.bf16.msrb.mxu1 %v4619_v46  ;;  %v6728_v46 = vld [vmem:[%s10807_s2 + $0x12c] sm:$0xf]  ;;  %v4539_v53 = vor.u32 %v6696_v42, %v4536_v45  ;;  %v5387_v42 = vor.u32 %v6908_v28, %v5384_v29  ;;  %v8718_v28 = vld [vmem:[%s10808_s3] sm:$0xf] }
  0xaa   :  { %1708 = vmatpush.bf16.msrb.mxu2 %v4747_v47  ;;  %v4664_v47 = vld [vmem:[%s10807_s2 + $0x138] sm:$0xf0]  ;;  %v6872_v45 = vld [vmem:[%s10807_s2 + $0x5ac] sm:$0xf] }
  0xab   :  { %1721 = vmatpush.bf16.msrb.mxu3 %v4875_v51  ;;  %v5286_v51 = vld [vmem:[%s10807_s2 + $0x608] sm:$0xf]  ;;  %v4667_v54 = vor.u32 %v6728_v46, %v4664_v47  ;;  %v5240_v46 = vld [vmem:[%s10807_s2 + $0x5b8] sm:$0xf0]  ;;  %v6904_v47 = vld [vmem:[%s10807_s2 + $0x6ac] sm:$0xf] }
  0xac   :  { %1683 = vmatpush.bf16.msrb.mxu0 %v5367_v57  ;;  %v8503_v34 = vpop.f32.mrf.mxu0  ;;  %v6724_v57 = vld [vmem:[%s10807_s2 + $0x10c] sm:$0xf]  ;;  %v5287_v3 = vor.u32 %v6886_v52, %v5286_v51  ;;  %v5243_v51 = vor.u32 %v6872_v45, %v5240_v46  ;;  %v4968_v52 = vld [vmem:[%s10807_s2 + $0x398] sm:$0xf0] }
  0xad   :  { %1696 = vmatpush.bf16.msrb.mxu1 %v4603_v58  ;;  %v8514_v43 = vpop.f32.mrf.mxu1  ;;  %v8546_v58 = vpop.f32.mrf.mxu2  ;;  %v4651_v9 = vor.u32 %v6724_v57, %v4648_v60  ;;  %v5352_v57 = vld [vmem:[%s10807_s2 + $0x698] sm:$0xf0]  ;;  %v6888_v46 = vld [vmem:[%s10807_s2 + $0x62c] sm:$0xf] }
  0xae   :  { %1709 = vmatpush.bf16.msrb.mxu2 %v4731_v59  ;;  %v4795_v59 = vor.u32 %v6760_v48, %v4792_v49  ;;  %v5368_v48 = vld [vmem:[%s10807_s2 + $0x6b8] sm:$0xf0]  ;;  %v5355_v4 = vor.u32 %v6900_v56, %v5352_v57  ;;  %v6884_v57 = vld [vmem:[%s10807_s2 + $0x60c] sm:$0xf] }
  0xaf   :  { %1722 = vmatpush.bf16.msrb.mxu3 %v4859_v63  ;;  %v8557_v63 = vpop.f32.mrf.mxu3  ;;  %v5176_v45 = vld [vmem:[%s10807_s2 + $0x538] sm:$0xf0] }
  0xb0   :  { %1684 = vmatpush.bf16.msrb.mxu0 %v5351_v5  ;;  %v6880_v5 = vld [vmem:[%s10807_s2 + $0x5ec] sm:$0xf]  ;;  %v5160_v56 = vld [vmem:[%s10807_s2 + $0x518] sm:$0xf0] }
  0xb1   :  { %1697 = vmatpush.bf16.msrb.mxu1 %v4587_v6  ;;  %v5272_v6 = vld [vmem:[%s10807_s2 + $0x5f8] sm:$0xf0] }
  0xb2   :  { %1710 = vmatpush.bf16.msrb.mxu2 %v4715_v7  ;;  %v5275_v16 = vor.u32 %v6880_v5, %v5272_v6  ;;  %v5080_v5 = vld [vmem:[%s10807_s2 + $0x478] sm:$0xf0]  ;;  %v6864_v6 = vld [vmem:[%s10807_s2 + $0x56c] sm:$0xf] }
  0xb3   :  { %1723 = vmatpush.bf16.msrb.mxu3 %v4843_v11  ;;  %v5400_v11 = vld [vmem:[%s10807_s2 + $0x6f8] sm:$0xf0] }
  0xb4   :  { %1685 = vmatpush.bf16.msrb.mxu0 %v5335_v17  ;;  %v1432_v7 = vpop.f32.mrf.mxu0  ;;  %v6812_v17 = vld [vmem:[%s10807_s2 + $0x3cc] sm:$0xf]  ;;  %v5403_v24 = vor.u32 %v6912_v10, %v5400_v11  ;;  %v4955_v10 = vor.u32 %v6800_v1, %v4952_v2 }
  0xb5   :  { %1698 = vmatpush.bf16.msrb.mxu1 %v4571_v21  ;;  %v1445_v12 = vpop.f32.mrf.mxu1  ;;  %v5000_v21 = vld [vmem:[%s10807_s2 + $0x3d8] sm:$0xf0]  ;;  %v1458_v30 = vpop.f32.mrf.mxu2 }
  0xb6   :  { %1711 = vmatpush.bf16.msrb.mxu2 %v4699_v23  ;;  %v6844_v23 = vld [vmem:[%s10807_s2 + $0x4cc] sm:$0xf]  ;;  %v5003_v31 = vor.u32 %v6812_v17, %v5000_v21  ;;  %v5208_v7 = vld [vmem:[%s10807_s2 + $0x578] sm:$0xf0] }
  0xb7   :  { %1724 = vmatpush.bf16.msrb.mxu3 %v4827_v27  ;;  %v5256_v27 = vld [vmem:[%s10807_s2 + $0x5d8] sm:$0xf0]  ;;  %v1471_v32 = vpop.f32.mrf.mxu3  ;;  %v5211_v12 = vor.u32 %v6864_v6, %v5208_v7 }
  0xb8   :  { %1686 = vmatpush.bf16.msrb.mxu0 %v5319_v33  ;;  %v5131_v33 = vor.u32 %v6844_v23, %v5128_v25  ;;  %v5064_v21 = vld [vmem:[%s10807_s2 + $0x458] sm:$0xf0]  ;;  %v6860_v23 = vld [vmem:[%s10807_s2 + $0x54c] sm:$0xf] }
  0xb9   :  { %1699 = vmatpush.bf16.msrb.mxu1 %v4555_v35  ;;  %v5259_v35 = vor.u32 %v6876_v26, %v5256_v27  ;;  %v6892_v25 = vld [vmem:[%s10807_s2 + $0x64c] sm:$0xf]  ;;  %v5320_v26 = vld [vmem:[%s10807_s2 + $0x658] sm:$0xf0] }
  0xba   :  { %1712 = vmatpush.bf16.msrb.mxu2 %v4683_v36  ;;  %v6808_v36 = vld [vmem:[%s10807_s2 + $0x3ac] sm:$0xf] }
  0xbb   :  { %1725 = vmatpush.bf16.msrb.mxu3 %v4811_v44  ;;  %v5112_v44 = vld [vmem:[%s10807_s2 + $0x4b8] sm:$0xf0]  ;;  %v4987_v49 = vor.u32 %v6808_v36, %v4984_v38  ;;  %v6824_v38 = vld [vmem:[%s10807_s2 + $0x42c] sm:$0xf] }
  0xbc   :  { %1687 = vmatpush.bf16.msrb.mxu0 %v5303_v50  ;;  %v5115_v50 = vor.u32 %v6840_v39, %v5112_v44  ;;  %v4920_v36 = vld [vmem:[%s10807_s2 + $0x338] sm:$0xf0]  ;;  %v5323_v39 = vor.u32 %v6892_v25, %v5320_v26  ;;  %v6856_v44 = vld [vmem:[%s10807_s2 + $0x52c] sm:$0xf] }
  0xbd   :  { %1700 = vmatpush.bf16.msrb.mxu1 %v4539_v53  ;;  %v5371_v53 = vor.u32 %v6904_v47, %v5368_v48  ;;  %v5304_v47 = vld [vmem:[%s10807_s2 + $0x638] sm:$0xf0]  ;;  %v268_v48 = vperm.slane %v8718_v28, 0 }
  0xbe   :  { %1713 = vmatpush.bf16.msrb.mxu2 %v4667_v54  ;;  %v6868_v54 = vld [vmem:[%s10807_s2 + $0x58c] sm:$0xf] }
  0xbf   :  { %1726 = vmatpush.bf16.msrb.mxu3 %v4795_v59  ;;  %v5227_v0 = vor.u32 %v6868_v54, %v5224_v55  ;;  %v5307_v54 = vor.u32 %v6888_v46, %v5304_v47  ;;  %v6852_v55 = vld [vmem:[%s10807_s2 + $0x50c] sm:$0xf] }
  0xc0   :  { %1688 = vmatpush.bf16.msrb.mxu0 %v5287_v3  ;;  %v8659_v60 = vpop.f32.mrf.mxu0  ;;  %v6832_v3 = vld [vmem:[%s10807_s2 + $0x46c] sm:$0xf]  ;;  %v5163_v6 = vor.u32 %v6852_v55, %v5160_v56  ;;  %v5478_v55 = vld [vmem:[%s10809_s4 + $0x90] sm:$0xf]  ;;  %v6934_v56 = vld [vmem:[%s10809_s4 + $0x94] sm:$0xf0] }
  0xc1   :  { %1701 = vmatpush.bf16.msrb.mxu1 %v4523_v8  ;;  %v8661_v61 = vpop.f32.mrf.mxu1  ;;  %v6896_v8 = vld [vmem:[%s10807_s2 + $0x66c] sm:$0xf]  ;;  %v5083_v11 = vor.u32 %v6832_v3, %v5080_v5  ;;  %v5526_v3 = vld [vmem:[%s10809_s4 + $0xf0] sm:$0xf] }
  0xc2   :  { %1714 = vmatpush.bf16.msrb.mxu2 %v4651_v9  ;;  %v5336_v9 = vld [vmem:[%s10807_s2 + $0x678] sm:$0xf0] }
  0xc3   :  { %1727 = vmatpush.bf16.msrb.mxu3 %v4779_v13  ;;  %1689 = vmatmul.bf16.vlgmr.msrb.gmra.mxu0 %v7803_v37  ;;  %v6796_v13 = vld [vmem:[%s10807_s2 + $0x34c] sm:$0xf]  ;;  %v5339_v17 = vor.u32 %v6896_v8, %v5336_v9  ;;  %v1431_v9 = vadd.f32 %v8503_v34, %v268_v48 }
  0xc4   :  { %1733 = vmatpush.bf16.msra.mxu0 %v5019_v14  ;;  %1702 = vmatmul.bf16.vlgmr.msrb.gmra.mxu1 %v7649_v19  ;;  %v5096_v19 = vld [vmem:[%s10807_s2 + $0x498] sm:$0xf0] }
  0xc5   :  { %1746 = vmatpush.bf16.msra.mxu1 %v5147_v15  ;;  %1715 = vmatmul.bf16.vlgmr.msrb.gmra.mxu2 %v7653_v22  ;;  %v6804_v22 = vld [vmem:[%s10807_s2 + $0x38c] sm:$0xf]  ;;  %v4936_v14 = vld [vmem:[%s10807_s2 + $0x358] sm:$0xf0] }
  0xc6   :  { %1759 = vmatpush.bf16.msra.mxu2 %v5275_v16  ;;  %1728 = vmatmul.bf16.vlgmr.msrb.gmra.mxu3 %v7647_v18  ;;  %v6836_v18 = vld [vmem:[%s10807_s2 + $0x48c] sm:$0xf]  ;;  %v4971_v59 = vor.u32 %v6804_v22, %v4968_v52  ;;  %v4939_v29 = vor.u32 %v6796_v13, %v4936_v14  ;;  %v5179_v22 = vor.u32 %v6856_v44, %v5176_v45  ;;  %v4904_v52 = vld [vmem:[%s10807_s2 + $0x318] sm:$0xf0]  ;;  %v5518_v13 = vld [vmem:[%s10809_s4 + $0xe0] sm:$0xf] }
  0xc7   :  { %1772 = vmatpush.bf16.msra.mxu3 %v5403_v24  ;;  %v5099_v62 = vor.u32 %v6836_v18, %v5096_v19  ;;  %v6828_v15 = vld [vmem:[%s10807_s2 + $0x44c] sm:$0xf]  ;;  %v5192_v24 = vld [vmem:[%s10807_s2 + $0x558] sm:$0xf0]  ;;  %v6944_v14 = vld [vmem:[%s10809_s4 + $0xe4] sm:$0xf0] }
  0xc8   :  { %1734 = vmatpush.bf16.msra.mxu0 %v5003_v31  ;;  %v8696_v16 = vpop.f32.mrf.mxu2  ;;  %v1484_v30 = vpop.f32.mrf.mxu0  ;;  %v5067_v32 = vor.u32 %v6828_v15, %v5064_v21  ;;  %v6820_v18 = vld [vmem:[%s10807_s2 + $0x40c] sm:$0xf]  ;;  %v1444_v15 = vadd.f32 %v8514_v43, %v1431_v9  ;;  %v6926_v21 = vld [vmem:[%s10809_s4 + $0x54] sm:$0xf0]  ;;  %v5510_v43 = vld [vmem:[%s10809_s4 + $0xd0] sm:$0xf] }
  0xc9   :  { %1747 = vmatpush.bf16.msra.mxu1 %v5131_v33  ;;  %v8713_v27 = vpop.f32.mrf.mxu3  ;;  %v1497_v31 = vpop.f32.mrf.mxu1  ;;  %v5195_v33 = vor.u32 %v6860_v23, %v5192_v24  ;;  %v5519_v23 = vor.u32 %v6944_v14, %v5518_v13  ;;  %v5422_v44 = vld [vmem:[%s10809_s4 + $0x20] sm:$0xf]  ;;  %v6920_v45 = vld [vmem:[%s10809_s4 + $0x24] sm:$0xf0]  ;;  %v6927_v13 = vld [vmem:[%s10809_s4 + $0x64] sm:$0xf] }
  0xca   :  { %1760 = vmatpush.bf16.msra.mxu2 %v5259_v35  ;;  %v6792_v35 = vld [vmem:[%s10807_s2 + $0x32c] sm:$0xf]  ;;  %v1457_v25 = vadd.f32 %v8546_v58, %v1444_v15  ;;  %v6943_v15 = vld [vmem:[%s10809_s4 + $0xe4] sm:$0xf] }
  0xcb   :  { %1773 = vmatpush.bf16.msra.mxu3 %v5387_v42  ;;  %v5048_v42 = vld [vmem:[%s10807_s2 + $0x438] sm:$0xf0]  ;;  %v5456_v14 = vld [vmem:[%s10809_s4 + $0x68] sm:$0xf0] }
  0xcc   :  { %1735 = vmatpush.bf16.msra.mxu0 %v4987_v49  ;;  %v4923_v49 = vor.u32 %v6792_v35, %v4920_v36  ;;  %v1470_v31 = vadd.f32 %v8557_v63, %v1457_v25  ;;  %v5459_v25 = vor.u32 %v6927_v13, %v5456_v14 }
  0xcd   :  { %1748 = vmatpush.bf16.msra.mxu1 %v5115_v50  ;;  %v6788_v50 = vld [vmem:[%s10807_s2 + $0x30c] sm:$0xf] }
  0xce   :  { %1761 = vmatpush.bf16.msra.mxu2 %v5243_v51  ;;  %v5051_v51 = vor.u32 %v6824_v38, %v5048_v42  ;;  %v4907_v2 = vor.u32 %v6788_v50, %v4904_v52  ;;  %v5494_v38 = vld [vmem:[%s10809_s4 + $0xb0] sm:$0xf]  ;;  %v1483_v42 = vadd.f32 %v8659_v60, %v1470_v31  ;;  %v6936_v60 = vld [vmem:[%s10809_s4 + $0xa4] sm:$0xf0]  ;;  %v269_v50 = vperm.slane %v8718_v28, 1 }
  0xcf   :  { %1774 = vmatpush.bf16.msra.mxu3 %v5371_v53  ;;  %v5032_v53 = vld [vmem:[%s10807_s2 + $0x418] sm:$0xf0] }
  0xd0   :  { %1736 = vmatpush.bf16.msra.mxu0 %v4971_v59  ;;  %v1510_v19 = vpop.f32.mrf.mxu2  ;;  %v5288_v59 = vld [vmem:[%s10807_s2 + $0x618] sm:$0xf0]  ;;  %v5035_v5 = vor.u32 %v6820_v18, %v5032_v53  ;;  %v1496_v52 = vadd.f32 %v8661_v61, %v1483_v42  ;;  %v5414_v18 = vld [vmem:[%s10809_s4 + $0x10] sm:$0xf]  ;;  %v6918_v53 = vld [vmem:[%s10809_s4 + $0x14] sm:$0xf0]  ;;  %v1522_v61 = vadd.f32 %v8713_v27, %v269_v50 }
  0xd1   :  { %1749 = vmatpush.bf16.msra.mxu1 %v5099_v62  ;;  %v5462_v62 = vld [vmem:[%s10809_s4 + $0x70] sm:$0xf]  ;;  %v1523_v1 = vpop.f32.mrf.mxu3  ;;  %v5291_v7 = vor.u32 %v6884_v57, %v5288_v59  ;;  %v5415_v57 = vor.u32 %v6918_v53, %v5414_v18  ;;  %v5464_v27 = vld [vmem:[%s10809_s4 + $0x78] sm:$0xf0]  ;;  %v6939_v42 = vld [vmem:[%s10809_s4 + $0xc4] sm:$0xf] }
  0xd2   :  { %1762 = vmatpush.bf16.msra.mxu2 %v5227_v0  ;;  %v6930_v0 = vld [vmem:[%s10809_s4 + $0x74] sm:$0xf0]  ;;  %v1509_v59 = vadd.f32 %v8696_v16, %v1496_v52  ;;  %v5479_v1 = vor.u32 %v6934_v56, %v5478_v55  ;;  %v5470_v16 = vld [vmem:[%s10809_s4 + $0x80] sm:$0xf]  ;;  %v5512_v31 = vld [vmem:[%s10809_s4 + $0xd8] sm:$0xf0] }
  0xd3   :  { %1775 = vmatpush.bf16.msra.mxu3 %v5355_v4  ;;  %v6946_v4 = vld [vmem:[%s10809_s4 + $0xf4] sm:$0xf0]  ;;  %v5463_v8 = vor.u32 %v6930_v0, %v5462_v62  ;;  %v5406_v62 = vld [vmem:[%s10809_s4] sm:$0xf]  ;;  %v6916_v0 = vld [vmem:[%s10809_s4 + $0x4] sm:$0xf0] }
  0xd4   :  { %1737 = vmatpush.bf16.msra.mxu0 %v4955_v10  ;;  %v5454_v10 = vld [vmem:[%s10809_s4 + $0x60] sm:$0xf]  ;;  %v5407_v9 = vor.u32 %v6916_v0, %v5406_v62  ;;  %v6921_v52 = vld [vmem:[%s10809_s4 + $0x34] sm:$0xf]  ;;  %v5432_v18 = vld [vmem:[%s10809_s4 + $0x38] sm:$0xf0] }
  0xd5   :  { %1750 = vmatpush.bf16.msra.mxu1 %v5083_v11  ;;  %v6928_v11 = vld [vmem:[%s10809_s4 + $0x64] sm:$0xf0]  ;;  %v6937_v56 = vld [vmem:[%s10809_s4 + $0xb4] sm:$0xf]  ;;  %v6919_v62 = vld [vmem:[%s10809_s4 + $0x24] sm:$0xf] }
  0xd6   :  { %1763 = vmatpush.bf16.msra.mxu2 %v5211_v12  ;;  %v5527_v12 = vor.u32 %v6946_v4, %v5526_v3  ;;  %v5455_v34 = vor.u32 %v6928_v11, %v5454_v10  ;;  %v6932_v4 = vld [vmem:[%s10809_s4 + $0x84] sm:$0xf0]  ;;  %v1785_v10 = vmax.f32 %v1509_v59, 0.0  ;;  %v5424_v0 = vld [vmem:[%s10809_s4 + $0x28] sm:$0xf0] }
  0xd7   :  { %1776 = vmatpush.bf16.msra.mxu3 %v5339_v17  ;;  %v5446_v17 = vld [vmem:[%s10809_s4 + $0x50] sm:$0xf] }
  0xd8   :  { %1738 = vmatpush.bf16.msra.mxu0 %v4939_v29  ;;  %v5447_v24 = vor.u32 %v6926_v21, %v5446_v17  ;;  %v5502_v29 = vld [vmem:[%s10809_s4 + $0xc0] sm:$0xf]  ;;  %v5520_v17 = vld [vmem:[%s10809_s4 + $0xe8] sm:$0xf0]  ;;  %v5590_v21 = vld [vmem:[%s10809_s4 + $0x170] sm:$0xf] }
  0xd9   :  { %1751 = vmatpush.bf16.msra.mxu1 %v5067_v32  ;;  %v5430_v32 = vld [vmem:[%s10809_s4 + $0x30] sm:$0xf] }
  0xda   :  { %1764 = vmatpush.bf16.msra.mxu2 %v5195_v33  ;;  %v6922_v33 = vld [vmem:[%s10809_s4 + $0x34] sm:$0xf0] }
  0xdb   :  { %1777 = vmatpush.bf16.msra.mxu3 %v5323_v39  ;;  %v6938_v39 = vld [vmem:[%s10809_s4 + $0xb4] sm:$0xf0]  ;;  %v5431_v63 = vor.u32 %v6922_v33, %v5430_v32  ;;  %v5574_v32 = vld [vmem:[%s10809_s4 + $0x150] sm:$0xf] }
  0xdc   :  { %1739 = vmatpush.bf16.msra.mxu0 %v4923_v49  ;;  %v5495_v46 = vor.u32 %v6938_v39, %v5494_v38  ;;  %v5486_v49 = vld [vmem:[%s10809_s4 + $0xa0] sm:$0xf]  ;;  %v6958_v33 = vld [vmem:[%s10809_s4 + $0x154] sm:$0xf0]  ;;  %v6923_v38 = vld [vmem:[%s10809_s4 + $0x44] sm:$0xf] }
  0xdd   :  { %1752 = vmatpush.bf16.msra.mxu1 %v5051_v51  ;;  %v5423_v51 = vor.u32 %v6920_v45, %v5422_v44  ;;  %v5487_v19 = vor.u32 %v6936_v60, %v5486_v49  ;;  %v5440_v39 = vld [vmem:[%s10809_s4 + $0x48] sm:$0xf0]  ;;  %v5575_v44 = vor.u32 %v6958_v33, %v5574_v32 }
  0xde   :  { %1765 = vmatpush.bf16.msra.mxu2 %v5179_v22  ;;  %v5504_v45 = vld [vmem:[%s10809_s4 + $0xc8] sm:$0xf0]  ;;  %v5443_v50 = vor.u32 %v6923_v38, %v5440_v39  ;;  %v6959_v39 = vld [vmem:[%s10809_s4 + $0x164] sm:$0xf] }
  0xdf   :  { %1778 = vmatpush.bf16.msra.mxu3 %v5307_v54  ;;  %v5507_v53 = vor.u32 %v6939_v42, %v5504_v45  ;;  %v6978_v45 = vld [vmem:[%s10809_s4 + $0x1f4] sm:$0xf0] }
  0xe0   :  { %1740 = vmatpush.bf16.msra.mxu0 %v4907_v2  ;;  %v1534_v30 = vpop.f32.mrf.mxu0  ;;  %v6929_v2 = vld [vmem:[%s10809_s4 + $0x74] sm:$0xf] }
  0xe1   :  { %1753 = vmatpush.bf16.msra.mxu1 %v5035_v5  ;;  %v1547_v36 = vpop.f32.mrf.mxu1  ;;  %v5467_v11 = vor.u32 %v6929_v2, %v5464_v27  ;;  %v6952_v27 = vld [vmem:[%s10809_s4 + $0x124] sm:$0xf0] }
  0xe2   :  { %1766 = vmatpush.bf16.msra.mxu2 %v5163_v6  ;;  %v6945_v6 = vld [vmem:[%s10809_s4 + $0xf4] sm:$0xf] }
  0xe3   :  { %1779 = vmatpush.bf16.msra.mxu3 %v5291_v7  ;;  %1741 = vmatmul.bf16.vlgmr.msra.gmra.mxu0 %v7651_v20  ;;  %v6942_v20 = vld [vmem:[%s10809_s4 + $0xd4] sm:$0xf0]  ;;  %v5528_v7 = vld [vmem:[%s10809_s4 + $0xf8] sm:$0xf0] }
  0xe4   :  { %2183 = vmatpush.bf16.msrb.mxu0 %v5463_v8  ;;  %1754 = vmatmul.bf16.vlgmr.msra.gmra.mxu1 %v7811_v40  ;;  %v5438_v40 = vld [vmem:[%s10809_s4 + $0x40] sm:$0xf]  ;;  %v5511_v26 = vor.u32 %v6942_v20, %v5510_v43  ;;  %v1535_v8 = vadd.f32 %v1534_v30, %v1522_v61  ;;  %v5496_v61 = vld [vmem:[%s10809_s4 + $0xb8] sm:$0xf0] }
  0xe5   :  { %2196 = vmatpush.bf16.msrb.mxu1 %v5527_v12  ;;  %1767 = vmatmul.bf16.vlgmr.msra.gmra.mxu2 %v7813_v41  ;;  %v6924_v41 = vld [vmem:[%s10809_s4 + $0x44] sm:$0xf0]  ;;  %v5471_v12 = vor.u32 %v6932_v4, %v5470_v16  ;;  %v5499_v2 = vor.u32 %v6937_v56, %v5496_v61  ;;  %v6935_v4 = vld [vmem:[%s10809_s4 + $0xa4] sm:$0xf]  ;;  %v6953_v56 = vld [vmem:[%s10809_s4 + $0x134] sm:$0xf] }
  0xe6   :  { %1780 = vmatmul.bf16.vlgmr.msra.gmra.mxu3 %v7803_v37  ;;  %v6940_v37 = vld [vmem:[%s10809_s4 + $0xc4] sm:$0xf0]  ;;  %v5439_v58 = vor.u32 %v6924_v41, %v5438_v40  ;;  %v1548_v43 = vadd.f32 %v1547_v36, %v1535_v8  ;;  %v5582_v40 = vld [vmem:[%s10809_s4 + $0x160] sm:$0xf] }
  0xe7   :  { %v5503_v35 = vor.u32 %v6940_v37, %v5502_v29  ;;  %v6960_v41 = vld [vmem:[%s10809_s4 + $0x164] sm:$0xf0]  ;;  %v5448_v29 = vld [vmem:[%s10809_s4 + $0x58] sm:$0xf0]  ;;  %v5523_v37 = vor.u32 %v6943_v15, %v5520_v17  ;;  %v6950_v15 = vld [vmem:[%s10809_s4 + $0x114] sm:$0xf0] }
  0xe8   :  { %2184 = vmatpush.bf16.msrb.mxu0 %v5455_v34  ;;  %v8844_v47 = vpop.f32.mrf.mxu2  ;;  %v1536_v22 = vpop.f32.mrf.mxu0  ;;  %v5531_v34 = vor.u32 %v6945_v6, %v5528_v7  ;;  %v5583_v30 = vor.u32 %v6960_v41, %v5582_v40  ;;  %v5427_v7 = vor.u32 %v6919_v62, %v5424_v0  ;;  %v6933_v17 = vld [vmem:[%s10809_s4 + $0x94] sm:$0xf]  ;;  %v6931_v41 = vld [vmem:[%s10809_s4 + $0x84] sm:$0xf]  ;;  %v5630_v62 = vld [vmem:[%s10809_s4 + $0x1c0] sm:$0xf] }
  0xe9   :  { %2197 = vmatpush.bf16.msrb.mxu1 %v5519_v23  ;;  %v8846_v48 = vpop.f32.mrf.mxu3  ;;  %v1549_v54 = vpop.f32.mrf.mxu1  ;;  %v6962_v23 = vld [vmem:[%s10809_s4 + $0x174] sm:$0xf0] }
  0xea   :  { %v5591_v20 = vor.u32 %v6962_v23, %v5590_v21  ;;  %v6954_v54 = vld [vmem:[%s10809_s4 + $0x134] sm:$0xf0]  ;;  %v5480_v21 = vld [vmem:[%s10809_s4 + $0x98] sm:$0xf0] }
  0xeb   :  { %v5483_v40 = vor.u32 %v6933_v17, %v5480_v21  ;;  %v6968_v17 = vld [vmem:[%s10809_s4 + $0x1a4] sm:$0xf0] }
  0xec   :  { %2185 = vmatpush.bf16.msrb.mxu0 %v5447_v24  ;;  %v8912_v24 = vpack.c.bf16 %v1785_v10, %v1785_v10  ;;  %2209 = vmatpush.bf16.msrb.mxu2 %v5591_v20  ;;  %v6917_v10 = vld [vmem:[%s10809_s4 + $0x14] sm:$0xf]  ;;  %v5408_v20 = vld [vmem:[%s10809_s4 + $0x8] sm:$0xf0] }
  0xed   :  { %2198 = vmatpush.bf16.msrb.mxu1 %v5511_v26  ;;  %v6925_v26 = vld [vmem:[%s10809_s4 + $0x54] sm:$0xf] }
  0xee   :  { %v5451_v36 = vor.u32 %v6925_v26, %v5448_v29  ;;  %v5534_v26 = vld [vmem:[%s10809_s4 + $0x100] sm:$0xf]  ;;  %v6948_v29 = vld [vmem:[%s10809_s4 + $0x104] sm:$0xf0] }
  0xf0   :  { %2186 = vmatpush.bf16.msrb.mxu0 %v5439_v58  ;;  %v1562_v3 = vpop.f32.mrf.mxu2  ;;  %v6941_v58 = vld [vmem:[%s10809_s4 + $0xd4] sm:$0xf]  ;;  %2210 = vmatpush.bf16.msrb.mxu2 %v5583_v30 }
  0xf1   :  { %2199 = vmatpush.bf16.msrb.mxu1 %v5503_v35  ;;  %v1575_v5 = vpop.f32.mrf.mxu3  ;;  %v1561_v35 = vadd.f32 %v8844_v47, %v1548_v43  ;;  %v6956_v47 = vld [vmem:[%s10809_s4 + $0x144] sm:$0xf0]  ;;  %v5550_v3 = vld [vmem:[%s10809_s4 + $0x120] sm:$0xf]  ;;  %v6915_v43 = vld [vmem:[%s10809_s4 + $0x4] sm:$0xf] }
  0xf2   :  { %v5488_v5 = vld [vmem:[%s10809_s4 + $0xa8] sm:$0xf0]  ;;  %v5551_v13 = vor.u32 %v6952_v27, %v5550_v3  ;;  %v6961_v30 = vld [vmem:[%s10809_s4 + $0x174] sm:$0xf]  ;;  %v5411_v32 = vor.u32 %v6915_v43, %v5408_v20  ;;  %v6951_v3 = vld [vmem:[%s10809_s4 + $0x124] sm:$0xf] }
  0xf3   :  { %v1574_v49 = vadd.f32 %v8846_v48, %v1561_v35  ;;  %v5558_v48 = vld [vmem:[%s10809_s4 + $0x130] sm:$0xf]  ;;  %v5491_v14 = vor.u32 %v6935_v4, %v5488_v5  ;;  %v5535_v35 = vor.u32 %v6948_v29, %v5534_v26  ;;  %v5552_v27 = vld [vmem:[%s10809_s4 + $0x128] sm:$0xf0]  ;;  %v6966_v29 = vld [vmem:[%s10809_s4 + $0x194] sm:$0xf0] }
  0xf4   :  { %2187 = vmatpush.bf16.msrb.mxu0 %v5431_v63  ;;  %v5515_v63 = vor.u32 %v6941_v58, %v5512_v31  ;;  %2211 = vmatpush.bf16.msrb.mxu2 %v5575_v44  ;;  %v5592_v31 = vld [vmem:[%s10809_s4 + $0x178] sm:$0xf0]  ;;  %v5654_v44 = vld [vmem:[%s10809_s4 + $0x1f0] sm:$0xf]  ;;  %v5536_v43 = vld [vmem:[%s10809_s4 + $0x108] sm:$0xf0] }
  0xf5   :  { %2200 = vmatpush.bf16.msrb.mxu1 %v5495_v46  ;;  %v5566_v46 = vld [vmem:[%s10809_s4 + $0x140] sm:$0xf]  ;;  %v5595_v38 = vor.u32 %v6961_v30, %v5592_v31  ;;  %v5606_v26 = vld [vmem:[%s10809_s4 + $0x190] sm:$0xf]  ;;  %v6964_v30 = vld [vmem:[%s10809_s4 + $0x184] sm:$0xf0] }
  0xf8   :  { %2188 = vmatpush.bf16.msrb.mxu0 %v5423_v51 }
  0xf9   :  { %2201 = vmatpush.bf16.msrb.mxu1 %v5487_v19  ;;  %v5567_v19 = vor.u32 %v6956_v47, %v5566_v46  ;;  %v6957_v46 = vld [vmem:[%s10809_s4 + $0x154] sm:$0xf]  ;;  %v5655_v47 = vor.u32 %v6978_v45, %v5654_v44 }
  0xfb   :  { %2212 = vmatpush.bf16.msrb.mxu2 %v5567_v19  ;;  %2222 = vmatpush.bf16.msrb.mxu3 %v5655_v47 }
  0xfc   :  { %2189 = vmatpush.bf16.msrb.mxu0 %v5415_v57  ;;  %v5435_v57 = vor.u32 %v6921_v52, %v5432_v18 }
  0xfd   :  { %2202 = vmatpush.bf16.msrb.mxu1 %v5479_v1  ;;  %v5559_v1 = vor.u32 %v6954_v54, %v5558_v48  ;;  %v270_v48 = vperm.slane %v8718_v28, 2  ;;  %v5638_v54 = vld [vmem:[%s10809_s4 + $0x1d0] sm:$0xf] }
  0xff   :  { %2213 = vmatpush.bf16.msrb.mxu2 %v5559_v1 }
 0x100   :  { %2190 = vmatpush.bf16.msrb.mxu0 %v5407_v9  ;;  %v1586_v60 = vpop.f32.mrf.mxu0 }
 0x101   :  { %2203 = vmatpush.bf16.msrb.mxu1 %v5471_v12  ;;  %v1587_v51 = vadd.f32 %v1586_v60, %v1574_v49  ;;  %v1599_v22 = vpop.f32.mrf.mxu1  ;;  %v5576_v49 = vld [vmem:[%s10809_s4 + $0x158] sm:$0xf0] }
 0x103   :  { %2191 = vmatmul.bf16.vlgmr.msrb.gmra.mxu0 %v8912_v24  ;;  %v1600_v55 = vadd.f32 %v1599_v22, %v1587_v51  ;;  %2214 = vmatpush.bf16.msrb.mxu2 %v5551_v13  ;;  %v6976_v51 = vld [vmem:[%s10809_s4 + $0x1e4] sm:$0xf0]  ;;  %v6955_v22 = vld [vmem:[%s10809_s4 + $0x144] sm:$0xf] }
 0x104   :  { %2235 = vmatpush.bf16.msra.mxu0 %v5467_v11  ;;  %v5416_v11 = vld [vmem:[%s10809_s4 + $0x18] sm:$0xf0] }
 0x105   :  { %2248 = vmatpush.bf16.msra.mxu1 %v5531_v34  ;;  %v1786_v59 = vmax.f32 %v1600_v55, 0.0  ;;  %v5542_v34 = vld [vmem:[%s10809_s4 + $0x110] sm:$0xf]  ;;  %v5419_v23 = vor.u32 %v6917_v10, %v5416_v11  ;;  %v6974_v55 = vld [vmem:[%s10809_s4 + $0x1d4] sm:$0xf0] }
 0x106   :  { %v6970_v10 = vld [vmem:[%s10809_s4 + $0x1b4] sm:$0xf0] }
 0x107   :  { %v1790_v16 = vpack.c.bf16 %v1786_v59, %v1786_v59  ;;  %v5560_v59 = vld [vmem:[%s10809_s4 + $0x138] sm:$0xf0] }
 0x108   :  { %2236 = vmatpush.bf16.msra.mxu0 %v5459_v25  ;;  %v8995_v6 = vpop.f32.mrf.mxu2  ;;  %v1588_v9 = vpop.f32.mrf.mxu0  ;;  %v5543_v25 = vor.u32 %v6950_v15, %v5542_v34  ;;  %v5563_v1 = vor.u32 %v6953_v56, %v5560_v59  ;;  %v5614_v15 = vld [vmem:[%s10809_s4 + $0x1a0] sm:$0xf] }
 0x109   :  { %2249 = vmatpush.bf16.msra.mxu1 %v5523_v37  ;;  %v8997_v8 = vpop.f32.mrf.mxu3  ;;  %v1601_v12 = vpop.f32.mrf.mxu1  ;;  %v5472_v37 = vld [vmem:[%s10809_s4 + $0x88] sm:$0xf0]  ;;  %v1613_v4 = vadd.f32 %v8995_v6, %v270_v48  ;;  %v5622_v9 = vld [vmem:[%s10809_s4 + $0x1b0] sm:$0xf]  ;;  %v5544_v6 = vld [vmem:[%s10809_s4 + $0x118] sm:$0xf0]  ;;  %v5615_v20 = vor.u32 %v6968_v17, %v5614_v15 }
 0x10a   :  { %2204 = vmatmul.bf16.vlgmr.msrb.gmra.mxu1 %v1790_v16  ;;  %2215 = vmatpush.bf16.msrb.mxu2 %v5543_v25  ;;  %v6949_v12 = vld [vmem:[%s10809_s4 + $0x114] sm:$0xf]  ;;  %v5623_v13 = vor.u32 %v6970_v10, %v5622_v9 }
 0x10b   :  { %v5547_v34 = vor.u32 %v6949_v12, %v5544_v6 }
 0x10c   :  { %2237 = vmatpush.bf16.msra.mxu0 %v5451_v36  ;;  %v5475_v36 = vor.u32 %v6931_v41, %v5472_v37  ;;  %v5598_v37 = vld [vmem:[%s10809_s4 + $0x180] sm:$0xf] }
 0x10d   :  { %2250 = vmatpush.bf16.msra.mxu1 %v5515_v63  ;;  %v5584_v63 = vld [vmem:[%s10809_s4 + $0x168] sm:$0xf0]  ;;  %v5599_v31 = vor.u32 %v6964_v30, %v5598_v37 }
 0x10e   :  { %2216 = vmatpush.bf16.msrb.mxu2 %v5535_v35  ;;  %v5587_v42 = vor.u32 %v6959_v39, %v5584_v63  ;;  %v5656_v35 = vld [vmem:[%s10809_s4 + $0x1f8] sm:$0xf0]  ;;  %v6975_v63 = vld [vmem:[%s10809_s4 + $0x1e4] sm:$0xf] }
 0x110   :  { %2238 = vmatpush.bf16.msra.mxu0 %v5443_v50  ;;  %v1614_v58 = vpop.f32.mrf.mxu2  ;;  %v5646_v50 = vld [vmem:[%s10809_s4 + $0x1e0] sm:$0xf] }
 0x111   :  { %2251 = vmatpush.bf16.msra.mxu1 %v5507_v53  ;;  %v1627_v33 = vpop.f32.mrf.mxu3  ;;  %v5647_v18 = vor.u32 %v6976_v51, %v5646_v50  ;;  %v5568_v53 = vld [vmem:[%s10809_s4 + $0x148] sm:$0xf0]  ;;  %v5607_v58 = vor.u32 %v6966_v29, %v5606_v26 }
 0x112   :  { %2261 = vmatpush.bf16.msra.mxu2 %v5595_v38  ;;  %v5571_v19 = vor.u32 %v6955_v22, %v5568_v53  ;;  %v6977_v33 = vld [vmem:[%s10809_s4 + $0x1f4] sm:$0xf]  ;;  %v5632_v53 = vld [vmem:[%s10809_s4 + $0x1c8] sm:$0xf0] }
 0x113   :  { %2223 = vmatpush.bf16.msrb.mxu3 %v5647_v18  ;;  %v6971_v18 = vld [vmem:[%s10809_s4 + $0x1c4] sm:$0xf] }
 0x114   :  { %2239 = vmatpush.bf16.msra.mxu0 %v5435_v57  ;;  %v5639_v57 = vor.u32 %v6974_v55, %v5638_v54  ;;  %v6969_v54 = vld [vmem:[%s10809_s4 + $0x1b4] sm:$0xf]  ;;  %v5624_v55 = vld [vmem:[%s10809_s4 + $0x1b8] sm:$0xf0] }
 0x115   :  { %2252 = vmatpush.bf16.msra.mxu1 %v5499_v2  ;;  %v6972_v2 = vld [vmem:[%s10809_s4 + $0x1c4] sm:$0xf0]  ;;  %v5627_v56 = vor.u32 %v6969_v54, %v5624_v55  ;;  %v5760_v55 = vld [vmem:[%s10811_s6 + $0xd0] sm:$0xf0] }
 0x116   :  { %2262 = vmatpush.bf16.msra.mxu2 %v5587_v42  ;;  %v5648_v42 = vld [vmem:[%s10809_s4 + $0x1e8] sm:$0xf0] }
 0x117   :  { %2224 = vmatpush.bf16.msrb.mxu3 %v5639_v57  ;;  %v5651_v45 = vor.u32 %v6975_v63, %v5648_v42  ;;  %v5616_v57 = vld [vmem:[%s10809_s4 + $0x1a8] sm:$0xf0] }
 0x118   :  { %2240 = vmatpush.bf16.msra.mxu0 %v5427_v7  ;;  %v5555_v7 = vor.u32 %v6951_v3, %v5552_v27  ;;  %v271_v3 = vperm.slane %v8718_v28, 3 }
 0x119   :  { %2253 = vmatpush.bf16.msra.mxu1 %v5491_v14  ;;  %v1626_v14 = vadd.f32 %v8997_v8, %v1613_v4  ;;  %v5600_v4 = vld [vmem:[%s10809_s4 + $0x188] sm:$0xf0] }
 0x11c   :  { %2241 = vmatpush.bf16.msra.mxu0 %v5419_v23  ;;  %v6947_v23 = vld [vmem:[%s10809_s4 + $0x104] sm:$0xf] }
 0x11d   :  { %2254 = vmatpush.bf16.msra.mxu1 %v5483_v40  ;;  %v5539_v40 = vor.u32 %v6947_v23, %v5536_v43 }
 0x120   :  { %2242 = vmatpush.bf16.msra.mxu0 %v5411_v32  ;;  %v1638_v60 = vpop.f32.mrf.mxu0 }
 0x121   :  { %2255 = vmatpush.bf16.msra.mxu1 %v5475_v36  ;;  %v1651_v52 = vpop.f32.mrf.mxu1  ;;  %v1639_v25 = vadd.f32 %v1638_v60, %v1626_v14  ;;  %v5659_v36 = vor.u32 %v6977_v33, %v5656_v35 }
 0x123   :  { %2243 = vmatmul.bf16.vlgmr.msra.gmra.mxu0 %v8912_v24  ;;  %v5579_v24 = vor.u32 %v6957_v46, %v5576_v49  ;;  %v1652_v41 = vadd.f32 %v1651_v52, %v1639_v25  ;;  %v6973_v49 = vld [vmem:[%s10809_s4 + $0x1d4] sm:$0xf] }
 0x124   :  { %2256 = vmatmul.bf16.vlgmr.msra.gmra.mxu1 %v1790_v16  ;;  %v5631_v16 = vor.u32 %v6972_v2, %v5630_v62  ;;  %v5608_v2 = vld [vmem:[%s10809_s4 + $0x198] sm:$0xf0] }
 0x125   :  { %2263 = vmatpush.bf16.msra.mxu2 %v5579_v24  ;;  %v5640_v24 = vld [vmem:[%s10809_s4 + $0x1d8] sm:$0xf0] }
 0x126   :  { %2225 = vmatpush.bf16.msrb.mxu3 %v5631_v16  ;;  %v5643_v50 = vor.u32 %v6973_v49, %v5640_v24  ;;  %v6963_v16 = vld [vmem:[%s10809_s4 + $0x184] sm:$0xf]  ;;  %v5776_v49 = vld [vmem:[%s10811_s6 + $0xf0] sm:$0xf0]  ;;  %v5782_v24 = vld [vmem:[%s10811_s6 + $0xe8] sm:$0xf] }
 0x128   :  { %v1664_v61 = vpop.f32.mrf.mxu2  ;;  %v1640_v5 = vpop.f32.mrf.mxu0 }
 0x129   :  { %2264 = vmatpush.bf16.msra.mxu2 %v5571_v19  ;;  %v1677_v0 = vpop.f32.mrf.mxu3  ;;  %v1653_v11 = vpop.f32.mrf.mxu1  ;;  %v1665_v32 = vadd.f32 %v1664_v61, %v1652_v41  ;;  %v5635_v19 = vor.u32 %v6971_v18, %v5632_v53  ;;  %v6967_v61 = vld [vmem:[%s10809_s4 + $0x1a4] sm:$0xf]  ;;  %v5758_v53 = vld [vmem:[%s10811_s6 + $0xc0] sm:$0xf] }
 0x12a   :  { %2226 = vmatpush.bf16.msrb.mxu3 %v5623_v13 }
 0x12b   :  { %v1678_v38 = vadd.f32 %v1677_v0, %v1665_v32  ;;  %v5619_v0 = vor.u32 %v6967_v61, %v5616_v57  ;;  %v7006_v61 = vld [vmem:[%s10811_s6 + $0xd4] sm:$0xf0] }
 0x12d   :  { %2265 = vmatpush.bf16.msra.mxu2 %v5563_v1  ;;  %v6965_v1 = vld [vmem:[%s10809_s4 + $0x194] sm:$0xf] }
 0x12e   :  { %2227 = vmatpush.bf16.msrb.mxu3 %v5615_v20  ;;  %v5611_v27 = vor.u32 %v6965_v1, %v5608_v2  ;;  %v5742_v1 = vld [vmem:[%s10811_s6 + $0xa0] sm:$0xf] }
 0x130   :  { %v1666_v21 = vpop.f32.mrf.mxu2 }
 0x131   :  { %2266 = vmatpush.bf16.msra.mxu2 %v5555_v7  ;;  %v1679_v8 = vpop.f32.mrf.mxu3  ;;  %v5603_v7 = vor.u32 %v6963_v16, %v5600_v4  ;;  %v6999_v16 = vld [vmem:[%s10811_s6 + $0xa4] sm:$0xf]  ;;  %v5744_v4 = vld [vmem:[%s10811_s6 + $0xb0] sm:$0xf0] }
 0x132   :  { %2228 = vmatpush.bf16.msrb.mxu3 %v5607_v58 }
 0x135   :  { %2267 = vmatpush.bf16.msra.mxu2 %v5547_v34 }
 0x136   :  { %2229 = vmatpush.bf16.msrb.mxu3 %v5599_v31 }
 0x139   :  { %2268 = vmatpush.bf16.msra.mxu2 %v5539_v40  ;;  %v1857_v40 = vld [vmem:[%s10810_s5] sm:$0x3] }
 0x13a   :  { %2274 = vmatpush.bf16.msra.mxu3 %v5659_v36  ;;  %v1859_v26 = vperm.slane %v1857_v40, 0  ;;  %v1860_v31 = vperm.slane %v1857_v40, 1 }
 0x13e   :  { %2275 = vmatpush.bf16.msra.mxu3 %v5651_v45  ;;  %v7009_v45 = vld [vmem:[%s10811_s6 + $0xec] sm:$0xf0] }
 0x140   :  { %v1690_v39 = vpop.f32.mrf.mxu0 }
 0x141   :  { %v1691_v44 = vadd.f32 %v1690_v39, %v1678_v38  ;;  %v1703_v46 = vpop.f32.mrf.mxu1 }
 0x142   :  { %2276 = vmatpush.bf16.msra.mxu3 %v5643_v50  ;;  %v1704_v5 = vadd.f32 %v1703_v46, %v271_v3  ;;  %v7007_v46 = vld [vmem:[%s10811_s6 + $0xe4] sm:$0xf] }
 0x143   :  { %v1787_v47 = vmax.f32 %v1691_v44, 0.0  ;;  %v5774_v44 = vld [vmem:[%s10811_s6 + $0xe0] sm:$0xf]  ;;  %v5779_v50 = vor.u32 %v7007_v46, %v5776_v49  ;;  %v6989_v46 = vld [vmem:[%s10811_s6 + $0x4c] sm:$0xf0] }
 0x145   :  { %v1791_v60 = vpack.c.bf16 %v1787_v47, %v1787_v47  ;;  %v5775_v47 = vor.u32 %v7009_v45, %v5774_v44  ;;  %2509 = vmatpush.bf16.msrb.mxu1 %v5779_v50  ;;  %v5694_v45 = vld [vmem:[%s10811_s6 + $0x40] sm:$0xf]  ;;  %v6990_v50 = vld [vmem:[%s10811_s6 + $0x54] sm:$0xf0] }
 0x146   :  { %2277 = vmatpush.bf16.msra.mxu3 %v5635_v19  ;;  %v7005_v19 = vld [vmem:[%s10811_s6 + $0xcc] sm:$0xf0]  ;;  %v5695_v49 = vor.u32 %v6989_v46, %v5694_v45  ;;  %v7168_v46 = vld [vmem:[%s10813_s8 + $0x4e8] sm:$0xf0] }
 0x147   :  { %2217 = vmatmul.bf16.vlgmr.msrb.gmra.mxu2 %v1791_v60  ;;  %2496 = vmatpush.bf16.msrb.mxu0 %v5775_v47  ;;  %v5759_v54 = vor.u32 %v7005_v19, %v5758_v53  ;;  %v6987_v47 = vld [vmem:[%s10811_s6 + $0x44] sm:$0xf]  ;;  %v5678_v19 = vld [vmem:[%s10811_s6 + $0x20] sm:$0xf]  ;;  %v6406_v45 = vld [vmem:[%s10813_s8 + $0x4d0] sm:$0xf] }
 0x148   :  { %v1716_v51 = vpop.f32.mrf.mxu2  ;;  %v1692_v52 = vpop.f32.mrf.mxu0 }
 0x149   :  { %v1729_v22 = vpop.f32.mrf.mxu3  ;;  %v1705_v48 = vpop.f32.mrf.mxu1  ;;  %v1717_v9 = vadd.f32 %v1716_v51, %v1704_v5  ;;  %v5784_v52 = vld [vmem:[%s10811_s6 + $0xf8] sm:$0xf0] }
 0x14a   :  { %2278 = vmatpush.bf16.msra.mxu3 %v5627_v56  ;;  %v7003_v48 = vld [vmem:[%s10811_s6 + $0xc4] sm:$0xf]  ;;  %v5766_v56 = vld [vmem:[%s10811_s6 + $0xc8] sm:$0xf] }
 0x14b   :  { %v1730_v10 = vadd.f32 %v1729_v22, %v1717_v9  ;;  %v7008_v22 = vld [vmem:[%s10811_s6 + $0xec] sm:$0xf]  ;;  %v5763_v57 = vor.u32 %v7003_v48, %v5760_v55  ;;  %2497 = vmatpush.bf16.msrb.mxu0 %v5759_v54  ;;  %v5750_v9 = vld [vmem:[%s10811_s6 + $0xa8] sm:$0xf]  ;;  %v6985_v48 = vld [vmem:[%s10811_s6 + $0x2c] sm:$0xf0] }
 0x14c   :  { %v5787_v18 = vor.u32 %v7008_v22, %v5784_v52  ;;  %v6988_v52 = vld [vmem:[%s10811_s6 + $0x4c] sm:$0xf]  ;;  %v6983_v54 = vld [vmem:[%s10811_s6 + $0x24] sm:$0xf]  ;;  %v5679_v55 = vor.u32 %v6985_v48, %v5678_v19  ;;  %v6602_v19 = vld [vmem:[%s10813_s8 + $0x658] sm:$0xf] }
 0x14d   :  { %2510 = vmatpush.bf16.msrb.mxu1 %v5763_v57  ;;  %v6986_v57 = vld [vmem:[%s10811_s6 + $0x34] sm:$0xf0]  ;;  %v6126_v48 = vld [vmem:[%s10813_s8 + $0x2a0] sm:$0xf] }
 0x14e   :  { %2279 = vmatpush.bf16.msra.mxu3 %v5619_v0  ;;  %v5768_v0 = vld [vmem:[%s10811_s6 + $0xd8] sm:$0xf0] }
 0x150   :  { %v1718_v59 = vpop.f32.mrf.mxu2 }
 0x151   :  { %v1731_v62 = vpop.f32.mrf.mxu3  ;;  %v5767_v59 = vor.u32 %v7006_v61, %v5766_v56  ;;  %v5680_v56 = vld [vmem:[%s10811_s6 + $0x30] sm:$0xf0]  ;;  %v5686_v61 = vld [vmem:[%s10811_s6 + $0x28] sm:$0xf] }
 0x152   :  { %2280 = vmatpush.bf16.msra.mxu3 %v5611_v27  ;;  %v7004_v62 = vld [vmem:[%s10811_s6 + $0xcc] sm:$0xf]  ;;  %v7001_v27 = vld [vmem:[%s10811_s6 + $0xac] sm:$0xf0] }
 0x153   :  { %v5771_v3 = vor.u32 %v7004_v62, %v5768_v0  ;;  %v5743_v5 = vor.u32 %v7001_v27, %v5742_v1  ;;  %v5687_v62 = vor.u32 %v6986_v57, %v5686_v61  ;;  %v6984_v0 = vld [vmem:[%s10811_s6 + $0x2c] sm:$0xf]  ;;  %v5688_v1 = vld [vmem:[%s10811_s6 + $0x38] sm:$0xf0]  ;;  %v5662_v27 = vld [vmem:[%s10811_s6] sm:$0xf] }
 0x155   :  { %2498 = vmatpush.bf16.msrb.mxu0 %v5743_v5 }
 0x156   :  { %2281 = vmatpush.bf16.msra.mxu3 %v5603_v7  ;;  %v5747_v7 = vor.u32 %v6999_v16, %v5744_v4  ;;  %v6981_v16 = vld [vmem:[%s10811_s6 + $0xc] sm:$0xf0]  ;;  %v6979_v4 = vld [vmem:[%s10811_s6 + $0x4] sm:$0xf] }
 0x157   :  { %2269 = vmatmul.bf16.vlgmr.msra.gmra.mxu2 %v1791_v60  ;;  %v7010_v60 = vld [vmem:[%s10811_s6 + $0xf4] sm:$0xf0] }
 0x158   :  { %v5783_v51 = vor.u32 %v7010_v60, %v5782_v24  ;;  %2511 = vmatpush.bf16.msrb.mxu1 %v5747_v7  ;;  %v5696_v24 = vld [vmem:[%s10811_s6 + $0x50] sm:$0xf0]  ;;  %v5702_v60 = vld [vmem:[%s10811_s6 + $0x48] sm:$0xf]  ;;  %v5663_v7 = vor.u32 %v6981_v16, %v5662_v27 }
 0x159   :  { %v5703_v22 = vor.u32 %v6990_v50, %v5702_v60  ;;  %v5874_v16 = vld [vmem:[%s10813_s8 + $0xa8] sm:$0xf] }
 0x15a   :  { %2522 = vmatpush.bf16.msrb.mxu2 %v5783_v51  ;;  %v5699_v51 = vor.u32 %v6987_v47, %v5696_v24  ;;  %v6407_v47 = vor.u32 %v7168_v46, %v6406_v45  ;;  %v7224_v24 = vld [vmem:[%s10813_s8 + $0x6a8] sm:$0xf0]  ;;  %v7133_v45 = vld [vmem:[%s10813_s8 + $0x3d0] sm:$0xf0]  ;;  %v6490_v46 = vld [vmem:[%s10813_s8 + $0x578] sm:$0xf] }
 0x15e   :  { %2523 = vmatpush.bf16.msrb.mxu2 %v5767_v59  ;;  %v5683_v59 = vor.u32 %v6983_v54, %v5680_v56  ;;  %v7098_v54 = vld [vmem:[%s10813_s8 + $0x2b8] sm:$0xf0] }
 0x15f   :  { %v6127_v27 = vor.u32 %v7098_v54, %v6126_v48  ;;  %v6212_v48 = vld [vmem:[%s10813_s8 + $0x364] sm:$0xf0] }
 0x160   :  { %v1742_v11 = vpop.f32.mrf.mxu0 }
 0x161   :  { %v1755_v12 = vpop.f32.mrf.mxu1  ;;  %v1743_v28 = vadd.f32 %v1742_v11, %v1730_v10  ;;  %v7002_v10 = vld [vmem:[%s10811_s6 + $0xb4] sm:$0xf0]  ;;  %v7000_v11 = vld [vmem:[%s10811_s6 + $0xac] sm:$0xf] }
 0x163   :  { %v1756_v6 = vadd.f32 %v1755_v12, %v1743_v28  ;;  %v5751_v12 = vor.u32 %v7002_v10, %v5750_v9  ;;  %v5752_v28 = vld [vmem:[%s10811_s6 + $0xb8] sm:$0xf0]  ;;  %v5664_v9 = vld [vmem:[%s10811_s6 + $0x10] sm:$0xf0]  ;;  %v5670_v10 = vld [vmem:[%s10811_s6 + $0x8] sm:$0xf] }
 0x165   :  { %2524 = vmatpush.bf16.msrb.mxu2 %v5751_v12 }
 0x168   :  { %v1768_v13 = vpop.f32.mrf.mxu2  ;;  %v1744_v15 = vpop.f32.mrf.mxu0 }
 0x169   :  { %v1769_v14 = vadd.f32 %v1768_v13, %v1756_v6  ;;  %v1781_v34 = vpop.f32.mrf.mxu3  ;;  %v1757_v17 = vpop.f32.mrf.mxu1  ;;  %v5755_v6 = vor.u32 %v7000_v11, %v5752_v28  ;;  %v5726_v13 = vld [vmem:[%s10811_s6 + $0x80] sm:$0xf]  ;;  %v6982_v11 = vld [vmem:[%s10811_s6 + $0x14] sm:$0xf0]  ;;  %v5667_v28 = vor.u32 %v6979_v4, %v5664_v9  ;;  %v7035_v4 = vld [vmem:[%s10813_s8 + $0xc0] sm:$0xf0] }
 0x16a   :  { %v5728_v17 = vld [vmem:[%s10811_s6 + $0x90] sm:$0xf0] }
 0x16b   :  { %v1782_v21 = vadd.f32 %v1781_v34, %v1769_v14  ;;  %v6997_v14 = vld [vmem:[%s10811_s6 + $0x8c] sm:$0xf0]  ;;  %v6995_v34 = vld [vmem:[%s10811_s6 + $0x84] sm:$0xf] }
 0x16c   :  { %v5727_v15 = vor.u32 %v6997_v14, %v5726_v13 }
 0x16d   :  { %v1788_v23 = vmax.f32 %v1782_v21, 0.0  ;;  %v5734_v21 = vld [vmem:[%s10811_s6 + $0x88] sm:$0xf] }
 0x16e   :  { %2499 = vmatpush.bf16.msrb.mxu0 %v5727_v15  ;;  %v7063_v15 = vld [vmem:[%s10813_s8 + $0x1a0] sm:$0xf0] }
 0x16f   :  { %v1792_v43 = vpack.c.bf16 %v1788_v23, %v1788_v23  ;;  %v6998_v23 = vld [vmem:[%s10811_s6 + $0x94] sm:$0xf0] }
 0x170   :  { %v1770_v8 = vpop.f32.mrf.mxu2 }
 0x171   :  { %v1783_v20 = vpop.f32.mrf.mxu3  ;;  %2230 = vmatmul.bf16.vlgmr.msrb.gmra.mxu3 %v1792_v43  ;;  %v5735_v8 = vor.u32 %v6998_v23, %v5734_v21  ;;  %v7119_v23 = vld [vmem:[%s10813_s8 + $0x360] sm:$0xf0] }
 0x172   :  { %2535 = vmatpush.bf16.msrb.mxu3 %v5787_v18  ;;  %v6996_v20 = vld [vmem:[%s10811_s6 + $0x8c] sm:$0xf]  ;;  %v5704_v18 = vld [vmem:[%s10811_s6 + $0x58] sm:$0xf0] }
 0x173   :  { %2525 = vmatpush.bf16.msrb.mxu2 %v5735_v8  ;;  %v5707_v53 = vor.u32 %v6988_v52, %v5704_v18  ;;  %v7056_v8 = vld [vmem:[%s10813_s8 + $0x168] sm:$0xf0]  ;;  %v6378_v18 = vld [vmem:[%s10813_s8 + $0x498] sm:$0xf] }
 0x176   :  { %2536 = vmatpush.bf16.msrb.mxu3 %v5771_v3  ;;  %v5691_v3 = vor.u32 %v6984_v0, %v5688_v1  ;;  %v7154_v1 = vld [vmem:[%s10813_s8 + $0x478] sm:$0xf0] }
 0x17a   :  { %2537 = vmatpush.bf16.msrb.mxu3 %v5755_v6  ;;  %v5671_v6 = vor.u32 %v6982_v11, %v5670_v10 }
 0x180   :  { %v2192_v25 = vpop.f32.mrf.mxu0 }
 0x181   :  { %2282 = vmatmul.bf16.vlgmr.msra.gmra.mxu3 %v1792_v43  ;;  %v2193_v29 = vadd.f32 %v2192_v25, %v1859_v26  ;;  %v5731_v43 = vor.u32 %v6995_v34, %v5728_v17  ;;  %v5736_v25 = vld [vmem:[%s10811_s6 + $0x98] sm:$0xf0]  ;;  %v5710_v26 = vld [vmem:[%s10811_s6 + $0x60] sm:$0xf]  ;;  %v5986_v34 = vld [vmem:[%s10813_s8 + $0x188] sm:$0xf] }
 0x182   :  { %v6210_v17 = vld [vmem:[%s10813_s8 + $0x348] sm:$0xf]  ;;  %v5987_v21 = vor.u32 %v7063_v15, %v5986_v34  ;;  %v5846_v15 = vld [vmem:[%s10813_s8 + $0x70] sm:$0xf] }
 0x183   :  { %2512 = vmatpush.bf16.msrb.mxu1 %v5731_v43  ;;  %v5958_v43 = vld [vmem:[%s10813_s8 + $0x150] sm:$0xf] }
 0x187   :  { %v2205_v37 = vpop.f32.mrf.mxu1 }
 0x188   :  { %v2194_v41 = vpop.f32.mrf.mxu0  ;;  %v9187_v58 = vadd.f32 %v2205_v37, %v2193_v29  ;;  %v6993_v29 = vld [vmem:[%s10811_s6 + $0x6c] sm:$0xf0]  ;;  %v6991_v37 = vld [vmem:[%s10811_s6 + $0x64] sm:$0xf] }
 0x189   :  { %v5739_v41 = vor.u32 %v6996_v20, %v5736_v25  ;;  %v6211_v20 = vor.u32 %v7119_v23, %v6210_v17  ;;  %v6182_v25 = vld [vmem:[%s10813_s8 + $0x310] sm:$0xf]  ;;  %v7028_v17 = vld [vmem:[%s10813_s8 + $0x88] sm:$0xf0] }
 0x18a   :  { %v7084_v23 = vld [vmem:[%s10813_s8 + $0x248] sm:$0xf0] }
 0x18b   :  { %2538 = vmatpush.bf16.msrb.mxu3 %v5739_v41  ;;  %v6434_v41 = vld [vmem:[%s10813_s8 + $0x508] sm:$0xf] }
 0x18f   :  { %v2207_v30 = vpop.f32.mrf.mxu1 }
 0x190   :  { %v5711_v30 = vor.u32 %v6993_v29, %v5710_v26  ;;  %v5959_v29 = vor.u32 %v7056_v8, %v5958_v43 }
 0x192   :  { %2500 = vmatpush.bf16.msrb.mxu0 %v5711_v30  ;;  %v6658_v30 = vld [vmem:[%s10813_s8 + $0x6c8] sm:$0xf] }
 0x196   :  { %2501 = vmatpush.bf16.msrb.mxu0 %v5695_v49  ;;  %v6630_v49 = vld [vmem:[%s10813_s8 + $0x690] sm:$0xf] }
 0x197   :  { %v6631_v50 = vor.u32 %v7224_v24, %v6630_v49 }
 0x19a   :  { %2502 = vmatpush.bf16.msrb.mxu0 %v5679_v55  ;;  %v7217_v55 = vld [vmem:[%s10813_s8 + $0x670] sm:$0xf0] }
 0x19b   :  { %v6603_v57 = vor.u32 %v7217_v55, %v6602_v19  ;;  %v7116_v19 = vld [vmem:[%s10813_s8 + $0x34c] sm:$0xf] }
 0x19e   :  { %2503 = vmatpush.bf16.msrb.mxu0 %v5663_v7  ;;  %v7091_v7 = vld [vmem:[%s10813_s8 + $0x280] sm:$0xf0] }
 0x1a0   :  { %v2244_v32 = vpop.f32.mrf.mxu0 }
 0x1a1   :  { %v2245_v33 = vadd.f32 %v2244_v32, %v1860_v31  ;;  %v2257_v35 = vpop.f32.mrf.mxu1  ;;  %v5712_v31 = vld [vmem:[%s10811_s6 + $0x70] sm:$0xf0]  ;;  %v5718_v32 = vld [vmem:[%s10811_s6 + $0x68] sm:$0xf] }
 0x1a2   :  { %3980 = vmatpush.bf16.msra.mxu0 %v5987_v21  ;;  %v6070_v21 = vld [vmem:[%s10813_s8 + $0x230] sm:$0xf] }
 0x1a3   :  { %v9189_v36 = vadd.f32 %v2257_v35, %v2245_v33  ;;  %v6994_v33 = vld [vmem:[%s10811_s6 + $0x74] sm:$0xf0]  ;;  %v5715_v35 = vor.u32 %v6991_v37, %v5712_v31  ;;  %v7175_v37 = vld [vmem:[%s10813_s8 + $0x520] sm:$0xf0] }
 0x1a4   :  { %v7231_v31 = vld [vmem:[%s10813_s8 + $0x6e0] sm:$0xf0] }
 0x1a5   :  { %2513 = vmatpush.bf16.msrb.mxu1 %v5715_v35  ;;  %v6659_v35 = vor.u32 %v7231_v31, %v6658_v30  ;;  %v5818_v30 = vld [vmem:[%s10813_s8 + $0x38] sm:$0xf]  ;;  %v7021_v31 = vld [vmem:[%s10813_s8 + $0x50] sm:$0xf0] }
 0x1a6   :  { %3981 = vmatpush.bf16.msra.mxu0 %v5959_v29  ;;  %v7196_v29 = vld [vmem:[%s10813_s8 + $0x5c8] sm:$0xf0] }
 0x1a8   :  { %v2246_v38 = vpop.f32.mrf.mxu0 }
 0x1a9   :  { %v2259_v39 = vpop.f32.mrf.mxu1  ;;  %v5719_v38 = vor.u32 %v6994_v33, %v5718_v32  ;;  %2514 = vmatpush.bf16.msrb.mxu1 %v5699_v51  ;;  %v6435_v33 = vor.u32 %v7175_v37, %v6434_v41  ;;  %v5902_v51 = vld [vmem:[%s10813_s8 + $0xe0] sm:$0xf]  ;;  %v7140_v41 = vld [vmem:[%s10813_s8 + $0x408] sm:$0xf0]  ;;  %v6071_v37 = vor.u32 %v7084_v23, %v6070_v21  ;;  %v7046_v21 = vld [vmem:[%s10813_s8 + $0x11c] sm:$0xf] }
 0x1aa   :  { %v6992_v39 = vld [vmem:[%s10811_s6 + $0x6c] sm:$0xf]  ;;  %v5932_v23 = vld [vmem:[%s10813_s8 + $0x134] sm:$0xf0] }
 0x1ab   :  { %2526 = vmatpush.bf16.msrb.mxu2 %v5719_v38  ;;  %v5930_v38 = vld [vmem:[%s10813_s8 + $0x118] sm:$0xf] }
 0x1ad   :  { %2515 = vmatpush.bf16.msrb.mxu1 %v5683_v59  ;;  %v6350_v59 = vld [vmem:[%s10813_s8 + $0x460] sm:$0xf] }
 0x1ae   :  { %v6351_v10 = vor.u32 %v7154_v1, %v6350_v59  ;;  %v6462_v59 = vld [vmem:[%s10813_s8 + $0x540] sm:$0xf] }
 0x1af   :  { %2527 = vmatpush.bf16.msrb.mxu2 %v5703_v22  ;;  %v7042_v22 = vld [vmem:[%s10813_s8 + $0xf8] sm:$0xf0] }
 0x1b0   :  { %v5903_v0 = vor.u32 %v7042_v22, %v5902_v51  ;;  %v6014_v22 = vld [vmem:[%s10813_s8 + $0x1c0] sm:$0xf] }
 0x1b1   :  { %2516 = vmatpush.bf16.msrb.mxu1 %v5667_v28  ;;  %v5875_v28 = vor.u32 %v7035_v4, %v5874_v16  ;;  %v6215_v4 = vor.u32 %v7116_v19, %v6212_v48  ;;  %v7025_v19 = vld [vmem:[%s10813_s8 + $0x74] sm:$0xf]  ;;  %v5848_v48 = vld [vmem:[%s10813_s8 + $0x8c] sm:$0xf0] }
 0x1b3   :  { %2528 = vmatpush.bf16.msrb.mxu2 %v5687_v62 }
 0x1b5   :  { %3993 = vmatpush.bf16.msra.mxu1 %v6211_v20  ;;  %v6294_v20 = vld [vmem:[%s10813_s8 + $0x3f0] sm:$0xf] }
 0x1b7   :  { %2529 = vmatpush.bf16.msrb.mxu2 %v5671_v6  ;;  %v7147_v6 = vld [vmem:[%s10813_s8 + $0x440] sm:$0xf0] }
 0x1bb   :  { %4006 = vmatpush.bf16.msra.mxu2 %v6435_v33  ;;  %v7077_v33 = vld [vmem:[%s10813_s8 + $0x210] sm:$0xf0] }
 0x1bf   :  { %4007 = vmatpush.bf16.msra.mxu2 %v6407_v47  ;;  %v7189_v47 = vld [vmem:[%s10813_s8 + $0x590] sm:$0xf0] }
 0x1c0   :  { %v6491_v55 = vor.u32 %v7189_v47, %v6490_v46  ;;  %v6576_v46 = vld [vmem:[%s10813_s8 + $0x63c] sm:$0xf0] }
 0x1ca   :  { %v9191_v63 = vpop.f32.mrf.mxu2 }
 0x1cb   :  { %v2219_v5 = vadd.f32 %v9191_v63, %v9187_v58  ;;  %v6980_v58 = vld [vmem:[%s10811_s6 + $0xc] sm:$0xf]  ;;  %v5672_v63 = vld [vmem:[%s10811_s6 + $0x18] sm:$0xf0] }
 0x1cc   :  { %v5675_v14 = vor.u32 %v6980_v58, %v5672_v63  ;;  %v6546_v58 = vld [vmem:[%s10813_s8 + $0x5e8] sm:$0xf]  ;;  %v7203_v63 = vld [vmem:[%s10813_s8 + $0x600] sm:$0xf0] }
 0x1cd   :  { %v6547_v8 = vor.u32 %v7203_v63, %v6546_v58  ;;  %v7165_v58 = vld [vmem:[%s10813_s8 + $0x4d4] sm:$0xf]  ;;  %v6408_v63 = vld [vmem:[%s10813_s8 + $0x4ec] sm:$0xf0] }
 0x1d2   :  { %v2220_v42 = vpop.f32.mrf.mxu2 }
 0x1d3   :  { %v5720_v42 = vld [vmem:[%s10811_s6 + $0x78] sm:$0xf0] }
 0x1d4   :  { %v5723_v44 = vor.u32 %v6992_v39, %v5720_v42  ;;  %v7049_v39 = vld [vmem:[%s10813_s8 + $0x130] sm:$0xf0]  ;;  %v6154_v42 = vld [vmem:[%s10813_s8 + $0x2d8] sm:$0xf] }
 0x1d5   :  { %v5931_v60 = vor.u32 %v7049_v39, %v5930_v38  ;;  %v6295_v38 = vor.u32 %v7140_v41, %v6294_v20  ;;  %v6411_v20 = vor.u32 %v7165_v58, %v6408_v63  ;;  %v6380_v41 = vld [vmem:[%s10813_s8 + $0x4b4] sm:$0xf0]  ;;  %v7067_v58 = vld [vmem:[%s10813_s8 + $0x1c4] sm:$0xf] }
 0x1d6   :  { %2539 = vmatpush.bf16.msrb.mxu3 %v5723_v44  ;;  %v7105_v44 = vld [vmem:[%s10813_s8 + $0x2f0] sm:$0xf0] }
 0x1d7   :  { %v6155_v52 = vor.u32 %v7105_v44, %v6154_v42  ;;  %3982 = vmatpush.bf16.msra.mxu0 %v5931_v60  ;;  %v6266_v42 = vld [vmem:[%s10813_s8 + $0x3b8] sm:$0xf]  ;;  %v5819_v44 = vor.u32 %v7021_v31, %v5818_v30  ;;  %v5790_v60 = vld [vmem:[%s10813_s8] sm:$0xf]  ;;  %v7039_v31 = vld [vmem:[%s10813_s8 + $0xe4] sm:$0xf] }
 0x1d8   :  { %v6267_v54 = vor.u32 %v7133_v45, %v6266_v42  ;;  %v7151_v42 = vld [vmem:[%s10813_s8 + $0x464] sm:$0xf] }
 0x1d9   :  { %v7207_v45 = vld [vmem:[%s10813_s8 + $0x624] sm:$0xf] }
 0x1da   :  { %v9244_v2 = vpop.f32.mrf.mxu2  ;;  %2540 = vmatpush.bf16.msrb.mxu3 %v5707_v53  ;;  %v7161_v53 = vld [vmem:[%s10813_s8 + $0x4b0] sm:$0xf0] }
 0x1db   :  { %v2271_v56 = vadd.f32 %v9244_v2, %v9189_v36  ;;  %v6379_v61 = vor.u32 %v7161_v53, %v6378_v18  ;;  %v7210_v36 = vld [vmem:[%s10813_s8 + $0x638] sm:$0xf0]  ;;  %3983 = vmatpush.bf16.msra.mxu0 %v5903_v0  ;;  %v7060_v18 = vld [vmem:[%s10813_s8 + $0x18c] sm:$0xf]  ;;  %v5988_v53 = vld [vmem:[%s10813_s8 + $0x1a4] sm:$0xf0] }
 0x1dc   :  { %v6436_v0 = vld [vmem:[%s10813_s8 + $0x524] sm:$0xf0]  ;;  %v5991_v16 = vor.u32 %v7060_v18, %v5988_v53 }
 0x1dd   :  { %4008 = vmatpush.bf16.msra.mxu2 %v6379_v61  ;;  %v6238_v61 = vld [vmem:[%s10813_s8 + $0x380] sm:$0xf] }
 0x1de   :  { %2541 = vmatpush.bf16.msrb.mxu3 %v5691_v3  ;;  %v6574_v3 = vld [vmem:[%s10813_s8 + $0x620] sm:$0xf] }
 0x1df   :  { %v6575_v11 = vor.u32 %v7210_v36, %v6574_v3  ;;  %3984 = vmatpush.bf16.msra.mxu0 %v5875_v28 }
 0x1e1   :  { %4009 = vmatpush.bf16.msra.mxu2 %v6351_v10  ;;  %v6184_v10 = vld [vmem:[%s10813_s8 + $0x32c] sm:$0xf0] }
 0x1e2   :  { %v2272_v40 = vpop.f32.mrf.mxu2  ;;  %2542 = vmatpush.bf16.msrb.mxu3 %v5675_v14 }
 0x1e3   :  { %v7112_v40 = vld [vmem:[%s10813_s8 + $0x328] sm:$0xf0] }
 0x1e4   :  { %v6183_v32 = vor.u32 %v7112_v40, %v6182_v25  ;;  %v5847_v40 = vor.u32 %v7028_v17, %v5846_v15 }
 0x1e6   :  { %4019 = vmatpush.bf16.msra.mxu3 %v6659_v35  ;;  %3994 = vmatpush.bf16.msra.mxu1 %v6183_v32  ;;  %v6042_v32 = vld [vmem:[%s10813_s8 + $0x1f8] sm:$0xf]  ;;  %v2287_v35 = vld [vmem:[%s10806_s1] sm:$0xff] }
 0x1e7   :  { %3985 = vmatpush.bf16.msra.mxu0 %v5847_v40  ;;  %v6043_v24 = vor.u32 %v7077_v33, %v6042_v32  ;;  %v7158_v40 = vld [vmem:[%s10813_s8 + $0x49c] sm:$0xf]  ;;  %v5904_v32 = vld [vmem:[%s10813_s8 + $0xfc] sm:$0xf0]  ;;  %v7095_v33 = vld [vmem:[%s10813_s8 + $0x2a4] sm:$0xf] }
 0x1e8   :  { %v5907_v47 = vor.u32 %v7039_v31, %v5904_v32 }
 0x1ea   :  { %4020 = vmatpush.bf16.msra.mxu3 %v6631_v50  ;;  %3995 = vmatpush.bf16.msra.mxu1 %v6155_v52  ;;  %v7014_v50 = vld [vmem:[%s10813_s8 + $0x18] sm:$0xf0] }
 0x1eb   :  { %v7070_v52 = vld [vmem:[%s10813_s8 + $0x1d8] sm:$0xf0]  ;;  %3986 = vmatpush.bf16.msra.mxu0 %v5819_v44  ;;  %v5791_v3 = vor.u32 %v7014_v50, %v5790_v60  ;;  %v6352_v44 = vld [vmem:[%s10813_s8 + $0x47c] sm:$0xf0]  ;;  %v5876_v60 = vld [vmem:[%s10813_s8 + $0xc4] sm:$0xf0] }
 0x1ec   :  { %v6015_v36 = vor.u32 %v7070_v52, %v6014_v22  ;;  %v7088_v50 = vld [vmem:[%s10813_s8 + $0x26c] sm:$0xf]  ;;  %v6355_v22 = vor.u32 %v7151_v42, %v6352_v44  ;;  %v6579_v52 = vor.u32 %v7207_v45, %v6576_v46  ;;  %v6218_v44 = vld [vmem:[%s10813_s8 + $0x350] sm:$0xf] }
 0x1ed   :  { %v7064_v42 = vld [vmem:[%s10813_s8 + $0x1a8] sm:$0xf0] }
 0x1ee   :  { %4021 = vmatpush.bf16.msra.mxu3 %v6603_v57  ;;  %3996 = vmatpush.bf16.msra.mxu1 %v6127_v27  ;;  %v7126_v57 = vld [vmem:[%s10813_s8 + $0x398] sm:$0xf0]  ;;  %v6660_v27 = vld [vmem:[%s10813_s8 + $0x6e4] sm:$0xf0]  ;;  %v7120_v45 = vld [vmem:[%s10813_s8 + $0x368] sm:$0xf0] }
 0x1ef   :  { %3987 = vmatpush.bf16.msra.mxu0 %v5791_v3  ;;  %v7018_v3 = vld [vmem:[%s10813_s8 + $0x3c] sm:$0xf] }
 0x1f2   :  { %4022 = vmatpush.bf16.msra.mxu3 %v6575_v11  ;;  %v6239_v11 = vor.u32 %v7126_v57, %v6238_v61  ;;  %v7144_v57 = vld [vmem:[%s10813_s8 + $0x42c] sm:$0xf] }
 0x1f4   :  { %v2231_v12 = vpop.f32.mrf.mxu3 }
 0x1f5   :  { %v9389_v13 = vadd.f32 %v2231_v12, %v2219_v5  ;;  %v6098_v5 = vld [vmem:[%s10813_s8 + $0x268] sm:$0xf] }
 0x1f6   :  { %v6322_v12 = vld [vmem:[%s10813_s8 + $0x428] sm:$0xf]  ;;  %v6099_v34 = vor.u32 %v7091_v7, %v6098_v5  ;;  %4023 = vmatpush.bf16.msra.mxu3 %v6547_v8  ;;  %v7053_v5 = vld [vmem:[%s10813_s8 + $0x154] sm:$0xf]  ;;  %v5960_v7 = vld [vmem:[%s10813_s8 + $0x16c] sm:$0xf0] }
 0x1f7   :  { %4485 = vst [vmem:[%s10816_s11] sm:$0xff] %v9389_v13  ;;  %v6323_v43 = vor.u32 %v7147_v6, %v6322_v12  ;;  %v5963_v15 = vor.u32 %v7053_v5, %v5960_v7  ;;  %v6156_v8 = vld [vmem:[%s10813_s8 + $0x2f4] sm:$0xf0]  ;;  %v7137_v5 = vld [vmem:[%s10813_s8 + $0x3f4] sm:$0xf]  ;;  %v6296_v7 = vld [vmem:[%s10813_s8 + $0x40c] sm:$0xf0] }
 0x1f8   :  { %3997 = vmatpush.bf16.msra.mxu1 %v6099_v34  ;;  %v6632_v34 = vld [vmem:[%s10813_s8 + $0x6ac] sm:$0xf0] }
 0x1f9   :  { %4010 = vmatpush.bf16.msra.mxu2 %v6323_v43  ;;  %v7102_v43 = vld [vmem:[%s10813_s8 + $0x2dc] sm:$0xf] }
 0x1fa   :  { %v6159_v30 = vor.u32 %v7102_v43, %v6156_v8  ;;  %v6492_v43 = vld [vmem:[%s10813_s8 + $0x594] sm:$0xf0] }
 0x1fc   :  { %v2233_v26 = vpop.f32.mrf.mxu3  ;;  %3998 = vmatpush.bf16.msra.mxu1 %v6071_v37  ;;  %v5935_v37 = vor.u32 %v7046_v21, %v5932_v23  ;;  %v7186_v23 = vld [vmem:[%s10813_s8 + $0x57c] sm:$0xf] }
 0x1fd   :  { %v6518_v26 = vld [vmem:[%s10813_s8 + $0x5b0] sm:$0xf]  ;;  %4011 = vmatpush.bf16.msra.mxu2 %v6295_v38  ;;  %v6383_v38 = vor.u32 %v7158_v40, %v6380_v41  ;;  %v6495_v8 = vor.u32 %v7186_v23, %v6492_v43  ;;  %v7179_v41 = vld [vmem:[%s10813_s8 + $0x544] sm:$0xf] }
 0x1fe   :  { %v6519_v39 = vor.u32 %v7196_v29, %v6518_v26  ;;  %v7214_v26 = vld [vmem:[%s10813_s8 + $0x65c] sm:$0xf]  ;;  %v6604_v29 = vld [vmem:[%s10813_s8 + $0x674] sm:$0xf0] }
 0x200   :  { %4024 = vmatpush.bf16.msra.mxu3 %v6519_v39  ;;  %3999 = vmatpush.bf16.msra.mxu1 %v6043_v24  ;;  %v6607_v39 = vor.u32 %v7214_v26, %v6604_v29  ;;  %v7032_v24 = vld [vmem:[%s10813_s8 + $0xac] sm:$0xf]  ;;  %v6464_v26 = vld [vmem:[%s10813_s8 + $0x55c] sm:$0xf0] }
 0x201   :  { %4012 = vmatpush.bf16.msra.mxu2 %v6267_v54  ;;  %v5879_v18 = vor.u32 %v7032_v24, %v5876_v60  ;;  %v7081_v54 = vld [vmem:[%s10813_s8 + $0x234] sm:$0xf]  ;;  %v6467_v29 = vor.u32 %v7179_v41, %v6464_v26  ;;  %v7162_v26 = vld [vmem:[%s10813_s8 + $0x4b8] sm:$0xf0] }
 0x204   :  { %v2283_v62 = vpop.f32.mrf.mxu3  ;;  %4025 = vmatpush.bf16.msra.mxu3 %v6491_v55  ;;  %4000 = vmatpush.bf16.msra.mxu1 %v6015_v36  ;;  %v6072_v55 = vld [vmem:[%s10813_s8 + $0x24c] sm:$0xf0]  ;;  %v5820_v36 = vld [vmem:[%s10813_s8 + $0x54] sm:$0xf0] }
 0x205   :  { %v2284_v2 = vadd.f32 %v2283_v62, %v2271_v56  ;;  %v7182_v62 = vld [vmem:[%s10813_s8 + $0x558] sm:$0xf0]  ;;  %4013 = vmatpush.bf16.msra.mxu2 %v6239_v11  ;;  %v6075_v61 = vor.u32 %v7081_v54, %v6072_v55  ;;  %v6520_v11 = vld [vmem:[%s10813_s8 + $0x5cc] sm:$0xf0] }
 0x206   :  { %v6463_v12 = vor.u32 %v7182_v62, %v6462_v59  ;;  %v6324_v59 = vld [vmem:[%s10813_s8 + $0x444] sm:$0xf0]  ;;  %v7200_v62 = vld [vmem:[%s10813_s8 + $0x5ec] sm:$0xf] }
 0x207   :  { %v2288_v9 = vmul.f32 0.5, %v2284_v2  ;;  %4486 = vst [vmem:[%s10816_s11 + $0x8] sm:$0xff] %v2284_v2  ;;  %v7228_v2 = vld [vmem:[%s10813_s8 + $0x6cc] sm:$0xf] }
 0x208   :  { %v6663_v6 = vor.u32 %v7228_v2, %v6660_v27  ;;  %4026 = vmatpush.bf16.msra.mxu3 %v6463_v12  ;;  %v5823_v2 = vor.u32 %v7018_v3, %v5820_v36  ;;  %v7074_v27 = vld [vmem:[%s10813_s8 + $0x1fc] sm:$0xf]  ;;  %v7232_v3 = vld [vmem:[%s10813_s8 + $0x6e8] sm:$0xf0]  ;;  %v5938_v36 = vld [vmem:[%s10813_s8 + $0x120] sm:$0xf] }
 0x209   :  { %v2289_v14 = vmul.f32 1.442695, %v2288_v9  ;;  %v7109_v9 = vld [vmem:[%s10813_s8 + $0x314] sm:$0xf] }
 0x20a   :  { %v6187_v17 = vor.u32 %v7109_v9, %v6184_v10  ;;  %v7193_v9 = vld [vmem:[%s10813_s8 + $0x5b4] sm:$0xf]  ;;  %v6299_v10 = vor.u32 %v7137_v5, %v6296_v7 }
 0x20b   :  { %7236 = vpow2.f32 %v2289_v14  ;;  %v7221_v14 = vld [vmem:[%s10813_s8 + $0x694] sm:$0xf]  ;;  %v6523_v12 = vor.u32 %v7193_v9, %v6520_v11  ;;  %v6414_v11 = vld [vmem:[%s10813_s8 + $0x4d8] sm:$0xf] }
 0x20c   :  { %v2285_v25 = vpop.f32.mrf.mxu3 }
 0x20d   :  { %v6635_v25 = vor.u32 %v7221_v14, %v6632_v34  ;;  %v6016_v14 = vld [vmem:[%s10813_s8 + $0x1dc] sm:$0xf0] }
 0x20e   :  { %v6019_v34 = vor.u32 %v7067_v58, %v6016_v14  ;;  %v7225_v14 = vld [vmem:[%s10813_s8 + $0x6b0] sm:$0xf0] }
 0x211   :  { %v7237_v49 = vpop.eup %7236 }
 0x212   :  { %v2291_v51 = vmul.f32 %v7237_v49, %v2287_v35  ;;  %v6128_v35 = vld [vmem:[%s10813_s8 + $0x2bc] sm:$0xf0] }
 0x213   :  { %v6131_v49 = vor.u32 %v7095_v33, %v6128_v35  ;;  %v5994_v35 = vld [vmem:[%s10813_s8 + $0x190] sm:$0xf] }
 0x214   :  { %v2292_v56 = vadd.f32 %v2291_v51, %v9389_v13  ;;  %v7172_v13 = vld [vmem:[%s10813_s8 + $0x50c] sm:$0xf]  ;;  %v6100_v51 = vld [vmem:[%s10813_s8 + $0x284] sm:$0xf0]  ;;  %v5995_v60 = vor.u32 %v7064_v42, %v5994_v35  ;;  %v7155_v42 = vld [vmem:[%s10813_s8 + $0x480] sm:$0xf0] }
 0x215   :  { %v6439_v28 = vor.u32 %v7172_v13, %v6436_v0  ;;  %v6103_v53 = vor.u32 %v7088_v50, %v6100_v51  ;;  %v6327_v13 = vor.u32 %v7144_v57, %v6324_v59  ;;  %v6548_v0 = vld [vmem:[%s10813_s8 + $0x604] sm:$0xf0]  ;;  %v6219_v50 = vor.u32 %v7120_v45, %v6218_v44  ;;  %v5966_v51 = vld [vmem:[%s10813_s8 + $0x158] sm:$0xf]  ;;  %v6666_v57 = vld [vmem:[%s10813_s8 + $0x6d0] sm:$0xf] }
 0x216   :  { %v2293_v1 = vpack.c.bf16 %v2292_v56, %v2292_v56  ;;  %4487 = vst [vmem:[%s10816_s11 + $0x10] sm:$0xff] %v2292_v56  ;;  %v5851_v56 = vor.u32 %v7025_v19, %v5848_v48  ;;  %v7113_v19 = vld [vmem:[%s10813_s8 + $0x330] sm:$0xf0]  ;;  %v6667_v9 = vor.u32 %v7232_v3, %v6666_v57  ;;  %v6582_v44 = vld [vmem:[%s10813_s8 + $0x628] sm:$0xf] }
 0x217   :  { %v7211_v45 = vld [vmem:[%s10813_s8 + $0x640] sm:$0xf0]  ;;  %v7022_v57 = vld [vmem:[%s10813_s8 + $0x58] sm:$0xf0]  ;;  %v7141_v3 = vld [vmem:[%s10813_s8 + $0x410] sm:$0xf0] }
 0x218   :  { %2504 = vmatmul.bf16.vlgmr.msrb.gmra.mxu0 %v2293_v1  ;;  %2517 = vmatmul.bf16.vlgmr.msrb.gmra.mxu1 %v2293_v1 }
 0x219   :  { %2530 = vmatmul.bf16.vlgmr.msrb.gmra.mxu2 %v2293_v1  ;;  %2543 = vmatmul.bf16.vlgmr.msrb.gmra.mxu3 %v2293_v1  ;;  %v6551_v1 = vor.u32 %v7200_v62, %v6548_v0 }
 0x21a   :  { %4032 = vmatpush.bf16.msrb.mxu0 %v5991_v16  ;;  %4045 = vmatpush.bf16.msrb.mxu1 %v6215_v4  ;;  %v6044_v16 = vld [vmem:[%s10813_s8 + $0x214] sm:$0xf0] }
 0x21b   :  { %4058 = vmatpush.bf16.msrb.mxu2 %v6439_v28  ;;  %4071 = vmatpush.bf16.msrb.mxu3 %v6663_v6  ;;  %v6047_v4 = vor.u32 %v7074_v27, %v6044_v16  ;;  %v7011_v28 = vld [vmem:[%s10813_s8 + $0x4] sm:$0xf]  ;;  %v5792_v6 = vld [vmem:[%s10813_s8 + $0x1c] sm:$0xf0]  ;;  %v7106_v16 = vld [vmem:[%s10813_s8 + $0x2f8] sm:$0xf0] }
 0x21c   :  { %v5795_v63 = vor.u32 %v7011_v28, %v5792_v6  ;;  %v6162_v27 = vld [vmem:[%s10813_s8 + $0x2e0] sm:$0xf] }
 0x21d   :  { %v6163_v58 = vor.u32 %v7106_v16, %v6162_v27 }
 0x21e   :  { %4033 = vmatpush.bf16.msrb.mxu0 %v5963_v15  ;;  %4046 = vmatpush.bf16.msrb.mxu1 %v6187_v17  ;;  %v7130_v15 = vld [vmem:[%s10813_s8 + $0x3bc] sm:$0xf]  ;;  %v6268_v17 = vld [vmem:[%s10813_s8 + $0x3d4] sm:$0xf0] }
 0x21f   :  { %4059 = vmatpush.bf16.msrb.mxu2 %v6411_v20  ;;  %4072 = vmatpush.bf16.msrb.mxu3 %v6635_v25  ;;  %v6271_v21 = vor.u32 %v7130_v15, %v6268_v17  ;;  %v7123_v20 = vld [vmem:[%s10813_s8 + $0x384] sm:$0xf]  ;;  %v6240_v25 = vld [vmem:[%s10813_s8 + $0x39c] sm:$0xf0]  ;;  %v6134_v17 = vld [vmem:[%s10813_s8 + $0x2a8] sm:$0xf] }
 0x220   :  { %v6243_v40 = vor.u32 %v7123_v20, %v6240_v25  ;;  %v7043_v15 = vld [vmem:[%s10813_s8 + $0x100] sm:$0xf0]  ;;  %v6386_v25 = vld [vmem:[%s10813_s8 + $0x4a0] sm:$0xf] }
 0x221   :  { %v6387_v35 = vor.u32 %v7162_v26, %v6386_v25  ;;  %v7054_v25 = vld [vmem:[%s10813_s8 + $0x15c] sm:$0xf] }
 0x222   :  { %4034 = vmatpush.bf16.msrb.mxu0 %v5935_v37  ;;  %4047 = vmatpush.bf16.msrb.mxu1 %v6159_v30  ;;  %v2326_v37 = vld [vmem:[%s10812_s7] sm:$0xf] }
 0x223   :  { %4060 = vmatpush.bf16.msrb.mxu2 %v6383_v38  ;;  %4073 = vmatpush.bf16.msrb.mxu3 %v6607_v39  ;;  %v2328_v30 = vperm.slane %v2326_v37, 0  ;;  %v2329_v31 = vperm.slane %v2326_v37, 1  ;;  %v2331_v24 = vperm.slane %v2326_v37, 3 }
 0x226   :  { %4035 = vmatpush.bf16.msrb.mxu0 %v5907_v47  ;;  %4048 = vmatpush.bf16.msrb.mxu1 %v6131_v49  ;;  %v2330_v49 = vperm.slane %v2326_v37, 2  ;;  %v7218_v37 = vld [vmem:[%s10813_s8 + $0x678] sm:$0xf0] }
 0x227   :  { %4061 = vmatpush.bf16.msrb.mxu2 %v6355_v22  ;;  %4074 = vmatpush.bf16.msrb.mxu3 %v6579_v52  ;;  %v7057_v22 = vld [vmem:[%s10813_s8 + $0x170] sm:$0xf0] }
 0x228   :  { %v5967_v55 = vor.u32 %v7057_v22, %v5966_v51  ;;  %v6583_v22 = vor.u32 %v7211_v45, %v6582_v44 }
 0x22a   :  { %4036 = vmatpush.bf16.msrb.mxu0 %v5879_v18  ;;  %4049 = vmatpush.bf16.msrb.mxu1 %v6103_v53  ;;  %v6190_v53 = vld [vmem:[%s10813_s8 + $0x318] sm:$0xf] }
 0x22b   :  { %4062 = vmatpush.bf16.msrb.mxu2 %v6327_v13  ;;  %4075 = vmatpush.bf16.msrb.mxu3 %v6551_v1  ;;  %v6191_v1 = vor.u32 %v7113_v19, %v6190_v53  ;;  %v6330_v53 = vld [vmem:[%s10813_s8 + $0x430] sm:$0xf]  ;;  %v7148_v19 = vld [vmem:[%s10813_s8 + $0x448] sm:$0xf0] }
 0x22e   :  { %4037 = vmatpush.bf16.msrb.mxu0 %v5851_v56  ;;  %4050 = vmatpush.bf16.msrb.mxu1 %v6075_v61  ;;  %v6442_v56 = vld [vmem:[%s10813_s8 + $0x510] sm:$0xf]  ;;  %v7176_v61 = vld [vmem:[%s10813_s8 + $0x528] sm:$0xf0] }
 0x22f   :  { %4063 = vmatpush.bf16.msrb.mxu2 %v6299_v10  ;;  %4076 = vmatpush.bf16.msrb.mxu3 %v6523_v12  ;;  %v6443_v7 = vor.u32 %v7176_v61, %v6442_v56  ;;  %v7169_v12 = vld [vmem:[%s10813_s8 + $0x4f0] sm:$0xf0]  ;;  %v5826_v61 = vld [vmem:[%s10813_s8 + $0x40] sm:$0xf] }
 0x230   :  { %v5827_v27 = vor.u32 %v7022_v57, %v5826_v61  ;;  %v7040_v61 = vld [vmem:[%s10813_s8 + $0xec] sm:$0xf]  ;;  %v5912_v57 = vld [vmem:[%s10813_s8 + $0x104] sm:$0xf0] }
 0x232   :  { %4038 = vmatpush.bf16.msrb.mxu0 %v5823_v2  ;;  %4051 = vmatpush.bf16.msrb.mxu1 %v6047_v4  ;;  %v7050_v2 = vld [vmem:[%s10813_s8 + $0x138] sm:$0xf0] }
 0x233   :  { %4064 = vmatpush.bf16.msrb.mxu2 %v6271_v21  ;;  %4077 = vmatpush.bf16.msrb.mxu3 %v6495_v8  ;;  %v5939_v10 = vor.u32 %v7050_v2, %v5938_v36  ;;  %v7099_v21 = vld [vmem:[%s10813_s8 + $0x2c0] sm:$0xf0]  ;;  %v6415_v8 = vor.u32 %v7169_v12, %v6414_v11  ;;  %v6526_v36 = vld [vmem:[%s10813_s8 + $0x5b8] sm:$0xf]  ;;  %v7197_v2 = vld [vmem:[%s10813_s8 + $0x5d0] sm:$0xf0] }
 0x234   :  { %v6135_v41 = vor.u32 %v7099_v21, %v6134_v17  ;;  %v5996_v11 = vld [vmem:[%s10813_s8 + $0x1ac] sm:$0xf0]  ;;  %v6498_v17 = vld [vmem:[%s10813_s8 + $0x580] sm:$0xf]  ;;  %v7190_v21 = vld [vmem:[%s10813_s8 + $0x598] sm:$0xf0] }
 0x236   :  { %4039 = vmatpush.bf16.msrb.mxu0 %v5795_v63  ;;  %4052 = vmatpush.bf16.msrb.mxu1 %v6019_v34  ;;  %v6638_v63 = vld [vmem:[%s10813_s8 + $0x698] sm:$0xf]  ;;  %v5910_v34 = vld [vmem:[%s10813_s8 + $0xe8] sm:$0xf] }
 0x237   :  { %4065 = vmatpush.bf16.msrb.mxu2 %v6243_v40  ;;  %4078 = vmatpush.bf16.msrb.mxu3 %v6467_v29  ;;  %v6639_v20 = vor.u32 %v7225_v14, %v6638_v63  ;;  %v5911_v40 = vor.u32 %v7043_v15, %v5910_v34  ;;  %v6610_v29 = vld [vmem:[%s10813_s8 + $0x660] sm:$0xf]  ;;  %v7117_v63 = vld [vmem:[%s10813_s8 + $0x354] sm:$0xf]  ;;  %v6220_v14 = vld [vmem:[%s10813_s8 + $0x36c] sm:$0xf0] }
 0x238   :  { %v6274_v34 = vld [vmem:[%s10813_s8 + $0x3c0] sm:$0xf]  ;;  %v7134_v15 = vld [vmem:[%s10813_s8 + $0x3d8] sm:$0xf0] }
 0x239   :  { %v6275_v26 = vor.u32 %v7134_v15, %v6274_v34 }
 0x295   :  { %v2505_v32 = vpop.f32.mrf.mxu0  ;;  %v2518_v33 = vpop.f32.mrf.mxu1 }
 0x296   :  { %v2506_v38 = vadd.f32 %v2505_v32, %v2328_v30  ;;  %v2519_v39 = vadd.f32 %v2518_v33, %v2329_v31  ;;  %v5882_v30 = vld [vmem:[%s10813_s8 + $0xb0] sm:$0xf]  ;;  %v7036_v31 = vld [vmem:[%s10813_s8 + $0xc8] sm:$0xf0] }
 0x297   :  { %v6106_v32 = vld [vmem:[%s10813_s8 + $0x270] sm:$0xf]  ;;  %v7092_v33 = vld [vmem:[%s10813_s8 + $0x288] sm:$0xf0] }
 0x298   :  { %v2548_v46 = vmax.f32 %v2506_v38, 0.0  ;;  %v2549_v47 = vmax.f32 %v2519_v39, 0.0  ;;  %v6611_v38 = vor.u32 %v7218_v37, %v6610_v29  ;;  %v6358_v39 = vld [vmem:[%s10813_s8 + $0x468] sm:$0xf]  ;;  %v6499_v29 = vor.u32 %v7190_v21, %v6498_v17  ;;  %v6192_v37 = vld [vmem:[%s10813_s8 + $0x334] sm:$0xf0] }
 0x299   :  { %v6359_v51 = vor.u32 %v7155_v42, %v6358_v39  ;;  %v7229_v39 = vld [vmem:[%s10813_s8 + $0x6d4] sm:$0xf]  ;;  %v6668_v42 = vld [vmem:[%s10813_s8 + $0x6ec] sm:$0xf0]  ;;  %v7026_v17 = vld [vmem:[%s10813_s8 + $0x7c] sm:$0xf] }
 0x29a   :  { %v9812_v52 = vpack.c.bf16 %v2548_v46, %v2548_v46  ;;  %v9814_v18 = vpack.c.bf16 %v2549_v47, %v2549_v47  ;;  %v5883_v46 = vor.u32 %v7036_v31, %v5882_v30  ;;  %v6107_v47 = vor.u32 %v7092_v33, %v6106_v32  ;;  %v6246_v30 = vld [vmem:[%s10813_s8 + $0x388] sm:$0xf]  ;;  %v7127_v31 = vld [vmem:[%s10813_s8 + $0x3a0] sm:$0xf0]  ;;  %v5856_v21 = vld [vmem:[%s10813_s8 + $0x94] sm:$0xf0] }
 0x29b   :  { %v6470_v32 = vld [vmem:[%s10813_s8 + $0x548] sm:$0xf]  ;;  %v7183_v33 = vld [vmem:[%s10813_s8 + $0x560] sm:$0xf0] }
 0x29c   :  { %v2531_v48 = vpop.f32.mrf.mxu2  ;;  %v2544_v54 = vpop.f32.mrf.mxu3  ;;  %3988 = vmatmul.bf16.vlgmr.msra.gmra.mxu0 %v9812_v52  ;;  %4001 = vmatmul.bf16.vlgmr.msra.gmra.mxu1 %v9814_v18 }
 0x29d   :  { %v2532_v59 = vadd.f32 %v2531_v48, %v2330_v49  ;;  %v2545_v62 = vadd.f32 %v2544_v54, %v2331_v24  ;;  %4084 = vmatpush.bf16.msra.mxu0 %v5995_v60  ;;  %4097 = vmatpush.bf16.msra.mxu1 %v6219_v50  ;;  %v2507_v13 = vpop.f32.mrf.mxu0  ;;  %v2520_v0 = vpop.f32.mrf.mxu1  ;;  %v5854_v49 = vld [vmem:[%s10813_s8 + $0x78] sm:$0xf]  ;;  %v7029_v24 = vld [vmem:[%s10813_s8 + $0x90] sm:$0xf0]  ;;  %v6554_v48 = vld [vmem:[%s10813_s8 + $0x5f0] sm:$0xf] }
 0x29e   :  { %v6078_v60 = vld [vmem:[%s10813_s8 + $0x238] sm:$0xf]  ;;  %v7085_v50 = vld [vmem:[%s10813_s8 + $0x250] sm:$0xf0]  ;;  %v7204_v54 = vld [vmem:[%s10813_s8 + $0x608] sm:$0xf0]  ;;  %v6331_v13 = vor.u32 %v7148_v19, %v6330_v53 }
 0x29f   :  { %v2550_v4 = vmax.f32 %v2532_v59, 0.0  ;;  %v2551_v5 = vmax.f32 %v2545_v62, 0.0  ;;  %v6079_v56 = vor.u32 %v7085_v50, %v6078_v60  ;;  %v6050_v59 = vld [vmem:[%s10813_s8 + $0x200] sm:$0xf]  ;;  %v7078_v62 = vld [vmem:[%s10813_s8 + $0x218] sm:$0xf0]  ;;  %v6555_v0 = vor.u32 %v7204_v54, %v6554_v48 }
 0x2a0   :  { %v6051_v16 = vor.u32 %v7078_v62, %v6050_v59  ;;  %v7103_v60 = vld [vmem:[%s10813_s8 + $0x2e4] sm:$0xf]  ;;  %v6164_v50 = vld [vmem:[%s10813_s8 + $0x2fc] sm:$0xf0]  ;;  %v7166_v53 = vld [vmem:[%s10813_s8 + $0x4dc] sm:$0xf] }
 0x2a1   :  { %v9854_v28 = vpack.c.bf16 %v2550_v4, %v2550_v4  ;;  %v9856_v6 = vpack.c.bf16 %v2551_v5, %v2551_v5  ;;  %4085 = vmatpush.bf16.msra.mxu0 %v5967_v55  ;;  %4098 = vmatpush.bf16.msra.mxu1 %v6191_v1  ;;  %v5855_v55 = vor.u32 %v7029_v24, %v5854_v49  ;;  %v6302_v1 = vld [vmem:[%s10813_s8 + $0x3f8] sm:$0xf]  ;;  %v5798_v4 = vld [vmem:[%s10813_s8 + $0x8] sm:$0xf]  ;;  %v7015_v5 = vld [vmem:[%s10813_s8 + $0x20] sm:$0xf0] }
 0x2a2   :  { %v6303_v12 = vor.u32 %v7141_v3, %v6302_v1  ;;  %v6471_v49 = vor.u32 %v7183_v33, %v6470_v32  ;;  %v5940_v24 = vld [vmem:[%s10813_s8 + $0x13c] sm:$0xf0]  ;;  %v6416_v19 = vld [vmem:[%s10813_s8 + $0x4f4] sm:$0xf0]  ;;  %v7222_v48 = vld [vmem:[%s10813_s8 + $0x69c] sm:$0xf] }
 0x2a3   :  { %4014 = vmatmul.bf16.vlgmr.msra.gmra.mxu2 %v9854_v28  ;;  %4027 = vmatmul.bf16.vlgmr.msra.gmra.mxu3 %v9856_v6  ;;  %v6640_v54 = vld [vmem:[%s10813_s8 + $0x6b4] sm:$0xf0]  ;;  %v7096_v59 = vld [vmem:[%s10813_s8 + $0x2ac] sm:$0xf]  ;;  %v6136_v62 = vld [vmem:[%s10813_s8 + $0x2c4] sm:$0xf0] }
 0x2a4   :  { %4110 = vmatpush.bf16.msra.mxu2 %v6443_v7  ;;  %4123 = vmatpush.bf16.msra.mxu3 %v6667_v9  ;;  %v2533_v23 = vpop.f32.mrf.mxu2  ;;  %v2546_v43 = vpop.f32.mrf.mxu3  ;;  %v6022_v7 = vld [vmem:[%s10813_s8 + $0x1c8] sm:$0xf]  ;;  %v7071_v9 = vld [vmem:[%s10813_s8 + $0x1e0] sm:$0xf0]  ;;  %v6388_v3 = vld [vmem:[%s10813_s8 + $0x4bc] sm:$0xf0] }
 0x2a5   :  { %4086 = vmatpush.bf16.msra.mxu0 %v5939_v10  ;;  %4099 = vmatpush.bf16.msra.mxu1 %v6163_v58  ;;  %v7061_v10 = vld [vmem:[%s10813_s8 + $0x194] sm:$0xf]  ;;  %v6527_v58 = vor.u32 %v7197_v2, %v6526_v36  ;;  %v5799_v23 = vor.u32 %v7015_v5, %v5798_v4  ;;  %v6023_v43 = vor.u32 %v7071_v9, %v6022_v7  ;;  %v7159_v1 = vld [vmem:[%s10813_s8 + $0x4a4] sm:$0xf]  ;;  %v6612_v2 = vld [vmem:[%s10813_s8 + $0x67c] sm:$0xf0] }
 0x2a6   :  { %v7215_v36 = vld [vmem:[%s10813_s8 + $0x664] sm:$0xf]  ;;  %v7033_v4 = vld [vmem:[%s10813_s8 + $0xb4] sm:$0xf]  ;;  %v5884_v5 = vld [vmem:[%s10813_s8 + $0xcc] sm:$0xf0] }
 0x2a7   :  { %v7089_v7 = vld [vmem:[%s10813_s8 + $0x274] sm:$0xf]  ;;  %v6108_v9 = vld [vmem:[%s10813_s8 + $0x28c] sm:$0xf0]  ;;  %v5887_v34 = vor.u32 %v7033_v4, %v5884_v5  ;;  %v7075_v32 = vld [vmem:[%s10813_s8 + $0x204] sm:$0xf] }
 0x2a8   :  { %4111 = vmatpush.bf16.msra.mxu2 %v6415_v8  ;;  %4124 = vmatpush.bf16.msra.mxu3 %v6639_v20  ;;  %v5999_v8 = vor.u32 %v7061_v10, %v5996_v11  ;;  %v6223_v20 = vor.u32 %v7117_v63, %v6220_v14  ;;  %v6391_v10 = vor.u32 %v7159_v1, %v6388_v3  ;;  %v7208_v63 = vld [vmem:[%s10813_s8 + $0x62c] sm:$0xf]  ;;  %v6584_v14 = vld [vmem:[%s10813_s8 + $0x644] sm:$0xf0]  ;;  %v6052_v33 = vld [vmem:[%s10813_s8 + $0x21c] sm:$0xf0] }
 0x2a9   :  { %4087 = vmatpush.bf16.msra.mxu0 %v5911_v40  ;;  %4100 = vmatpush.bf16.msra.mxu1 %v6135_v41  ;;  %v5968_v40 = vld [vmem:[%s10813_s8 + $0x174] sm:$0xf0]  ;;  %v7110_v41 = vld [vmem:[%s10813_s8 + $0x31c] sm:$0xf]  ;;  %v6615_v11 = vor.u32 %v7215_v36, %v6612_v2  ;;  %v6111_v15 = vor.u32 %v7089_v7, %v6108_v9  ;;  %v5974_v1 = vld [vmem:[%s10813_s8 + $0x160] sm:$0xf] }
 0x2aa   :  { %v5971_v44 = vor.u32 %v7054_v25, %v5968_v40  ;;  %v6195_v45 = vor.u32 %v7110_v41, %v6192_v37  ;;  %v7145_v25 = vld [vmem:[%s10813_s8 + $0x434] sm:$0xf]  ;;  %v6332_v40 = vld [vmem:[%s10813_s8 + $0x44c] sm:$0xf0]  ;;  %v7058_v3 = vld [vmem:[%s10813_s8 + $0x178] sm:$0xf0] }
 0x2ab   :  { %v7201_v41 = vld [vmem:[%s10813_s8 + $0x5f4] sm:$0xf]  ;;  %v6198_v36 = vld [vmem:[%s10813_s8 + $0x320] sm:$0xf]  ;;  %v7124_v4 = vld [vmem:[%s10813_s8 + $0x38c] sm:$0xf] }
 0x2ac   :  { %4112 = vmatpush.bf16.msra.mxu2 %v6387_v35  ;;  %4125 = vmatpush.bf16.msra.mxu3 %v6611_v38  ;;  %v7173_v35 = vld [vmem:[%s10813_s8 + $0x514] sm:$0xf]  ;;  %v6444_v38 = vld [vmem:[%s10813_s8 + $0x52c] sm:$0xf0]  ;;  %v6248_v5 = vld [vmem:[%s10813_s8 + $0x3a4] sm:$0xf0] }
 0x2ad   :  { %4040 = vmatmul.bf16.vlgmr.msrb.gmra.mxu0 %v9812_v52  ;;  %4053 = vmatmul.bf16.vlgmr.msrb.gmra.mxu1 %v9814_v18  ;;  %v7180_v7 = vld [vmem:[%s10813_s8 + $0x54c] sm:$0xf]  ;;  %v6472_v9 = vld [vmem:[%s10813_s8 + $0x564] sm:$0xf0] }
 0x2ae   :  { %4088 = vmatpush.bf16.msra.mxu0 %v5883_v46  ;;  %4101 = vmatpush.bf16.msra.mxu1 %v6107_v47  ;;  %v7047_v46 = vld [vmem:[%s10813_s8 + $0x124] sm:$0xf]  ;;  %v6247_v47 = vor.u32 %v7127_v31, %v6246_v30  ;;  %v5828_v31 = vld [vmem:[%s10813_s8 + $0x5c] sm:$0xf0] }
 0x2af   :  { %v7019_v30 = vld [vmem:[%s10813_s8 + $0x44] sm:$0xf] }
 0x2b0   :  { %4113 = vmatpush.bf16.msra.mxu2 %v6359_v51  ;;  %4126 = vmatpush.bf16.msra.mxu3 %v6583_v22  ;;  %v6447_v51 = vor.u32 %v7173_v35, %v6444_v38  ;;  %v6671_v22 = vor.u32 %v7229_v39, %v6668_v42  ;;  %v6335_v35 = vor.u32 %v7145_v25, %v6332_v40  ;;  %v7138_v39 = vld [vmem:[%s10813_s8 + $0x3fc] sm:$0xf]  ;;  %v6304_v42 = vld [vmem:[%s10813_s8 + $0x414] sm:$0xf0]  ;;  %v6422_v25 = vld [vmem:[%s10813_s8 + $0x4e0] sm:$0xf] }
 0x2b1   :  { %v7170_v40 = vld [vmem:[%s10813_s8 + $0x4f8] sm:$0xf0] }
 0x2b2   :  { %4089 = vmatpush.bf16.msra.mxu0 %v5855_v55  ;;  %4102 = vmatpush.bf16.msra.mxu1 %v6079_v56  ;;  %v5943_v55 = vor.u32 %v7047_v46, %v5940_v24  ;;  %v6167_v56 = vor.u32 %v7103_v60, %v6164_v50  ;;  %v5831_v46 = vor.u32 %v7019_v30, %v5828_v31  ;;  %v5800_v24 = vld [vmem:[%s10813_s8 + $0x24] sm:$0xf0]  ;;  %v7068_v60 = vld [vmem:[%s10813_s8 + $0x1cc] sm:$0xf]  ;;  %v5918_v30 = vld [vmem:[%s10813_s8 + $0xf0] sm:$0xf] }
 0x2b3   :  { %4066 = vmatmul.bf16.vlgmr.msrb.gmra.mxu2 %v9854_v28  ;;  %4079 = vmatmul.bf16.vlgmr.msrb.gmra.mxu3 %v9856_v6  ;;  %v6024_v50 = vld [vmem:[%s10813_s8 + $0x1e4] sm:$0xf0]  ;;  %v7044_v31 = vld [vmem:[%s10813_s8 + $0x108] sm:$0xf0] }
 0x2b4   :  { %4114 = vmatpush.bf16.msra.mxu2 %v6331_v13  ;;  %4127 = vmatpush.bf16.msra.mxu3 %v6555_v0  ;;  %v6419_v13 = vor.u32 %v7166_v53, %v6416_v19  ;;  %v6643_v0 = vor.u32 %v7222_v48, %v6640_v54  ;;  %v6307_v53 = vor.u32 %v7138_v39, %v6304_v42  ;;  %v6226_v48 = vld [vmem:[%s10813_s8 + $0x358] sm:$0xf]  ;;  %v7121_v54 = vld [vmem:[%s10813_s8 + $0x370] sm:$0xf0]  ;;  %v6394_v39 = vld [vmem:[%s10813_s8 + $0x4a8] sm:$0xf] }
 0x2b5   :  { %v7163_v42 = vld [vmem:[%s10813_s8 + $0x4c0] sm:$0xf0] }
 0x2b6   :  { %4090 = vmatpush.bf16.msra.mxu0 %v5827_v27  ;;  %4103 = vmatpush.bf16.msra.mxu1 %v6051_v16  ;;  %v5915_v27 = vor.u32 %v7040_v61, %v5912_v57  ;;  %v6139_v16 = vor.u32 %v7096_v59, %v6136_v62  ;;  %v7187_v61 = vld [vmem:[%s10813_s8 + $0x584] sm:$0xf]  ;;  %v6500_v57 = vld [vmem:[%s10813_s8 + $0x59c] sm:$0xf0]  ;;  %v6027_v62 = vor.u32 %v7068_v60, %v6024_v50 }
 0x2b7   :  { %v6395_v60 = vor.u32 %v7163_v42, %v6394_v39  ;;  %v7055_v39 = vld [vmem:[%s10813_s8 + $0x164] sm:$0xf]  ;;  %v5976_v42 = vld [vmem:[%s10813_s8 + $0x17c] sm:$0xf0] }
 0x2b8   :  { %4115 = vmatpush.bf16.msra.mxu2 %v6303_v12  ;;  %4128 = vmatpush.bf16.msra.mxu3 %v6527_v58  ;;  %v7152_v12 = vld [vmem:[%s10813_s8 + $0x46c] sm:$0xf]  ;;  %v6360_v58 = vld [vmem:[%s10813_s8 + $0x484] sm:$0xf0] }
 0x2ba   :  { %4091 = vmatpush.bf16.msra.mxu0 %v5799_v23  ;;  %4104 = vmatpush.bf16.msra.mxu1 %v6023_v43  ;;  %v7082_v23 = vld [vmem:[%s10813_s8 + $0x23c] sm:$0xf]  ;;  %v6080_v43 = vld [vmem:[%s10813_s8 + $0x254] sm:$0xf0] }
 0x2bb   :  { %v6083_v37 = vor.u32 %v7082_v23, %v6080_v43 }
 0x2bc   :  { %4116 = vmatpush.bf16.msra.mxu2 %v6275_v26  ;;  %4129 = vmatpush.bf16.msra.mxu3 %v6499_v29  ;;  %v6556_v26 = vld [vmem:[%s10813_s8 + $0x60c] sm:$0xf0]  ;;  %v5859_v29 = vor.u32 %v7026_v17, %v5856_v21  ;;  %v5946_v17 = vld [vmem:[%s10813_s8 + $0x128] sm:$0xf]  ;;  %v7051_v21 = vld [vmem:[%s10813_s8 + $0x140] sm:$0xf0] }
 0x2bd   :  { %4092 = vmatmul.bf16.vlgmr.msra.gmra.mxu0 %v9812_v52  ;;  %4105 = vmatmul.bf16.vlgmr.msra.gmra.mxu1 %v9814_v18  ;;  %v6559_v38 = vor.u32 %v7201_v41, %v6556_v26  ;;  %v6646_v41 = vld [vmem:[%s10813_s8 + $0x6a0] sm:$0xf]  ;;  %v7226_v26 = vld [vmem:[%s10813_s8 + $0x6b8] sm:$0xf0] }
 0x2be   :  { %4136 = vmatpush.bf16.msrb.mxu0 %v5999_v8  ;;  %4149 = vmatpush.bf16.msrb.mxu1 %v6223_v20  ;;  %v6363_v8 = vor.u32 %v7152_v12, %v6360_v58  ;;  %v6587_v20 = vor.u32 %v7208_v63, %v6584_v14  ;;  %v6674_v12 = vld [vmem:[%s10813_s8 + $0x6d8] sm:$0xf]  ;;  %v7233_v58 = vld [vmem:[%s10813_s8 + $0x6f0] sm:$0xf0]  ;;  %v5975_v63 = vor.u32 %v7058_v3, %v5974_v1 }
 0x2bf   :  { %v6675_v43 = vor.u32 %v7233_v58, %v6674_v12  ;;  %v6338_v1 = vld [vmem:[%s10813_s8 + $0x438] sm:$0xf]  ;;  %v7149_v3 = vld [vmem:[%s10813_s8 + $0x450] sm:$0xf0]  ;;  %v6310_v12 = vld [vmem:[%s10813_s8 + $0x400] sm:$0xf] }
 0x2c0   :  { %4117 = vmatpush.bf16.msra.mxu2 %v6247_v47  ;;  %4130 = vmatpush.bf16.msra.mxu3 %v6471_v49  ;;  %v6055_v47 = vor.u32 %v7075_v32, %v6052_v33  ;;  %v7012_v49 = vld [vmem:[%s10813_s8 + $0xc] sm:$0xf]  ;;  %v6423_v32 = vor.u32 %v7170_v40, %v6422_v25  ;;  %v6647_v33 = vor.u32 %v7226_v26, %v6646_v41  ;;  %v7142_v58 = vld [vmem:[%s10813_s8 + $0x418] sm:$0xf0]  ;;  %v6004_v40 = vld [vmem:[%s10813_s8 + $0x1b4] sm:$0xf0] }
 0x2c1   :  { %v5803_v59 = vor.u32 %v7012_v49, %v5800_v24  ;;  %v5890_v49 = vld [vmem:[%s10813_s8 + $0xb8] sm:$0xf]  ;;  %v7037_v24 = vld [vmem:[%s10813_s8 + $0xd0] sm:$0xf0]  ;;  %v7062_v25 = vld [vmem:[%s10813_s8 + $0x19c] sm:$0xf] }
 0x2c2   :  { %4137 = vmatpush.bf16.msrb.mxu0 %v5971_v44  ;;  %4150 = vmatpush.bf16.msrb.mxu1 %v6195_v45  ;;  %v7194_v44 = vld [vmem:[%s10813_s8 + $0x5bc] sm:$0xf]  ;;  %v6528_v45 = vld [vmem:[%s10813_s8 + $0x5d4] sm:$0xf0] }
 0x2c3   :  { %4118 = vmatmul.bf16.vlgmr.msra.gmra.mxu2 %v9854_v28  ;;  %4131 = vmatmul.bf16.vlgmr.msra.gmra.mxu3 %v9856_v6  ;;  %v6531_v19 = vor.u32 %v7194_v44, %v6528_v45  ;;  %v6618_v44 = vld [vmem:[%s10813_s8 + $0x668] sm:$0xf]  ;;  %v7219_v45 = vld [vmem:[%s10813_s8 + $0x680] sm:$0xf0]  ;;  %v7118_v41 = vld [vmem:[%s10813_s8 + $0x35c] sm:$0xf] }
 0x2c4   :  { %4162 = vmatpush.bf16.msrb.mxu2 %v6447_v51  ;;  %4175 = vmatpush.bf16.msrb.mxu3 %v6671_v22  ;;  %v6002_v51 = vld [vmem:[%s10813_s8 + $0x198] sm:$0xf]  ;;  %v7065_v22 = vld [vmem:[%s10813_s8 + $0x1b0] sm:$0xf0]  ;;  %v6619_v50 = vor.u32 %v7219_v45, %v6618_v44  ;;  %v7111_v44 = vld [vmem:[%s10813_s8 + $0x324] sm:$0xf] }
 0x2c5   :  { %v6228_v26 = vld [vmem:[%s10813_s8 + $0x374] sm:$0xf0] }
 0x2c6   :  { %4138 = vmatpush.bf16.msrb.mxu0 %v5943_v55  ;;  %4151 = vmatpush.bf16.msrb.mxu1 %v6167_v56  ;;  %v7131_v55 = vld [vmem:[%s10813_s8 + $0x3c4] sm:$0xf]  ;;  %v6276_v56 = vld [vmem:[%s10813_s8 + $0x3dc] sm:$0xf0] }
 0x2c7   :  { %v6279_v2 = vor.u32 %v7131_v55, %v6276_v56  ;;  %v5891_v55 = vor.u32 %v7037_v24, %v5890_v49  ;;  %v6254_v49 = vld [vmem:[%s10813_s8 + $0x390] sm:$0xf]  ;;  %v7128_v24 = vld [vmem:[%s10813_s8 + $0x3a8] sm:$0xf0] }
 0x2c8   :  { %4163 = vmatpush.bf16.msrb.mxu2 %v6419_v13  ;;  %4176 = vmatpush.bf16.msrb.mxu3 %v6643_v0  ;;  %v6003_v13 = vor.u32 %v7065_v22, %v6002_v51  ;;  %v6227_v0 = vor.u32 %v7121_v54, %v6226_v48  ;;  %v6114_v51 = vld [vmem:[%s10813_s8 + $0x278] sm:$0xf]  ;;  %v7093_v22 = vld [vmem:[%s10813_s8 + $0x290] sm:$0xf0]  ;;  %v6590_v48 = vld [vmem:[%s10813_s8 + $0x630] sm:$0xf] }
 0x2c9   :  { %v7212_v54 = vld [vmem:[%s10813_s8 + $0x648] sm:$0xf0]  ;;  %v6115_v56 = vor.u32 %v7093_v22, %v6114_v51  ;;  %v7174_v51 = vld [vmem:[%s10813_s8 + $0x51c] sm:$0xf]  ;;  %v6452_v22 = vld [vmem:[%s10813_s8 + $0x534] sm:$0xf0] }
 0x2ca   :  { %4139 = vmatpush.bf16.msrb.mxu0 %v5915_v27  ;;  %4152 = vmatpush.bf16.msrb.mxu1 %v6139_v16  ;;  %v6503_v27 = vor.u32 %v7187_v61, %v6500_v57  ;;  %v7114_v16 = vld [vmem:[%s10813_s8 + $0x338] sm:$0xf0]  ;;  %v5862_v61 = vld [vmem:[%s10813_s8 + $0x80] sm:$0xf] }
 0x2cb   :  { %v6199_v14 = vor.u32 %v7114_v16, %v6198_v36  ;;  %v7030_v57 = vld [vmem:[%s10813_s8 + $0x98] sm:$0xf0]  ;;  %v6562_v36 = vld [vmem:[%s10813_s8 + $0x5f8] sm:$0xf] }
 0x2cc   :  { %4164 = vmatpush.bf16.msrb.mxu2 %v6391_v10  ;;  %4177 = vmatpush.bf16.msrb.mxu3 %v6615_v11  ;;  %v6450_v10 = vld [vmem:[%s10813_s8 + $0x518] sm:$0xf]  ;;  %v7177_v11 = vld [vmem:[%s10813_s8 + $0x530] sm:$0xf0] }
 0x2cd   :  { %v6451_v23 = vor.u32 %v7177_v11, %v6450_v10  ;;  %v6058_v10 = vld [vmem:[%s10813_s8 + $0x208] sm:$0xf]  ;;  %v7079_v11 = vld [vmem:[%s10813_s8 + $0x220] sm:$0xf0] }
 0x2ce   :  { %4140 = vmatpush.bf16.msrb.mxu0 %v5887_v34  ;;  %4153 = vmatpush.bf16.msrb.mxu1 %v6111_v15  ;;  %v6251_v34 = vor.u32 %v7124_v4, %v6248_v5  ;;  %v6475_v15 = vor.u32 %v7180_v7, %v6472_v9  ;;  %v5834_v4 = vld [vmem:[%s10813_s8 + $0x48] sm:$0xf]  ;;  %v7023_v5 = vld [vmem:[%s10813_s8 + $0x60] sm:$0xf0]  ;;  %v6339_v7 = vor.u32 %v7149_v3, %v6338_v1  ;;  %v6424_v3 = vld [vmem:[%s10813_s8 + $0x4fc] sm:$0xf0] }
 0x2cf   :  { %v7167_v1 = vld [vmem:[%s10813_s8 + $0x4e4] sm:$0xf] }
 0x2d0   :  { %4165 = vmatpush.bf16.msrb.mxu2 %v6363_v8  ;;  %4178 = vmatpush.bf16.msrb.mxu3 %v6587_v20  ;;  %v6170_v8 = vld [vmem:[%s10813_s8 + $0x2e8] sm:$0xf]  ;;  %v7107_v20 = vld [vmem:[%s10813_s8 + $0x300] sm:$0xf0] }
 0x2d2   :  { %4141 = vmatpush.bf16.msrb.mxu0 %v5859_v29  ;;  %4154 = vmatpush.bf16.msrb.mxu1 %v6083_v37  ;;  %v5947_v29 = vor.u32 %v7051_v21, %v5946_v17  ;;  %v6171_v37 = vor.u32 %v7107_v20, %v6170_v8  ;;  %v5806_v17 = vld [vmem:[%s10813_s8 + $0x10] sm:$0xf]  ;;  %v7016_v21 = vld [vmem:[%s10813_s8 + $0x28] sm:$0xf0] }
 0x2d3   :  { %v7072_v20 = vld [vmem:[%s10813_s8 + $0x1e8] sm:$0xf0] }
 0x2d4   :  { %4166 = vmatpush.bf16.msrb.mxu2 %v6335_v35  ;;  %4179 = vmatpush.bf16.msrb.mxu3 %v6559_v38  ;;  %v6142_v35 = vld [vmem:[%s10813_s8 + $0x2b0] sm:$0xf]  ;;  %v7100_v38 = vld [vmem:[%s10813_s8 + $0x2c8] sm:$0xf0] }
 0x2d6   :  { %4142 = vmatpush.bf16.msrb.mxu0 %v5831_v46  ;;  %4155 = vmatpush.bf16.msrb.mxu1 %v6055_v47  ;;  %v5919_v46 = vor.u32 %v7044_v31, %v5918_v30  ;;  %v6143_v47 = vor.u32 %v7100_v38, %v6142_v35  ;;  %v6506_v30 = vld [vmem:[%s10813_s8 + $0x588] sm:$0xf]  ;;  %v7191_v31 = vld [vmem:[%s10813_s8 + $0x5a0] sm:$0xf0]  ;;  %v6007_v35 = vor.u32 %v7062_v25, %v6004_v40  ;;  %v7153_v25 = vld [vmem:[%s10813_s8 + $0x474] sm:$0xf] }
 0x2d7   :  { %v6231_v38 = vor.u32 %v7118_v41, %v6228_v26  ;;  %v6368_v40 = vld [vmem:[%s10813_s8 + $0x48c] sm:$0xf0]  ;;  %v7209_v41 = vld [vmem:[%s10813_s8 + $0x634] sm:$0xf] }
 0x2d8   :  { %4167 = vmatpush.bf16.msrb.mxu2 %v6307_v53  ;;  %4180 = vmatpush.bf16.msrb.mxu3 %v6531_v19  ;;  %v6366_v53 = vld [vmem:[%s10813_s8 + $0x470] sm:$0xf]  ;;  %v7156_v19 = vld [vmem:[%s10813_s8 + $0x488] sm:$0xf0] }
 0x2d9   :  { %v6592_v26 = vld [vmem:[%s10813_s8 + $0x64c] sm:$0xf0] }
 0x2da   :  { %4143 = vmatpush.bf16.msrb.mxu0 %v5803_v59  ;;  %4156 = vmatpush.bf16.msrb.mxu1 %v6027_v62  ;;  %v6367_v59 = vor.u32 %v7156_v19, %v6366_v53  ;;  %v6591_v62 = vor.u32 %v7212_v54, %v6590_v48  ;;  %v7230_v53 = vld [vmem:[%s10813_s8 + $0x6dc] sm:$0xf]  ;;  %v6676_v19 = vld [vmem:[%s10813_s8 + $0x6f4] sm:$0xf0]  ;;  %v5979_v48 = vor.u32 %v7055_v39, %v5976_v42 }
 0x2db   :  { %v7146_v39 = vld [vmem:[%s10813_s8 + $0x43c] sm:$0xf]  ;;  %v6340_v42 = vld [vmem:[%s10813_s8 + $0x454] sm:$0xf0] }
 0x2dc   :  { %4168 = vmatpush.bf16.msrb.mxu2 %v6279_v2  ;;  %4181 = vmatpush.bf16.msrb.mxu3 %v6503_v27  ;;  %v7205_v2 = vld [vmem:[%s10813_s8 + $0x610] sm:$0xf0]  ;;  %v5863_v27 = vor.u32 %v7030_v57, %v5862_v61  ;;  %v7048_v61 = vld [vmem:[%s10813_s8 + $0x12c] sm:$0xf]  ;;  %v5948_v57 = vld [vmem:[%s10813_s8 + $0x144] sm:$0xf0] }
 0x2dd   :  { %4144 = vmatmul.bf16.vlgmr.msrb.gmra.mxu0 %v9812_v52  ;;  %4157 = vmatmul.bf16.vlgmr.msrb.gmra.mxu1 %v9814_v18  ;;  %v6563_v9 = vor.u32 %v7205_v2, %v6562_v36  ;;  %v7223_v36 = vld [vmem:[%s10813_s8 + $0x6a4] sm:$0xf]  ;;  %v6648_v2 = vld [vmem:[%s10813_s8 + $0x6bc] sm:$0xf0] }
 0x2de   :  { %4188 = vmatpush.bf16.msra.mxu0 %v6003_v13  ;;  %4201 = vmatpush.bf16.msra.mxu1 %v6227_v0  ;;  %v6086_v13 = vld [vmem:[%s10813_s8 + $0x240] sm:$0xf]  ;;  %v7086_v0 = vld [vmem:[%s10813_s8 + $0x258] sm:$0xf0] }
 0x2df   :  { %v6087_v16 = vor.u32 %v7086_v0, %v6086_v13  ;;  %v7104_v13 = vld [vmem:[%s10813_s8 + $0x2ec] sm:$0xf]  ;;  %v6172_v0 = vld [vmem:[%s10813_s8 + $0x304] sm:$0xf0] }
 0x2e0   :  { %4169 = vmatpush.bf16.msrb.mxu2 %v6251_v34  ;;  %4182 = vmatpush.bf16.msrb.mxu3 %v6475_v15  ;;  %v5835_v34 = vor.u32 %v7023_v5, %v5834_v4  ;;  %v6059_v15 = vor.u32 %v7079_v11, %v6058_v10  ;;  %v7041_v4 = vld [vmem:[%s10813_s8 + $0xf4] sm:$0xf]  ;;  %v5920_v5 = vld [vmem:[%s10813_s8 + $0x10c] sm:$0xf0] }
 0x2e1   :  { %v7097_v10 = vld [vmem:[%s10813_s8 + $0x2b4] sm:$0xf]  ;;  %v6144_v11 = vld [vmem:[%s10813_s8 + $0x2cc] sm:$0xf0] }
 0x2e2   :  { %4189 = vmatpush.bf16.msra.mxu0 %v5975_v63  ;;  %4202 = vmatpush.bf16.msra.mxu1 %v6199_v14  ;;  %v6534_v63 = vld [vmem:[%s10813_s8 + $0x5c0] sm:$0xf]  ;;  %v7198_v14 = vld [vmem:[%s10813_s8 + $0x5d8] sm:$0xf0] }
 0x2e3   :  { %4170 = vmatmul.bf16.vlgmr.msrb.gmra.mxu2 %v9854_v28  ;;  %4183 = vmatmul.bf16.vlgmr.msrb.gmra.mxu3 %v9856_v6  ;;  %v6535_v8 = vor.u32 %v7198_v14, %v6534_v63  ;;  %v7216_v63 = vld [vmem:[%s10813_s8 + $0x66c] sm:$0xf]  ;;  %v6620_v14 = vld [vmem:[%s10813_s8 + $0x684] sm:$0xf0] }
 0x2e4   :  { %4214 = vmatpush.bf16.msra.mxu2 %v6451_v23  ;;  %4227 = vmatpush.bf16.msra.mxu3 %v6675_v43  ;;  %v6030_v23 = vld [vmem:[%s10813_s8 + $0x1d0] sm:$0xf]  ;;  %v6311_v43 = vor.u32 %v7142_v58, %v6310_v12  ;;  %v7160_v12 = vld [vmem:[%s10813_s8 + $0x4ac] sm:$0xf]  ;;  %v6396_v58 = vld [vmem:[%s10813_s8 + $0x4c4] sm:$0xf0] }
 0x2e6   :  { %4190 = vmatpush.bf16.msra.mxu0 %v5947_v29  ;;  %4203 = vmatpush.bf16.msra.mxu1 %v6171_v37  ;;  %v6282_v29 = vld [vmem:[%s10813_s8 + $0x3c8] sm:$0xf]  ;;  %v7135_v37 = vld [vmem:[%s10813_s8 + $0x3e0] sm:$0xf0] }
 0x2e7   :  { %v6283_v45 = vor.u32 %v7135_v37, %v6282_v29 }
 0x2e8   :  { %4215 = vmatpush.bf16.msra.mxu2 %v6423_v32  ;;  %4228 = vmatpush.bf16.msra.mxu3 %v6647_v33  ;;  %v5807_v32 = vor.u32 %v7016_v21, %v5806_v17  ;;  %v6031_v33 = vor.u32 %v7072_v20, %v6030_v23  ;;  %v7034_v17 = vld [vmem:[%s10813_s8 + $0xbc] sm:$0xf]  ;;  %v5892_v21 = vld [vmem:[%s10813_s8 + $0xd4] sm:$0xf0]  ;;  %v6399_v23 = vor.u32 %v7160_v12, %v6396_v58  ;;  %v5982_v12 = vld [vmem:[%s10813_s8 + $0x168] sm:$0xf] }
 0x2e9   :  { %v6116_v20 = vld [vmem:[%s10813_s8 + $0x294] sm:$0xf0]  ;;  %v5895_v29 = vor.u32 %v7034_v17, %v5892_v21  ;;  %v7059_v58 = vld [vmem:[%s10813_s8 + $0x180] sm:$0xf0]  ;;  %v7125_v17 = vld [vmem:[%s10813_s8 + $0x394] sm:$0xf] }
 0x2ea   :  { %4191 = vmatpush.bf16.msra.mxu0 %v5919_v46  ;;  %4204 = vmatpush.bf16.msra.mxu1 %v6143_v47  ;;  %v6507_v46 = vor.u32 %v7191_v31, %v6506_v30  ;;  %v6200_v47 = vld [vmem:[%s10813_s8 + $0x33c] sm:$0xf0]  ;;  %v7027_v30 = vld [vmem:[%s10813_s8 + $0x84] sm:$0xf]  ;;  %v6256_v21 = vld [vmem:[%s10813_s8 + $0x3ac] sm:$0xf0] }
 0x2eb   :  { %v6203_v54 = vor.u32 %v7111_v44, %v6200_v47  ;;  %v5864_v31 = vld [vmem:[%s10813_s8 + $0x9c] sm:$0xf0]  ;;  %v7202_v44 = vld [vmem:[%s10813_s8 + $0x5fc] sm:$0xf] }
 0x2ec   :  { %4216 = vmatpush.bf16.msra.mxu2 %v6395_v60  ;;  %4229 = vmatpush.bf16.msra.mxu3 %v6619_v50  ;;  %v6478_v60 = vld [vmem:[%s10813_s8 + $0x550] sm:$0xf]  ;;  %v7184_v50 = vld [vmem:[%s10813_s8 + $0x568] sm:$0xf0] }
 0x2ee   :  { %4192 = vmatpush.bf16.msra.mxu0 %v5891_v55  ;;  %4205 = vmatpush.bf16.msra.mxu1 %v6115_v56  ;;  %v6255_v55 = vor.u32 %v7128_v24, %v6254_v49  ;;  %v6479_v56 = vor.u32 %v7184_v50, %v6478_v60  ;;  %v7020_v49 = vld [vmem:[%s10813_s8 + $0x4c] sm:$0xf]  ;;  %v5836_v24 = vld [vmem:[%s10813_s8 + $0x64] sm:$0xf0]  ;;  %v6343_v60 = vor.u32 %v7146_v39, %v6340_v42  ;;  %v7171_v42 = vld [vmem:[%s10813_s8 + $0x500] sm:$0xf0] }
 0x2ef   :  { %v6430_v39 = vld [vmem:[%s10813_s8 + $0x4e8] sm:$0xf] }
 0x2f0   :  { %4217 = vmatpush.bf16.msra.mxu2 %v6367_v59  ;;  %4230 = vmatpush.bf16.msra.mxu3 %v6591_v62  ;;  %v6455_v59 = vor.u32 %v7174_v51, %v6452_v22  ;;  %v6679_v62 = vor.u32 %v7230_v53, %v6676_v19  ;;  %v7076_v51 = vld [vmem:[%s10813_s8 + $0x20c] sm:$0xf]  ;;  %v6060_v22 = vld [vmem:[%s10813_s8 + $0x224] sm:$0xf0]  ;;  %v7139_v53 = vld [vmem:[%s10813_s8 + $0x404] sm:$0xf] }
 0x2f1   :  { %v6312_v19 = vld [vmem:[%s10813_s8 + $0x41c] sm:$0xf0] }
 0x2f2   :  { %4193 = vmatpush.bf16.msra.mxu0 %v5863_v27  ;;  %4206 = vmatpush.bf16.msra.mxu1 %v6087_v16  ;;  %v5951_v27 = vor.u32 %v7048_v61, %v5948_v57  ;;  %v6175_v16 = vor.u32 %v7104_v13, %v6172_v0  ;;  %v7013_v61 = vld [vmem:[%s10813_s8 + $0x14] sm:$0xf]  ;;  %v5808_v57 = vld [vmem:[%s10813_s8 + $0x2c] sm:$0xf0] }
 0x2f3   :  { %v6032_v0 = vld [vmem:[%s10813_s8 + $0x1ec] sm:$0xf0] }
 0x2f4   :  { %4218 = vmatpush.bf16.msra.mxu2 %v6339_v7  ;;  %4231 = vmatpush.bf16.msra.mxu3 %v6563_v9  ;;  %v6427_v7 = vor.u32 %v7167_v1, %v6424_v3  ;;  %v6651_v9 = vor.u32 %v7223_v36, %v6648_v2  ;;  %v6010_v1 = vld [vmem:[%s10813_s8 + $0x1a0] sm:$0xf]  ;;  %v7066_v3 = vld [vmem:[%s10813_s8 + $0x1b8] sm:$0xf0] }
 0x2f5   :  { %v6234_v36 = vld [vmem:[%s10813_s8 + $0x360] sm:$0xf]  ;;  %v7122_v2 = vld [vmem:[%s10813_s8 + $0x378] sm:$0xf0] }
 0x2f6   :  { %4194 = vmatpush.bf16.msra.mxu0 %v5835_v34  ;;  %4207 = vmatpush.bf16.msra.mxu1 %v6059_v15  ;;  %v5923_v34 = vor.u32 %v7041_v4, %v5920_v5  ;;  %v6147_v15 = vor.u32 %v7097_v10, %v6144_v11  ;;  %v7188_v4 = vld [vmem:[%s10813_s8 + $0x58c] sm:$0xf]  ;;  %v6508_v5 = vld [vmem:[%s10813_s8 + $0x5a4] sm:$0xf0]  ;;  %v6011_v10 = vor.u32 %v7066_v3, %v6010_v1 }
 0x2f7   :  { %v6235_v11 = vor.u32 %v7122_v2, %v6234_v36  ;;  %v6122_v36 = vld [vmem:[%s10813_s8 + $0x280] sm:$0xf]  ;;  %v7094_v2 = vld [vmem:[%s10813_s8 + $0x298] sm:$0xf0] }
 0x2f8   :  { %4219 = vmatpush.bf16.msra.mxu2 %v6311_v43  ;;  %4232 = vmatpush.bf16.msra.mxu3 %v6535_v8  ;;  %v6623_v43 = vor.u32 %v7216_v63, %v6620_v14  ;;  %v7090_v8 = vld [vmem:[%s10813_s8 + $0x27c] sm:$0xf]  ;;  %v6206_v63 = vld [vmem:[%s10813_s8 + $0x328] sm:$0xf] }
 0x2f9   :  { %v6119_v37 = vor.u32 %v7090_v8, %v6116_v20  ;;  %v6458_v8 = vld [vmem:[%s10813_s8 + $0x520] sm:$0xf]  ;;  %v7178_v20 = vld [vmem:[%s10813_s8 + $0x538] sm:$0xf0] }
 0x2fa   :  { %4195 = vmatpush.bf16.msra.mxu0 %v5807_v32  ;;  %4208 = vmatpush.bf16.msra.mxu1 %v6031_v33  ;;  %v6371_v32 = vor.u32 %v7153_v25, %v6368_v40  ;;  %v6595_v33 = vor.u32 %v7209_v41, %v6592_v26  ;;  %v6682_v25 = vld [vmem:[%s10813_s8 + $0x6e0] sm:$0xf]  ;;  %v7234_v40 = vld [vmem:[%s10813_s8 + $0x6f8] sm:$0xf0]  ;;  %v5983_v41 = vor.u32 %v7059_v58, %v5982_v12  ;;  %v5870_v58 = vld [vmem:[%s10813_s8 + $0x88] sm:$0xf] }
 0x2fc   :  { %4220 = vmatpush.bf16.msra.mxu2 %v6283_v45  ;;  %4233 = vmatpush.bf16.msra.mxu3 %v6507_v46  ;;  %v6564_v45 = vld [vmem:[%s10813_s8 + $0x614] sm:$0xf0]  ;;  %v5867_v46 = vor.u32 %v7027_v30, %v5864_v31  ;;  %v5954_v30 = vld [vmem:[%s10813_s8 + $0x130] sm:$0xf]  ;;  %v7052_v31 = vld [vmem:[%s10813_s8 + $0x148] sm:$0xf0] }
 0x2fd   :  { %4196 = vmatmul.bf16.vlgmr.msra.gmra.mxu0 %v9812_v52  ;;  %4209 = vmatmul.bf16.vlgmr.msra.gmra.mxu1 %v9814_v18  ;;  %v6567_v50 = vor.u32 %v7202_v44, %v6564_v45  ;;  %v6654_v44 = vld [vmem:[%s10813_s8 + $0x6a8] sm:$0xf]  ;;  %v7227_v45 = vld [vmem:[%s10813_s8 + $0x6c0] sm:$0xf0] }
 0x2fe   :  { %4240 = vmatpush.bf16.msrb.mxu0 %v6007_v35  ;;  %4253 = vmatpush.bf16.msrb.mxu1 %v6231_v38  ;;  %v7083_v35 = vld [vmem:[%s10813_s8 + $0x244] sm:$0xf]  ;;  %v6088_v38 = vld [vmem:[%s10813_s8 + $0x25c] sm:$0xf0] }
 0x2ff   :  { %v6091_v47 = vor.u32 %v7083_v35, %v6088_v38  ;;  %v6178_v35 = vld [vmem:[%s10813_s8 + $0x2f0] sm:$0xf]  ;;  %v7108_v38 = vld [vmem:[%s10813_s8 + $0x308] sm:$0xf0] }
 0x300   :  { %4221 = vmatpush.bf16.msra.mxu2 %v6255_v55  ;;  %4234 = vmatpush.bf16.msra.mxu3 %v6479_v56  ;;  %v5839_v55 = vor.u32 %v7020_v49, %v5836_v24  ;;  %v6063_v56 = vor.u32 %v7076_v51, %v6060_v22  ;;  %v10655_v49 = vld [vmem:[%s10814_s9] sm:$0x7f]  ;;  %v7045_v51 = vld [vmem:[%s10813_s8 + $0x110] sm:$0xf0]  ;;  %v6431_v22 = vor.u32 %v7171_v42, %v6430_v39  ;;  %v6542_v42 = vld [vmem:[%s10813_s8 + $0x5c8] sm:$0xf] }
 0x301   :  { %v7143_v39 = vld [vmem:[%s10813_s8 + $0x420] sm:$0xf0] }
 0x302   :  { %4241 = vmatpush.bf16.msrb.mxu0 %v5979_v48  ;;  %4254 = vmatpush.bf16.msrb.mxu1 %v6203_v54  ;;  %v7195_v48 = vld [vmem:[%s10813_s8 + $0x5c4] sm:$0xf]  ;;  %v6536_v54 = vld [vmem:[%s10813_s8 + $0x5dc] sm:$0xf0] }
 0x303   :  { %4222 = vmatmul.bf16.vlgmr.msra.gmra.mxu2 %v9854_v28  ;;  %4235 = vmatmul.bf16.vlgmr.msra.gmra.mxu3 %v9856_v6  ;;  %v6539_v13 = vor.u32 %v7195_v48, %v6536_v54  ;;  %v7101_v48 = vld [vmem:[%s10813_s8 + $0x2d0] sm:$0xf0]  ;;  %v6402_v54 = vld [vmem:[%s10813_s8 + $0x4b0] sm:$0xf] }
 0x304   :  { %4266 = vmatpush.bf16.msrb.mxu2 %v6455_v59  ;;  %4279 = vmatpush.bf16.msrb.mxu3 %v6679_v62  ;;  %v7069_v59 = vld [vmem:[%s10813_s8 + $0x1d4] sm:$0xf]  ;;  %v6315_v62 = vor.u32 %v7139_v53, %v6312_v19  ;;  %v6655_v53 = vor.u32 %v7227_v45, %v6654_v44  ;;  %v6150_v19 = vld [vmem:[%s10813_s8 + $0x2b8] sm:$0xf]  ;;  %v7199_v44 = vld [vmem:[%s10813_s8 + $0x5e0] sm:$0xf0] }
 0x306   :  { %4242 = vmatpush.bf16.msrb.mxu0 %v5951_v27  ;;  %4255 = vmatpush.bf16.msrb.mxu1 %v6175_v16  ;;  %v7132_v27 = vld [vmem:[%s10813_s8 + $0x3cc] sm:$0xf]  ;;  %v6284_v16 = vld [vmem:[%s10813_s8 + $0x3e4] sm:$0xf0] }
 0x307   :  { %v6287_v14 = vor.u32 %v7132_v27, %v6284_v16  ;;  %v6374_v27 = vld [vmem:[%s10813_s8 + $0x478] sm:$0xf]  ;;  %v7157_v16 = vld [vmem:[%s10813_s8 + $0x490] sm:$0xf0] }
 0x308   :  { %4267 = vmatpush.bf16.msrb.mxu2 %v6427_v7  ;;  %4280 = vmatpush.bf16.msrb.mxu3 %v6651_v9  ;;  %v5811_v7 = vor.u32 %v7013_v61, %v5808_v57  ;;  %v6035_v9 = vor.u32 %v7069_v59, %v6032_v0  ;;  %v7220_v61 = vld [vmem:[%s10813_s8 + $0x688] sm:$0xf0]  ;;  %v2814_v57 = vperm.slane %v10655_v49, 0  ;;  %v7038_v0 = vld [vmem:[%s10813_s8 + $0xd8] sm:$0xf0] }
 0x30a   :  { %4243 = vmatpush.bf16.msrb.mxu0 %v5923_v34  ;;  %4256 = vmatpush.bf16.msrb.mxu1 %v6147_v15  ;;  %v6511_v34 = vor.u32 %v7188_v4, %v6508_v5  ;;  %v7115_v15 = vld [vmem:[%s10813_s8 + $0x340] sm:$0xf0]  ;;  %v6598_v4 = vld [vmem:[%s10813_s8 + $0x638] sm:$0xf]  ;;  %v7213_v5 = vld [vmem:[%s10813_s8 + $0x650] sm:$0xf0] }
 0x30b   :  { %v6207_v26 = vor.u32 %v7115_v15, %v6206_v63  ;;  %v7031_v63 = vld [vmem:[%s10813_s8 + $0xa0] sm:$0xf0]  ;;  %v6094_v15 = vld [vmem:[%s10813_s8 + $0x248] sm:$0xf] }
 0x30c   :  { %4268 = vmatpush.bf16.msrb.mxu2 %v6399_v23  ;;  %4281 = vmatpush.bf16.msrb.mxu3 %v6623_v43  ;;  %v7181_v23 = vld [vmem:[%s10813_s8 + $0x554] sm:$0xf]  ;;  %v6480_v43 = vld [vmem:[%s10813_s8 + $0x56c] sm:$0xf0] }
 0x30e   :  { %4244 = vmatpush.bf16.msrb.mxu0 %v5895_v29  ;;  %4257 = vmatpush.bf16.msrb.mxu1 %v6119_v37  ;;  %v6259_v29 = vor.u32 %v7125_v17, %v6256_v21  ;;  %v6483_v37 = vor.u32 %v7181_v23, %v6480_v43  ;;  %v7087_v17 = vld [vmem:[%s10813_s8 + $0x260] sm:$0xf0]  ;;  %v6346_v21 = vld [vmem:[%s10813_s8 + $0x440] sm:$0xf]  ;;  %v7150_v23 = vld [vmem:[%s10813_s8 + $0x458] sm:$0xf0] }
 0x30f   :  { %v6570_v43 = vld [vmem:[%s10813_s8 + $0x600] sm:$0xf] }
 0x310   :  { %4269 = vmatpush.bf16.msrb.mxu2 %v6371_v32  ;;  %4282 = vmatpush.bf16.msrb.mxu3 %v6595_v33  ;;  %v6459_v32 = vor.u32 %v7178_v20, %v6458_v8  ;;  %v6683_v33 = vor.u32 %v7234_v40, %v6682_v25  ;;  %v7206_v8 = vld [vmem:[%s10813_s8 + $0x618] sm:$0xf0]  ;;  %v5871_v25 = vor.u32 %v7031_v63, %v5870_v58 }
 0x311   :  { %v6095_v40 = vor.u32 %v7087_v17, %v6094_v15 }
 0x312   :  { %4245 = vmatpush.bf16.msrb.mxu0 %v5867_v46  ;;  %4258 = vmatpush.bf16.msrb.mxu1 %v6091_v47  ;;  %v5955_v46 = vor.u32 %v7052_v31, %v5954_v30  ;;  %v6179_v47 = vor.u32 %v7108_v38, %v6178_v35  ;;  %v6347_v30 = vor.u32 %v7150_v23, %v6346_v21  ;;  %v6318_v35 = vld [vmem:[%s10813_s8 + $0x408] sm:$0xf] }
 0x313   :  { %v6571_v31 = vor.u32 %v7206_v8, %v6570_v43 }
 0x314   :  { %4270 = vmatpush.bf16.msrb.mxu2 %v6343_v60  ;;  %4283 = vmatpush.bf16.msrb.mxu3 %v6567_v50  ;;  %v5926_v50 = vld [vmem:[%s10813_s8 + $0xf8] sm:$0xf] }
 0x315   :  { %v5927_v59 = vor.u32 %v7045_v51, %v5926_v50  ;;  %v6038_v50 = vld [vmem:[%s10813_s8 + $0x1d8] sm:$0xf] }
 0x316   :  { %4246 = vmatpush.bf16.msrb.mxu0 %v5839_v55  ;;  %4259 = vmatpush.bf16.msrb.mxu1 %v6063_v56  ;;  %v7164_v55 = vld [vmem:[%s10813_s8 + $0x4c8] sm:$0xf0]  ;;  %v6626_v56 = vld [vmem:[%s10813_s8 + $0x670] sm:$0xf] }
 0x317   :  { %v6403_v1 = vor.u32 %v7164_v55, %v6402_v54  ;;  %v6627_v3 = vor.u32 %v7220_v61, %v6626_v56  ;;  %v6290_v54 = vld [vmem:[%s10813_s8 + $0x3d0] sm:$0xf]  ;;  %v7136_v55 = vld [vmem:[%s10813_s8 + $0x3e8] sm:$0xf0] }
 0x318   :  { %4271 = vmatpush.bf16.msrb.mxu2 %v6315_v62  ;;  %4284 = vmatpush.bf16.msrb.mxu3 %v6539_v13  ;;  %v6151_v62 = vor.u32 %v7101_v48, %v6150_v19  ;;  %v5898_v13 = vld [vmem:[%s10813_s8 + $0xc0] sm:$0xf]  ;;  %v6543_v19 = vor.u32 %v7199_v44, %v6542_v42  ;;  %v7073_v48 = vld [vmem:[%s10813_s8 + $0x1f0] sm:$0xf0]  ;;  %v6514_v61 = vld [vmem:[%s10813_s8 + $0x590] sm:$0xf] }
 0x319   :  { %v3989_v24 = vpop.f32.mrf.mxu0  ;;  %v4002_v60 = vpop.f32.mrf.mxu1 }
 0x31a   :  { %4247 = vmatpush.bf16.msrb.mxu0 %v5811_v7  ;;  %4260 = vmatpush.bf16.msrb.mxu1 %v6035_v9  ;;  %v3990_v7 = vadd.f32 %v3989_v24, %v2814_v57  ;;  %v5899_v9 = vor.u32 %v7038_v0, %v5898_v13  ;;  %v5814_v24 = vld [vmem:[%s10813_s8 + $0x18] sm:$0xf]  ;;  %v7192_v57 = vld [vmem:[%s10813_s8 + $0x5a8] sm:$0xf0]  ;;  %v6039_v13 = vor.u32 %v7073_v48, %v6038_v50 }
 0x31c   :  { %4272 = vmatpush.bf16.msrb.mxu2 %v6287_v14  ;;  %4285 = vmatpush.bf16.msrb.mxu3 %v6511_v34  ;;  %v6375_v14 = vor.u32 %v7157_v16, %v6374_v27  ;;  %v6599_v34 = vor.u32 %v7213_v5, %v6598_v4  ;;  %v4003_v20 = vadd.f32 %v4002_v60, %v3990_v7  ;;  %v7017_v60 = vld [vmem:[%s10813_s8 + $0x30] sm:$0xf0]  ;;  %v6486_v16 = vld [vmem:[%s10813_s8 + $0x558] sm:$0xf] }
 0x31d   :  { %4248 = vmatmul.bf16.vlgmr.msrb.gmra.mxu0 %v9812_v52  ;;  %4261 = vmatmul.bf16.vlgmr.msrb.gmra.mxu1 %v9814_v18  ;;  %v7129_v27 = vld [vmem:[%s10813_s8 + $0x3b0] sm:$0xf0] }
 0x31e   :  { %4292 = vmatpush.bf16.msra.mxu0 %v6011_v10  ;;  %4305 = vmatpush.bf16.msra.mxu1 %v6235_v11  ;;  %v6123_v10 = vor.u32 %v7094_v2, %v6122_v36  ;;  %v6515_v36 = vor.u32 %v7192_v57, %v6514_v61  ;;  %v6262_v2 = vld [vmem:[%s10813_s8 + $0x398] sm:$0xf]  ;;  %v7185_v4 = vld [vmem:[%s10813_s8 + $0x570] sm:$0xf0] }
 0x320   :  { %4273 = vmatpush.bf16.msrb.mxu2 %v6259_v29  ;;  %4286 = vmatpush.bf16.msrb.mxu3 %v6483_v37 }
 0x321   :  { %v3991_v11 = vpop.f32.mrf.mxu0  ;;  %v4004_v12 = vpop.f32.mrf.mxu1 }
 0x322   :  { %4293 = vmatpush.bf16.msra.mxu0 %v5983_v41  ;;  %4306 = vmatpush.bf16.msra.mxu1 %v6207_v26  ;;  %v5842_v41 = vld [vmem:[%s10813_s8 + $0x50] sm:$0xf]  ;;  %v7024_v26 = vld [vmem:[%s10813_s8 + $0x68] sm:$0xf0]  ;;  %v6487_v11 = vor.u32 %v7185_v4, %v6486_v16 }
 0x323   :  { %4274 = vmatmul.bf16.vlgmr.msrb.gmra.mxu2 %v9854_v28  ;;  %4287 = vmatmul.bf16.vlgmr.msrb.gmra.mxu3 %v9856_v6 }
 0x324   :  { %4318 = vmatpush.bf16.msra.mxu2 %v6459_v32  ;;  %4331 = vmatpush.bf16.msra.mxu3 %v6683_v33  ;;  %v6066_v32 = vld [vmem:[%s10813_s8 + $0x210] sm:$0xf]  ;;  %v7080_v33 = vld [vmem:[%s10813_s8 + $0x228] sm:$0xf0]  ;;  %s7292_s8 = smov [#allocation2]  }
 0x325   :  { %s4493_s16 = sshll.u32 %s7292_s8, 4  ;;  %s4494_s16 = int_to_ptr.vmem [resolvable:$true] %s4493_s16 }
 0x326   :  { %4294 = vmatpush.bf16.msra.mxu0 %v5955_v46  ;;  %4307 = vmatpush.bf16.msra.mxu1 %v6179_v47  ;;  %v4015_v29 = vpop.f32.mrf.mxu2  ;;  %v4028_v37 = vpop.f32.mrf.mxu3  ;;  %v5843_v46 = vor.u32 %v7024_v26, %v5842_v41  ;;  %v6067_v47 = vor.u32 %v7080_v33, %v6066_v32 }
 0x327   :  { %v4016_v38 = vadd.f32 %v4015_v29, %v4003_v20 }
 0x328   :  { %4319 = vmatpush.bf16.msra.mxu2 %v6431_v22  ;;  %4332 = vmatpush.bf16.msra.mxu3 %v6655_v53  ;;  %v6319_v53 = vor.u32 %v7143_v39, %v6318_v35 }
 0x329   :  { %v4029_v45 = vadd.f32 %v4028_v37, %v4016_v38 }
 0x32a   :  { %4295 = vmatpush.bf16.msra.mxu0 %v5927_v59  ;;  %4308 = vmatpush.bf16.msra.mxu1 %v6151_v62  ;;  %v4041_v51 = vpop.f32.mrf.mxu0  ;;  %v4054_v22 = vpop.f32.mrf.mxu1  ;;  %v2815_v59 = vperm.slane %v10655_v49, 1  ;;  %v5815_v62 = vor.u32 %v7017_v60, %v5814_v24 }
 0x32b   :  { %v6684_v56 = vmul.f32 -1.442695, %v4029_v45 }
 0x32c   :  { %4320 = vmatpush.bf16.msra.mxu2 %v6403_v1  ;;  %4333 = vmatpush.bf16.msra.mxu3 %v6627_v3  ;;  %v6291_v3 = vor.u32 %v7136_v55, %v6290_v54  ;;  %v4042_v5 = vadd.f32 %v4041_v51, %v2815_v59 }
 0x32d   :  { %7238 = vpow2.f32 %v6684_v56 }
 0x32e   :  { %4296 = vmatpush.bf16.msra.mxu0 %v5899_v9  ;;  %4309 = vmatpush.bf16.msra.mxu1 %v6123_v10  ;;  %v4017_v0 = vpop.f32.mrf.mxu2  ;;  %v4030_v1 = vpop.f32.mrf.mxu3  ;;  %v6263_v10 = vor.u32 %v7129_v27, %v6262_v2  ;;  %v4055_v63 = vadd.f32 %v4054_v22, %v4042_v5 }
 0x32f   :  { %v2817_v0 = vperm.slane %v10655_v49, 3 }
 0x330   :  { %4321 = vmatpush.bf16.msra.mxu2 %v6375_v14  ;;  %4334 = vmatpush.bf16.msra.mxu3 %v6599_v34 }
 0x332   :  { %4297 = vmatpush.bf16.msra.mxu0 %v5871_v25  ;;  %4310 = vmatpush.bf16.msra.mxu1 %v6095_v40  ;;  %v4043_v7 = vpop.f32.mrf.mxu0  ;;  %v4056_v9 = vpop.f32.mrf.mxu1 }
 0x333   :  { %v7239_v12 = vpop.eup %7238 }
 0x334   :  { %4322 = vmatpush.bf16.msra.mxu2 %v6347_v30  ;;  %4335 = vmatpush.bf16.msra.mxu3 %v6571_v31  ;;  %v4365_v58 = vadd.f32 1.0, %v7239_v12 }
 0x336   :  { %4298 = vmatpush.bf16.msra.mxu0 %v5843_v46  ;;  %4311 = vmatpush.bf16.msra.mxu1 %v6067_v47  ;;  %7240 = vrcp.f32 %v4365_v58  ;;  %v4067_v14 = vpop.f32.mrf.mxu2  ;;  %v4080_v34 = vpop.f32.mrf.mxu3  ;;  %v4383_v41 = vand.u32 2147483648, %v4365_v58  ;;  %v4381_v29 = vand.u32 2147483647, %v4365_v58  ;;  %vm4377_vm1 = vweird.f32 %v4365_v58 }
 0x337   :  { %v4068_v15 = vadd.f32 %v4067_v14, %v4055_v63 }
 0x338   :  { %4323 = vmatpush.bf16.msra.mxu2 %v6319_v53  ;;  %4336 = vmatpush.bf16.msra.mxu3 %v6543_v19  ;;  %v4384_v32 = vor.u32 1.1754944e-38, %v4383_v41  ;;  %vm4382_vm3 = vcmp.eq.f32.partialorder %v4381_v29, 8.507059e+37 }
 0x339   :  { %v4081_v17 = vadd.f32 %v4080_v34, %v4068_v15 }
 0x33a   :  { %4299 = vmatpush.bf16.msra.mxu0 %v5815_v62  ;;  %4312 = vmatpush.bf16.msra.mxu1 %v6039_v13  ;;  %v4093_v21 = vpop.f32.mrf.mxu0  ;;  %v4106_v23 = vpop.f32.mrf.mxu1 }
 0x33b   :  { %v6685_v43 = vmul.f32 -1.442695, %v4081_v17 }
 0x33c   :  { %4324 = vmatpush.bf16.msra.mxu2 %v6291_v3  ;;  %4337 = vmatpush.bf16.msra.mxu3 %v6515_v36  ;;  %v7241_v8 = vpop.eup %7240 }
 0x33d   :  { %4300 = vmatmul.bf16.vlgmr.msra.gmra.mxu0 %v9812_v52  ;;  %4313 = vmatmul.bf16.vlgmr.msra.gmra.mxu1 %v9814_v18  ;;  %v4373_v20 = vmul.f32 %v7241_v8, %v4365_v58  ;;  %7242 = vpow2.f32 %v6685_v43  ;;  %v2816_v52 = vperm.slane %v10655_v49, 2  ;;  %vm4378_vm0 = vweird.f32 %v7241_v8 }
 0x33e   :  { %v4069_v18 = vpop.f32.mrf.mxu2  ;;  %v4082_v25 = vpop.f32.mrf.mxu3  ;;  %vm4379_vm2 = vmor %vm4377_vm1, %vm4378_vm0 }
 0x33f   :  { %v4374_v40 = vsub.f32 1.0, %v4373_v20  ;;  %v4094_v37 = vadd.f32 %v4093_v21, %v2816_v52  ;;  %v2818_v18 = vperm.slane %v10655_v49, 4 }
 0x340   :  { %4325 = vmatpush.bf16.msra.mxu2 %v6263_v10  ;;  %4338 = vmatpush.bf16.msra.mxu3 %v6487_v11 }
 0x341   :  { %v4375_v26 = vmul.f32 %v7241_v8, %v4374_v40  ;;  %v4107_v39 = vadd.f32 %v4106_v23, %v4094_v37 }
 0x342   :  { %v4095_v30 = vpop.f32.mrf.mxu0 }
 0x343   :  { %4326 = vmatmul.bf16.vlgmr.msra.gmra.mxu2 %v9854_v28  ;;  %4339 = vmatmul.bf16.vlgmr.msra.gmra.mxu3 %v9856_v6  ;;  %v4108_v28 = vpop.f32.mrf.mxu1  ;;  %v7243_v31 = vpop.eup %7242  ;;  %v4376_v6 = vadd.f32 %v7241_v8, %v4375_v26 }
 0x344   :  { %v4366_v33 = vadd.f32 1.0, %v7243_v31 }
 0x345   :  { %v4380_v35 = vsel %vm4379_vm2, %v7241_v8, %v4376_v6 }
 0x346   :  { %v4385_v38 = vsel %vm4382_vm3, %v4384_v32, %v4380_v35  ;;  %7244 = vrcp.f32 %v4366_v33  ;;  %v4119_v42 = vpop.f32.mrf.mxu2  ;;  %v4132_v44 = vpop.f32.mrf.mxu3  ;;  %v4398_v53 = vand.u32 2147483648, %v4366_v33  ;;  %v4396_v48 = vand.u32 2147483647, %v4366_v33 }
 0x347   :  { %4477 = vst [vmem:[#allocation2] sm:$0xff] %v4385_v38  ;;  %v4120_v45 = vadd.f32 %v4119_v42, %v4107_v39  ;;  %vm4392_vm5 = vweird.f32 %v4366_v33 }
 0x348   :  { %v4399_v56 = vor.u32 1.1754944e-38, %v4398_v53  ;;  %vm4397_vm7 = vcmp.eq.f32.partialorder %v4396_v48, 8.507059e+37  ;;  %v2819_v53 = vperm.slane %v10655_v49, 5 }
 0x349   :  { %v4133_v46 = vadd.f32 %v4132_v44, %v4120_v45 }
 0x34b   :  { %v6686_v24 = vmul.f32 -1.442695, %v4133_v46 }
 0x34c   :  { %v7245_v47 = vpop.eup %7244 }
 0x34d   :  { %v4388_v60 = vmul.f32 %v7245_v47, %v4366_v33  ;;  %7246 = vpow2.f32 %v6686_v24  ;;  %vm4393_vm4 = vweird.f32 %v7245_v47 }
 0x34e   :  { %v4121_v51 = vpop.f32.mrf.mxu2  ;;  %v4134_v22 = vpop.f32.mrf.mxu3  ;;  %vm4394_vm6 = vmor %vm4392_vm5, %vm4393_vm4 }
 0x34f   :  { %v4389_v50 = vsub.f32 1.0, %v4388_v60 }
 0x351   :  { %v4390_v19 = vmul.f32 %v7245_v47, %v4389_v50 }
 0x353   :  { %v4391_v54 = vadd.f32 %v7245_v47, %v4390_v19  ;;  %v7247_v55 = vpop.eup %7246 }
 0x354   :  { %v4367_v57 = vadd.f32 1.0, %v7247_v55 }
 0x355   :  { %v4395_v61 = vsel %vm4394_vm6, %v7245_v47, %v4391_v54 }
 0x356   :  { %v4400_v59 = vsel %vm4397_vm7, %v4399_v56, %v4395_v61  ;;  %7248 = vrcp.f32 %v4367_v57  ;;  %v4413_v4 = vand.u32 2147483648, %v4367_v57  ;;  %v4411_v7 = vand.u32 2147483647, %v4367_v57 }
 0x357   :  { %4478 = vst [vmem:[#allocation2 + $0x8] sm:$0xff] %v4400_v59  ;;  %vm4407_vm9 = vweird.f32 %v4367_v57 }
 0x358   :  { %v4414_v63 = vor.u32 1.1754944e-38, %v4413_v4  ;;  %vm4412_vm11 = vcmp.eq.f32.partialorder %v4411_v7, 8.507059e+37 }
 0x35a   :  { %v4145_v62 = vpop.f32.mrf.mxu0  ;;  %v4158_v13 = vpop.f32.mrf.mxu1 }
 0x35b   :  { %v4146_v36 = vadd.f32 %v4145_v62, %v2817_v0 }
 0x35c   :  { %v7249_v1 = vpop.eup %7248 }
 0x35d   :  { %v4403_v3 = vmul.f32 %v7249_v1, %v4367_v57  ;;  %vm4408_vm8 = vweird.f32 %v7249_v1  ;;  %v4159_v9 = vadd.f32 %v4158_v13, %v4146_v36 }
 0x35e   :  { %vm4409_vm10 = vmor %vm4407_vm9, %vm4408_vm8 }
 0x35f   :  { %v4404_v16 = vsub.f32 1.0, %v4403_v3 }
 0x361   :  { %v4405_v5 = vmul.f32 %v7249_v1, %v4404_v16 }
 0x362   :  { %v4147_v2 = vpop.f32.mrf.mxu0  ;;  %v4160_v27 = vpop.f32.mrf.mxu1 }
 0x363   :  { %v4406_v12 = vadd.f32 %v7249_v1, %v4405_v5 }
 0x365   :  { %v4410_v14 = vsel %vm4409_vm10, %v7249_v1, %v4406_v12 }
 0x366   :  { %v4171_v10 = vpop.f32.mrf.mxu2  ;;  %v4184_v11 = vpop.f32.mrf.mxu3  ;;  %v4415_v15 = vsel %vm4412_vm11, %v4414_v63, %v4410_v14  ;;  %v2820_v63 = vperm.slane %v10655_v49, 6  ;;  %vm4483_vm11 = vcmask 130048  }
 0x367   :  { %v4172_v58 = vadd.f32 %v4171_v10, %v4159_v9  ;;  %4479 = vst [vmem:[#allocation2 + $0x10] sm:$0xff] %v4415_v15 }
 0x369   :  { %v4185_v34 = vadd.f32 %v4184_v11, %v4172_v58 }
 0x36b   :  { %v6687_v17 = vmul.f32 -1.442695, %v4185_v34 }
 0x36d   :  { %7250 = vpow2.f32 %v6687_v17 }
 0x36e   :  { %v4173_v21 = vpop.f32.mrf.mxu2  ;;  %v4186_v23 = vpop.f32.mrf.mxu3 }
 0x373   :  { %v7251_v43 = vpop.eup %7250 }
 0x374   :  { %v4368_v8 = vadd.f32 1.0, %v7251_v43 }
 0x376   :  { %7252 = vrcp.f32 %v4368_v8  ;;  %v4428_v29 = vand.u32 2147483648, %v4368_v8  ;;  %v4426_v31 = vand.u32 2147483647, %v4368_v8  ;;  %vm4422_vm13 = vweird.f32 %v4368_v8 }
 0x378   :  { %v4429_v33 = vor.u32 1.1754944e-38, %v4428_v29  ;;  %vm4427_vm15 = vcmp.eq.f32.partialorder %v4426_v31, 8.507059e+37 }
 0x37a   :  { %v4197_v20 = vpop.f32.mrf.mxu0  ;;  %v4210_v52 = vpop.f32.mrf.mxu1 }
 0x37b   :  { %v4198_v26 = vadd.f32 %v4197_v20, %v2818_v18 }
 0x37c   :  { %v7253_v25 = vpop.eup %7252 }
 0x37d   :  { %v4418_v40 = vmul.f32 %v7253_v25, %v4368_v8  ;;  %vm4423_vm12 = vweird.f32 %v7253_v25  ;;  %v4211_v32 = vadd.f32 %v4210_v52, %v4198_v26 }
 0x37e   :  { %vm4424_vm14 = vmor %vm4422_vm13, %vm4423_vm12 }
 0x37f   :  { %v4419_v41 = vsub.f32 1.0, %v4418_v40 }
 0x381   :  { %v4420_v28 = vmul.f32 %v7253_v25, %v4419_v41 }
 0x382   :  { %v4199_v37 = vpop.f32.mrf.mxu0  ;;  %v4212_v30 = vpop.f32.mrf.mxu1 }
 0x383   :  { %v4421_v6 = vadd.f32 %v7253_v25, %v4420_v28 }
 0x385   :  { %v4425_v39 = vsel %vm4424_vm14, %v7253_v25, %v4421_v6 }
 0x386   :  { %v4223_v35 = vpop.f32.mrf.mxu2  ;;  %v4236_v38 = vpop.f32.mrf.mxu3  ;;  %v4430_v44 = vsel %vm4427_vm15, %v4429_v33, %v4425_v39 }
 0x387   :  { %v4224_v42 = vadd.f32 %v4223_v35, %v4211_v32  ;;  %4480 = vst [vmem:[#allocation2 + $0x18] sm:$0xff] %v4430_v44 }
 0x389   :  { %v4237_v45 = vadd.f32 %v4236_v38, %v4224_v42 }
 0x38b   :  { %v6688_v46 = vmul.f32 -1.442695, %v4237_v45 }
 0x38d   :  { %7254 = vpow2.f32 %v6688_v46 }
 0x38e   :  { %v4225_v47 = vpop.f32.mrf.mxu2  ;;  %v4238_v24 = vpop.f32.mrf.mxu3 }
 0x393   :  { %v7255_v60 = vpop.eup %7254 }
 0x394   :  { %v4369_v50 = vadd.f32 1.0, %v7255_v60 }
 0x396   :  { %7256 = vrcp.f32 %v4369_v50  ;;  %v4443_v56 = vand.u32 2147483648, %v4369_v50  ;;  %v4441_v62 = vand.u32 2147483647, %v4369_v50  ;;  %vm4437_vm1 = vweird.f32 %v4369_v50 }
 0x398   :  { %v4444_v1 = vor.u32 1.1754944e-38, %v4443_v56  ;;  %vm4442_vm3 = vcmp.eq.f32.partialorder %v4441_v62, 8.507059e+37 }
 0x39a   :  { %v4249_v51 = vpop.f32.mrf.mxu0  ;;  %v4262_v22 = vpop.f32.mrf.mxu1 }
 0x39b   :  { %v4250_v55 = vadd.f32 %v4249_v51, %v2819_v53 }
 0x39c   :  { %v7257_v19 = vpop.eup %7256 }
 0x39d   :  { %v4433_v48 = vmul.f32 %v7257_v19, %v4369_v50  ;;  %vm4438_vm0 = vweird.f32 %v7257_v19  ;;  %v4263_v0 = vadd.f32 %v4262_v22, %v4250_v55 }
 0x39e   :  { %vm4439_vm2 = vmor %vm4437_vm1, %vm4438_vm0 }
 0x39f   :  { %v4434_v54 = vsub.f32 1.0, %v4433_v48 }
 0x3a1   :  { %v4435_v59 = vmul.f32 %v7257_v19, %v4434_v54 }
 0x3a2   :  { %v4251_v61 = vpop.f32.mrf.mxu0  ;;  %v4264_v57 = vpop.f32.mrf.mxu1 }
 0x3a3   :  { %v4436_v13 = vadd.f32 %v7257_v19, %v4435_v59 }
 0x3a5   :  { %v4440_v2 = vsel %vm4439_vm2, %v7257_v19, %v4436_v13 }
 0x3a6   :  { %v4275_v3 = vpop.f32.mrf.mxu2  ;;  %v4288_v36 = vpop.f32.mrf.mxu3  ;;  %v4445_v16 = vsel %vm4442_vm3, %v4444_v1, %v4440_v2 }
 0x3a7   :  { %v4276_v27 = vadd.f32 %v4275_v3, %v4263_v0  ;;  %4481 = vst [vmem:[#allocation2 + $0x20] sm:$0xff] %v4445_v16 }
 0x3a9   :  { %v4289_v4 = vadd.f32 %v4288_v36, %v4276_v27 }
 0x3ab   :  { %v6689_v5 = vmul.f32 -1.442695, %v4289_v4 }
 0x3ad   :  { %7258 = vpow2.f32 %v6689_v5 }
 0x3ae   :  { %v4277_v7 = vpop.f32.mrf.mxu2  ;;  %v4290_v9 = vpop.f32.mrf.mxu3 }
 0x3b3   :  { %v7259_v10 = vpop.eup %7258 }
 0x3b4   :  { %v4370_v11 = vadd.f32 1.0, %v7259_v10 }
 0x3b6   :  { %7260 = vrcp.f32 %v4370_v11  ;;  %v4458_v21 = vand.u32 2147483648, %v4370_v11  ;;  %v4456_v20 = vand.u32 2147483647, %v4370_v11  ;;  %vm4452_vm5 = vweird.f32 %v4370_v11 }
 0x3b8   :  { %v4459_v41 = vor.u32 1.1754944e-38, %v4458_v21  ;;  %vm4457_vm7 = vcmp.eq.f32.partialorder %v4456_v20, 8.507059e+37 }
 0x3ba   :  { %v4301_v12 = vpop.f32.mrf.mxu0  ;;  %v4314_v58 = vpop.f32.mrf.mxu1 }
 0x3bb   :  { %v4302_v15 = vadd.f32 %v4301_v12, %v2820_v63 }
 0x3bc   :  { %v7261_v14 = vpop.eup %7260 }
 0x3bd   :  { %v4448_v34 = vmul.f32 %v7261_v14, %v4370_v11  ;;  %vm4453_vm4 = vweird.f32 %v7261_v14  ;;  %v4315_v52 = vadd.f32 %v4314_v58, %v4302_v15 }
 0x3be   :  { %vm4454_vm6 = vmor %vm4452_vm5, %vm4453_vm4 }
 0x3bf   :  { %v4449_v17 = vsub.f32 1.0, %v4448_v34 }
 0x3c1   :  { %v4450_v8 = vmul.f32 %v7261_v14, %v4449_v17 }
 0x3c2   :  { %v4303_v23 = vpop.f32.mrf.mxu0  ;;  %v4316_v43 = vpop.f32.mrf.mxu1 }
 0x3c3   :  { %v4451_v18 = vadd.f32 %v7261_v14, %v4450_v8 }
 0x3c5   :  { %v4455_v29 = vsel %vm4454_vm6, %v7261_v14, %v4451_v18 }
 0x3c6   :  { %v4327_v25 = vpop.f32.mrf.mxu2  ;;  %v4340_v40 = vpop.f32.mrf.mxu3  ;;  %v4460_v49 = vsel %vm4457_vm7, %v4459_v41, %v4455_v29 }
 0x3c7   :  { %v4328_v26 = vadd.f32 %v4327_v25, %v4315_v52  ;;  %4482 = vst [vmem:[#allocation2 + $0x28] sm:$0xff] %v4460_v49 }
 0x3c9   :  { %v4341_v37 = vadd.f32 %v4340_v40, %v4328_v26 }
 0x3cb   :  { %v6690_v30 = vmul.f32 -1.442695, %v4341_v37 }
 0x3cd   :  { %7262 = vpow2.f32 %v6690_v30 }
 0x3ce   :  { %v4329_v28 = vpop.f32.mrf.mxu2  ;;  %v4342_v31 = vpop.f32.mrf.mxu3 }
 0x3d3   :  { %v7263_v6 = vpop.eup %7262 }
 0x3d4   :  { %v4371_v32 = vadd.f32 1.0, %v7263_v6 }
 0x3d6   :  { %7264 = vrcp.f32 %v4371_v32  ;;  %v4473_v39 = vand.u32 2147483648, %v4371_v32  ;;  %v4471_v44 = vand.u32 2147483647, %v4371_v32  ;;  %vm4467_vm9 = vweird.f32 %v4371_v32 }
 0x3d8   :  { %v4474_v46 = vor.u32 1.1754944e-38, %v4473_v39  ;;  %vm4472_vm12 = vcmp.eq.f32.partialorder %v4471_v44, 8.507059e+37 }
 0x3dc   :  { %v7265_v33 = vpop.eup %7264 }
 0x3dd   :  { %v4463_v35 = vmul.f32 %v7265_v33, %v4371_v32  ;;  %vm4468_vm8 = vweird.f32 %v7265_v33 }
 0x3de   :  { %vm4469_vm10 = vmor %vm4467_vm9, %vm4468_vm8 }
 0x3df   :  { %v4464_v38 = vsub.f32 1.0, %v4463_v35 }
 0x3e1   :  { %v4465_v42 = vmul.f32 %v7265_v33, %v4464_v38 }
 0x3e3   :  { %v4466_v45 = vadd.f32 %v7265_v33, %v4465_v42 }
 0x3e5   :  { %v4470_v47 = vsel %vm4469_vm10, %v7265_v33, %v4466_v45 }
 0x3e6   :  { %v4475_v24 = vsel %vm4472_vm12, %v4474_v46, %v4470_v47 }
 0x3e7   :  { %4484 = vst.msk [vmem:[#allocation2 + $0x30] sm:$0xff] %vm4483_vm11, %v4475_v24 }
 0x3e8   :  { %4498 = dma.vmem_to_hbm [thread:$0]  %s4494_s16, 896, %s4496_s18, [#allocation3]  }
 0x3e9   :  { %7290 = dma.done.wait [#allocation3], 896  }
 0x3ea   :  { %7291 = vsyncadd [#allocation3], 4294966400 }
 0x3eb   :  { %4507 = vsyncpa [#allocation3], 1 }

</bundles_post_ra>
